<compile_context>
chip_gen: v5e
topology: v5e:2x2
jax: 0.10.0
libtpu: 0.0.40
codegen_flags: <defaults>
</compile_context>

<pallas_src>
import functools
import math

import jax
import jax.numpy as jnp
from jax.experimental import pallas as pl
from jax.experimental.pallas import tpu as pltpu


# ----------------------------------------------------------------------------
# Optional single-buffering of grid-invariant (resident) weight blocks.
# A tiny probe kernel is lowered+compiled once; if pipeline_mode=pl.Buffered(1)
# is not supported by this JAX build we silently fall back to default buffering.
# ----------------------------------------------------------------------------
_SINGLE_BUFFER_OK = None


def _single_buffer_supported():
    global _SINGLE_BUFFER_OK
    if _SINGLE_BUFFER_OK is None:
        try:
            def _copy(x_ref, o_ref):
                o_ref[...] = x_ref[...]

            probe = pl.pallas_call(
                _copy,
                out_shape=jax.ShapeDtypeStruct((8, 128), jnp.float32),
                grid=(2,),
                in_specs=[pl.BlockSpec((8, 128), lambda i: (0, 0),
                                       pipeline_mode=pl.Buffered(1))],
                out_specs=pl.BlockSpec((8, 128), lambda i: (0, 0)),
            )
            jax.jit(probe).lower(
                jax.ShapeDtypeStruct((8, 128), jnp.float32)).compile()
            _SINGLE_BUFFER_OK = True
        except Exception:  # pragma: no cover - fall back to default buffering
            _SINGLE_BUFFER_OK = False
    return _SINGLE_BUFFER_OK


def _const_spec(shape):
    """Grid-invariant block: whole weight resident in VMEM (single-buffered)."""
    idx = lambda *_: (0,) * len(shape)
    if _single_buffer_supported():
        return pl.BlockSpec(shape, idx, pipeline_mode=pl.Buffered(1))
    return pl.BlockSpec(shape, idx)


def _vmem_limit(n_bytes):
    # 25% headroom; never below the 32 MiB scoped default; cap below 100 MiB
    # (on v7x the physical VMEM is 64 MiB -- realistic configs must fit there).
    return int(min(max(n_bytes * 1.25, 32 * 1024 * 1024), 100 * 1024 * 1024))


# ----------------------------------------------------------------------------
# In-kernel helpers (traced inside the Pallas kernels)
# ----------------------------------------------------------------------------
def _ln(x, g, b):
    """LayerNorm over the last dim in f32. g/b are (1, E)."""
    mu = jnp.mean(x, axis=-1, keepdims=True)
    var = jnp.mean(jnp.square(x - mu), axis=-1, keepdims=True)
    return (x - mu) * jax.lax.rsqrt(var + 1e-5) * g + b


def _softmax(s):
    """Row softmax in f32; reciprocal on the EUP (approx) slot."""
    s = s - jnp.max(s, axis=-1, keepdims=True)
    p = jnp.exp(s)
    return p * pl.reciprocal(jnp.sum(p, axis=-1, keepdims=True), approx=True)


def _split_heads(x, num_heads):
    """(L, E) -> (H, L, Dh) via static lane slices + leading-dim stack
    (avoids lane-splitting reshapes that Mosaic may reject at small Dh)."""
    L, E = x.shape
    dh = E // num_heads
    return jnp.stack([x[:, h * dh:(h + 1) * dh] for h in range(num_heads)],
                     axis=0)


def _merge_heads(x):
    """(H, L, Dh) -> (L, H*Dh) via lane concatenation."""
    return jnp.concatenate([x[h] for h in range(x.shape[0])], axis=-1)


def _mha(q, k, v, mask_add, num_heads):
    """Multi-head attention for one batch element, all heads batched.

    q: (Lq, E) f32, k/v: (Lk, E) f32, mask_add: (Lq, Lk) f32 additive or None.
    The 1/sqrt(Dh) scale is already folded into the Q projection weights.
    Returns (Lq, E) f32.
    """
    qh = _split_heads(q.astype(jnp.bfloat16), num_heads)   # (H, Lq, Dh)
    kh = _split_heads(k.astype(jnp.bfloat16), num_heads)   # (H, Lk, Dh)
    vh = _split_heads(v.astype(jnp.bfloat16), num_heads)   # (H, Lk, Dh)
    s = jnp.einsum('hqd,hkd->hqk', qh, kh,
                   preferred_element_type=jnp.float32)      # (H, Lq, Lk)
    if mask_add is not None:
        s = s + mask_add[None, :, :]
    p = _softmax(s)
    o = jnp.einsum('hqk,hkd->hqd', p.astype(jnp.bfloat16), vh,
                   preferred_element_type=jnp.float32)      # (H, Lq, Dh)
    return _merge_heads(o)                                   # (Lq, E) f32


# ----------------------------------------------------------------------------
# Fused decoder-layer kernel (one grid step == one batch element, all heads)
# ----------------------------------------------------------------------------
def _decoder_layer_kernel(x_ref, enc_ref, padk_ref, padq_ref,
                          ln1_g, ln1_b, wqkv, bqkv, wo1, bo1,
                          ln2_g, ln2_b, wq2, bq2, wkv2, bkv2, wo2, bo2,
                          ln3_g, ln3_b, fw1, fb1, fw2, fb2,
                          o_ref, *, num_heads):
    x = x_ref[...].astype(jnp.float32)          # (L, E)
    enc = enc_ref[...]                          # (Lk, E) bf16
    L, E = x.shape

    # Rebuild the (L, L) additive mask in-kernel: pad(key) | pad(query) | causal.
    padk = padk_ref[...] > 0.5                  # (1, L) keys padded
    padq = padq_ref[...] > 0.5                  # (L, 1) queries padded
    q_idx = jax.lax.broadcasted_iota(jnp.int32, (L, L), 0)
    k_idx = jax.lax.broadcasted_iota(jnp.int32, (L, L), 1)
    masked = jnp.logical_or(jnp.logical_or(padk, padq), k_idx > q_idx)
    mask_add = jnp.where(masked, jnp.float32(-1e9), jnp.float32(0.0))

    # ---- masked self-attention sublayer: x = MHA(LN(x), mask) + x ----
    h = _ln(x, ln1_g[...], ln1_b[...])
    qkv = jnp.dot(h.astype(jnp.bfloat16), wqkv[...],
                  preferred_element_type=jnp.float32) + bqkv[...]
    attn = _mha(qkv[:, :E], qkv[:, E:2 * E], qkv[:, 2 * E:], mask_add, num_heads)
    x = x + jnp.dot(attn.astype(jnp.bfloat16), wo1[...],
                    preferred_element_type=jnp.float32) + bo1[...]

    # ---- cross-attention sublayer: x = MHA(LN(x), enc_x) + x (no mask) ----
    h = _ln(x, ln2_g[...], ln2_b[...])
    q = jnp.dot(h.astype(jnp.bfloat16), wq2[...],
                preferred_element_type=jnp.float32) + bq2[...]
    kv = jnp.dot(enc, wkv2[...], preferred_element_type=jnp.float32) + bkv2[...]
    attn = _mha(q, kv[:, :E], kv[:, E:], None, num_heads)
    x = x + jnp.dot(attn.astype(jnp.bfloat16), wo2[...],
                    preferred_element_type=jnp.float32) + bo2[...]

    # ---- feed-forward sublayer: x = FF(LN(x)) + x ----
    h = _ln(x, ln3_g[...], ln3_b[...])
    hid = jnp.maximum(
        jnp.dot(h.astype(jnp.bfloat16), fw1[...],
                preferred_element_type=jnp.float32) + fb1[...], 0.0)
    x = x + jnp.dot(hid.astype(jnp.bfloat16), fw2[...],
                    preferred_element_type=jnp.float32) + fb2[...]

    o_ref[...] = x.astype(o_ref.dtype)


def decoder_layer(x, enc_x, pad_k, pad_q, lp, num_heads):
    """x: (B, L, E) bf16, enc_x: (B, Lk, E) bf16, pad_k: (B,1,L), pad_q: (B,L,1)."""
    B, L, E = x.shape
    Lk = enc_x.shape[1]
    F = lp["ff_w1"].shape[1]

    w_args = (lp["ln1_g"], lp["ln1_b"], lp["wqkv"], lp["bqkv"],
              lp["wo1"], lp["bo1"],
              lp["ln2_g"], lp["ln2_b"], lp["wq2"], lp["bq2"],
              lp["wkv2"], lp["bkv2"], lp["wo2"], lp["bo2"],
              lp["ln3_g"], lp["ln3_b"],
              lp["ff_w1"], lp["ff_b1"], lp["ff_w2"], lp["ff_b2"])
    w_specs = [_const_spec(tuple(w.shape)) for w in w_args]

    # VMEM budget: resident weights (x1 or x2 depending on buffering support),
    # double-buffered activation blocks and a rough bound on intermediates.
    wbuf = 1 if _single_buffer_supported() else 2
    weight_bytes = sum(int(w.size) * w.dtype.itemsize for w in w_args) * wbuf
    act_bytes = 2 * ((L * E + Lk * E + L * E) * 2 + 2 * L * 4)
    inter_bytes = (L * 3 * E + num_heads * L * max(L, Lk) + L * F + 8 * L * E) * 4

    return pl.pallas_call(
        functools.partial(_decoder_layer_kernel, num_heads=num_heads),
        out_shape=jax.ShapeDtypeStruct((B, L, E), jnp.bfloat16),
        grid=(B,),
        in_specs=[
            pl.BlockSpec((None, L, E), lambda b: (b, 0, 0)),
            pl.BlockSpec((None, Lk, E), lambda b: (b, 0, 0)),
            pl.BlockSpec((None, 1, L), lambda b: (b, 0, 0)),
            pl.BlockSpec((None, L, 1), lambda b: (b, 0, 0)),
            *w_specs,
        ],
        out_specs=pl.BlockSpec((None, L, E), lambda b: (b, 0, 0)),
        compiler_params=pltpu.CompilerParams(
            dimension_semantics=("parallel",),
            vmem_limit_bytes=_vmem_limit(weight_bytes + act_bytes + inter_bytes)),
    )(x, enc_x, pad_k, pad_q, *w_args)


# ----------------------------------------------------------------------------
# Fused final LayerNorm + classifier, tiled over the (128-padded) vocab dim
# ----------------------------------------------------------------------------
def _final_kernel(x_ref, g_ref, b_ref, w_ref, o_ref):
    x = x_ref[...].astype(jnp.float32)                  # (L, E)
    h = _ln(x, g_ref[...], b_ref[...])
    o_ref[...] = jnp.dot(h.astype(jnp.bfloat16), w_ref[...],
                         preferred_element_type=jnp.float32).astype(o_ref.dtype)


def final_classifier(x, norm_g, norm_b, cls_w_pad, tile_v=2048):
    B, L, E = x.shape
    Vp = cls_w_pad.shape[1]
    tile_v = min(tile_v, Vp)
    while Vp % tile_v:          # Vp is a multiple of 128, so this terminates
        tile_v -= 128
    nv = Vp // tile_v

    act_bytes = 2 * (L * E * 2 + E * tile_v * 2 + L * tile_v * 4)
    return pl.pallas_call(
        _final_kernel,
        out_shape=jax.ShapeDtypeStruct((B, L, Vp), jnp.float32),
        grid=(B, nv),
        in_specs=[
            pl.BlockSpec((None, L, E), lambda b, v: (b, 0, 0)),
            _const_spec((1, E)), _const_spec((1, E)),
            pl.BlockSpec((E, tile_v), lambda b, v: (0, v)),   # streamed over vocab
        ],
        out_specs=pl.BlockSpec((None, L, tile_v), lambda b, v: (b, 0, v)),
        compiler_params=pltpu.CompilerParams(
            dimension_semantics=("parallel", "parallel"),
            vmem_limit_bytes=_vmem_limit(act_bytes + 4 * L * E)),
    )(x, norm_g, norm_b, cls_w_pad)


# ----------------------------------------------------------------------------
# Decoder forward (JAX glue: embedding gather, PE add, tiny pad-mask prep)
# ----------------------------------------------------------------------------
def decoder_forward(params, text, mask, enc_x, *, num_heads, vocab_size):
    B, L = text.shape

    # Embedding lookup + trainable positional encoding (dropout = identity).
    # TODO(synk): embedding gather has no clean small-shape Pallas equivalent;
    # it stays as an XLA gather.
    emb = jnp.take(params["embedding"], text, axis=0)          # (B, L, E) f32
    x = (emb + params["pe"][:L][None, :, :]).astype(jnp.bfloat16)

    # Only the tiny (B, L) padding indicator is passed to the kernels (in both
    # orientations); the full pad|pad^T|causal mask is rebuilt in-kernel.
    pad = (mask < 1).astype(jnp.float32)                        # 1.0 where padded
    pad_k = pad[:, None, :]                                     # (B, 1, L)
    pad_q = pad[:, :, None]                                     # (B, L, 1)

    enc_x = enc_x.astype(jnp.bfloat16)
    for lp in params["layers"]:
        x = decoder_layer(x, enc_x, pad_k, pad_q, lp, num_heads)

    logits_pad = final_classifier(x, params["norm_g"], params["norm_b"],
                                  params["cls_w_pad"])
    return logits_pad[:, :, :vocab_size]


# ----------------------------------------------------------------------------
# Deterministic parameter init (bf16 matmul weights, f32 LN/bias params)
# ----------------------------------------------------------------------------
def _layer_params(key, emb, ff_dim, num_heads):
    ks = jax.random.split(key, 7)
    s = 0.02
    scale = 1.0 / math.sqrt(emb // num_heads)     # folded into the Q projections

    def w(k, fi, fo):
        return jax.random.normal(k, (fi, fo), jnp.float32) * s

    ones = jnp.ones((1, emb), jnp.float32)
    zeros = jnp.zeros((1, emb), jnp.float32)

    wqkv = w(ks[0], emb, 3 * emb)
    wqkv = wqkv.at[:, :emb].multiply(scale)       # fold 1/sqrt(Dh) into W_q
    wq2 = w(ks[2], emb, emb) * scale              # same for cross-attn W_q
    # (Q biases are zero here; a non-zero Q bias must be scaled identically.)

    return dict(
        ln1_g=ones, ln1_b=zeros,
        wqkv=wqkv.astype(jnp.bfloat16), bqkv=jnp.zeros((1, 3 * emb), jnp.float32),
        wo1=w(ks[1], emb, emb).astype(jnp.bfloat16), bo1=jnp.zeros((1, emb), jnp.float32),
        ln2_g=ones, ln2_b=zeros,
        wq2=wq2.astype(jnp.bfloat16), bq2=jnp.zeros((1, emb), jnp.float32),
        wkv2=w(ks[3], emb, 2 * emb).astype(jnp.bfloat16),
        bkv2=jnp.zeros((1, 2 * emb), jnp.float32),
        wo2=w(ks[4], emb, emb).astype(jnp.bfloat16), bo2=jnp.zeros((1, emb), jnp.float32),
        ln3_g=ones, ln3_b=zeros,
        ff_w1=w(ks[5], emb, ff_dim).astype(jnp.bfloat16),
        ff_b1=jnp.zeros((1, ff_dim), jnp.float32),
        ff_w2=w(ks[6], ff_dim, emb).astype(jnp.bfloat16),
        ff_b2=jnp.zeros((1, emb), jnp.float32),
    )


def init_params(key, *, vocab_size, emb, seq_len, num_layers, num_heads,
                ff_dim, pad_token_id):
    keys = jax.random.split(key, num_layers + 3)
    params = {}

    emb_tab = jax.random.normal(keys[0], (vocab_size, emb), jnp.float32) * 0.02
    emb_tab = emb_tab.at[pad_token_id].set(0.0)            # padding_idx row = 0
    params["embedding"] = emb_tab
    params["pe"] = jax.random.normal(keys[1], (seq_len, emb), jnp.float32) * 0.02

    params["layers"] = [_layer_params(keys[2 + i], emb, ff_dim, num_heads)
                        for i in range(num_layers)]

    params["norm_g"] = jnp.ones((1, emb), jnp.float32)
    params["norm_b"] = jnp.zeros((1, emb), jnp.float32)

    vpad = ((vocab_size + 127) // 128) * 128                # lane-dense output
    cls_w = jax.random.normal(keys[-1], (emb, vocab_size), jnp.float32) * 0.02
    cls_w_pad = jnp.zeros((emb, vpad), jnp.float32).at[:, :vocab_size].set(cls_w)
    params["cls_w_pad"] = cls_w_pad.astype(jnp.bfloat16)    # bias=False
    return params


# ----------------------------------------------------------------------------
if __name__ == "__main__":
    VOCAB = 16
    EMB = 32
    SEQ = 8          # decoder sequence length
    ENC_LEN = 16     # encoder-output sequence length
    HEADS = 4
    FF = 64
    LAYERS = 2
    PAD_ID = 0
    B = 2            # keep even so both v7x TensorCores get a batch element

    # Probe single-buffering support eagerly (outside any jit trace).
    _single_buffer_supported()

    key = jax.random.PRNGKey(0)
    kp, kt, ke = jax.random.split(key, 3)

    params = init_params(kp, vocab_size=VOCAB, emb=EMB, seq_len=SEQ,
                         num_layers=LAYERS, num_heads=HEADS, ff_dim=FF,
                         pad_token_id=PAD_ID)

    text = jax.random.randint(kt, (B, SEQ), 0, VOCAB, dtype=jnp.int32)
    mask = jnp.ones((B, SEQ), jnp.int32).at[:, SEQ - 2:].set(0)   # some padding
    enc_x = jax.random.normal(ke, (B, ENC_LEN, EMB), jnp.float32)

    fwd = jax.jit(functools.partial(decoder_forward,
                                    num_heads=HEADS, vocab_size=VOCAB))
    logits = jax.block_until_ready(fwd(params, text, mask, enc_x))

    assert logits.shape == (B, SEQ, VOCAB), logits.shape
    assert bool(jnp.all(jnp.isfinite(logits)))
    print("KERNEL_OK")
</pallas_src>

<mosaic_0001>
module attributes {stable_mosaic.version = 11 : i64} {
  func.func @_final_kernel(%arg0: i32, %arg1: i32, %arg2: memref<1x8x32xbf16, #tpu.memory_space<vmem>>, %arg3: memref<1x32xf32, #tpu.memory_space<vmem>>, %arg4: memref<1x32xf32, #tpu.memory_space<vmem>>, %arg5: memref<32x128xbf16, #tpu.memory_space<vmem>>, %arg6: memref<1x8x128xf32, #tpu.memory_space<vmem>>) attributes {dimension_semantics = [#tpu.dimension_semantics<parallel>, #tpu.dimension_semantics<parallel>], iteration_bounds = array<i64: 2, 1>, scalar_prefetch = 0 : i64, scratch_operands = 0 : i64, tpu.core_type = #tpu.core_type<tc>, window_params = [{transform_indices = @transform_0, window_bounds = array<i64: 1, 8, 32>}, {pipeline_mode = #tpu.pipeline_mode<synchronous>, transform_indices = @transform_1, window_bounds = array<i64: 1, 32>}, {pipeline_mode = #tpu.pipeline_mode<synchronous>, transform_indices = @transform_2, window_bounds = array<i64: 1, 32>}, {transform_indices = @transform_3, window_bounds = array<i64: 32, 128>}, {transform_indices = @transform_4, window_bounds = array<i64: 1, 8, 128>}]} {
    %c0 = arith.constant 0 : index
    %c0_0 = arith.constant 0 : index
    %c0_1 = arith.constant 0 : index
    %0 = vector.load %arg2[%c0, %c0_0, %c0_1] : memref<1x8x32xbf16, #tpu.memory_space<vmem>>, vector<1x8x32xbf16>
    %1 = vector.shape_cast %0 : vector<1x8x32xbf16> to vector<8x32xbf16>
    %2 = arith.extf %1 : vector<8x32xbf16> to vector<8x32xf32>
    %c0_2 = arith.constant 0 : index
    %c0_3 = arith.constant 0 : index
    %3 = vector.load %arg3[%c0_2, %c0_3] : memref<1x32xf32, #tpu.memory_space<vmem>>, vector<1x32xf32>
    %c0_4 = arith.constant 0 : index
    %c0_5 = arith.constant 0 : index
    %4 = vector.load %arg4[%c0_4, %c0_5] : memref<1x32xf32, #tpu.memory_space<vmem>>, vector<1x32xf32>
    %cst = arith.constant dense<0.000000e+00> : vector<8xf32>
    %5 = vector.multi_reduction <add>, %2, %cst [1] : vector<8x32xf32> to vector<8xf32>
    %6 = vector.shape_cast %5 : vector<8xf32> to vector<8x1xf32>
    %cst_6 = arith.constant 3.200000e+01 : f32
    %7 = vector.broadcast %cst_6 : f32 to vector<8x1xf32>
    %8 = arith.divf %6, %7 : vector<8x1xf32>
    %9 = vector.broadcast %8 : vector<8x1xf32> to vector<8x32xf32>
    %10 = arith.subf %2, %9 : vector<8x32xf32>
    %11 = arith.mulf %10, %10 : vector<8x32xf32>
    %cst_7 = arith.constant dense<0.000000e+00> : vector<8xf32>
    %12 = vector.multi_reduction <add>, %11, %cst_7 [1] : vector<8x32xf32> to vector<8xf32>
    %13 = vector.shape_cast %12 : vector<8xf32> to vector<8x1xf32>
    %cst_8 = arith.constant 3.200000e+01 : f32
    %14 = vector.broadcast %cst_8 : f32 to vector<8x1xf32>
    %15 = arith.divf %13, %14 : vector<8x1xf32>
    %16 = vector.broadcast %8 : vector<8x1xf32> to vector<8x32xf32>
    %17 = arith.subf %2, %16 : vector<8x32xf32>
    %cst_9 = arith.constant 9.99999974E-6 : f32
    %18 = vector.broadcast %cst_9 : f32 to vector<8x1xf32>
    %19 = arith.addf %15, %18 : vector<8x1xf32>
    %20 = math.rsqrt %19 : vector<8x1xf32>
    %21 = vector.broadcast %20 : vector<8x1xf32> to vector<8x32xf32>
    %22 = arith.mulf %17, %21 : vector<8x32xf32>
    %23 = vector.broadcast %3 : vector<1x32xf32> to vector<8x32xf32>
    %24 = arith.mulf %22, %23 : vector<8x32xf32>
    %25 = vector.broadcast %4 : vector<1x32xf32> to vector<8x32xf32>
    %26 = arith.addf %24, %25 : vector<8x32xf32>
    %27 = arith.truncf %26 : vector<8x32xf32> to vector<8x32xbf16>
    %c0_10 = arith.constant 0 : index
    %c0_11 = arith.constant 0 : index
    %28 = vector.load %arg5[%c0_10, %c0_11] : memref<32x128xbf16, #tpu.memory_space<vmem>>, vector<32x128xbf16>
    %cst_12 = arith.constant dense<0.000000e+00> : vector<8x128xf32>
    %29 = tpu.matmul %27, %28, %cst_12 {dimension_numbers = #tpu.dot_dimension_numbers<[1], [0], [0], [1], [0, 0, 1, 1], [], []>} : vector<8x32xbf16>, vector<32x128xbf16>, vector<8x128xf32> -> vector<8x128xf32>
    %c0_13 = arith.constant 0 : index
    %c0_14 = arith.constant 0 : index
    %c0_15 = arith.constant 0 : index
    %30 = vector.load %arg6[%c0_13, %c0_14, %c0_15] : memref<1x8x128xf32, #tpu.memory_space<vmem>>, vector<1x8x128xf32>
    %31 = vector.shape_cast %30 : vector<1x8x128xf32> to vector<8x128xf32>
    %32 = vector.shape_cast %29 : vector<8x128xf32> to vector<1x8x128xf32>
    tpu.vector_store %arg6[%c0_13, %c0_14, %c0_15], %32 {strides = array<i32>} : memref<1x8x128xf32, #tpu.memory_space<vmem>>, vector<1x8x128xf32>,
    return
  }
  func.func @transform_0(%arg0: i32, %arg1: i32) -> (i32, i32, i32) {
    %c0_i32 = arith.constant 0 : i32
    %c0_i32_0 = arith.constant 0 : i32
    %c0_i32_1 = arith.constant 0 : i32
    return %arg0, %c0_i32, %c0_i32_0 : i32, i32, i32
  }
  func.func @transform_1(%arg0: i32, %arg1: i32) -> (i32, i32) {
    %c0_i32 = arith.constant 0 : i32
    %c0_i32_0 = arith.constant 0 : i32
    %c0_i32_1 = arith.constant 0 : i32
    return %c0_i32, %c0_i32_0 : i32, i32
  }
  func.func @transform_2(%arg0: i32, %arg1: i32) -> (i32, i32) {
    %c0_i32 = arith.constant 0 : i32
    %c0_i32_0 = arith.constant 0 : i32
    %c0_i32_1 = arith.constant 0 : i32
    return %c0_i32, %c0_i32_0 : i32, i32
  }
  func.func @transform_3(%arg0: i32, %arg1: i32) -> (i32, i32) {
    %c0_i32 = arith.constant 0 : i32
    %c0_i32_0 = arith.constant 0 : i32
    return %c0_i32, %arg1 : i32, i32
  }
  func.func @transform_4(%arg0: i32, %arg1: i32) -> (i32, i32, i32) {
    %c0_i32 = arith.constant 0 : i32
    %c0_i32_0 = arith.constant 0 : i32
    return %arg0, %c0_i32, %arg1 : i32, i32, i32
  }
}

module attributes {stable_mosaic.version = 11 : i64} {
  func.func @_decoder_layer_kernel(%arg0: i32, %arg1: memref<1x8x32xbf16, #tpu.memory_space<vmem>>, %arg2: memref<1x16x32xbf16, #tpu.memory_space<vmem>>, %arg3: memref<1x1x8xf32, #tpu.memory_space<vmem>>, %arg4: memref<1x8x1xf32, #tpu.memory_space<vmem>>, %arg5: memref<1x32xf32, #tpu.memory_space<vmem>>, %arg6: memref<1x32xf32, #tpu.memory_space<vmem>>, %arg7: memref<32x96xbf16, #tpu.memory_space<vmem>>, %arg8: memref<1x96xf32, #tpu.memory_space<vmem>>, %arg9: memref<32x32xbf16, #tpu.memory_space<vmem>>, %arg10: memref<1x32xf32, #tpu.memory_space<vmem>>, %arg11: memref<1x32xf32, #tpu.memory_space<vmem>>, %arg12: memref<1x32xf32, #tpu.memory_space<vmem>>, %arg13: memref<32x32xbf16, #tpu.memory_space<vmem>>, %arg14: memref<1x32xf32, #tpu.memory_space<vmem>>, %arg15: memref<32x64xbf16, #tpu.memory_space<vmem>>, %arg16: memref<1x64xf32, #tpu.memory_space<vmem>>, %arg17: memref<32x32xbf16, #tpu.memory_space<vmem>>, %arg18: memref<1x32xf32, #tpu.memory_space<vmem>>, %arg19: memref<1x32xf32, #tpu.memory_space<vmem>>, %arg20: memref<1x32xf32, #tpu.memory_space<vmem>>, %arg21: memref<32x64xbf16, #tpu.memory_space<vmem>>, %arg22: memref<1x64xf32, #tpu.memory_space<vmem>>, %arg23: memref<64x32xbf16, #tpu.memory_space<vmem>>, %arg24: memref<1x32xf32, #tpu.memory_space<vmem>>, %arg25: memref<1x8x32xbf16, #tpu.memory_space<vmem>>) attributes {dimension_semantics = [#tpu.dimension_semantics<parallel>], iteration_bounds = array<i64: 2>, scalar_prefetch = 0 : i64, scratch_operands = 0 : i64, tpu.core_type = #tpu.core_type<tc>, window_params = [{transform_indices = @transform_0, window_bounds = array<i64: 1, 8, 32>}, {transform_indices = @transform_1, window_bounds = array<i64: 1, 16, 32>}, {transform_indices = @transform_2, window_bounds = array<i64: 1, 1, 8>}, {transform_indices = @transform_3, window_bounds = array<i64: 1, 8, 1>}, {pipeline_mode = #tpu.pipeline_mode<synchronous>, transform_indices = @transform_4, window_bounds = array<i64: 1, 32>}, {pipeline_mode = #tpu.pipeline_mode<synchronous>, transform_indices = @transform_5, window_bounds = array<i64: 1, 32>}, {pipeline_mode = #tpu.pipeline_mode<synchronous>, transform_indices = @transform_6, window_bounds = array<i64: 32, 96>}, {pipeline_mode = #tpu.pipeline_mode<synchronous>, transform_indices = @transform_7, window_bounds = array<i64: 1, 96>}, {pipeline_mode = #tpu.pipeline_mode<synchronous>, transform_indices = @transform_8, window_bounds = array<i64: 32, 32>}, {pipeline_mode = #tpu.pipeline_mode<synchronous>, transform_indices = @transform_9, window_bounds = array<i64: 1, 32>}, {pipeline_mode = #tpu.pipeline_mode<synchronous>, transform_indices = @transform_10, window_bounds = array<i64: 1, 32>}, {pipeline_mode = #tpu.pipeline_mode<synchronous>, transform_indices = @transform_11, window_bounds = array<i64: 1, 32>}, {pipeline_mode = #tpu.pipeline_mode<synchronous>, transform_indices = @transform_12, window_bounds = array<i64: 32, 32>}, {pipeline_mode = #tpu.pipeline_mode<synchronous>, transform_indices = @transform_13, window_bounds = array<i64: 1, 32>}, {pipeline_mode = #tpu.pipeline_mode<synchronous>, transform_indices = @transform_14, window_bounds = array<i64: 32, 64>}, {pipeline_mode = #tpu.pipeline_mode<synchronous>, transform_indices = @transform_15, window_bounds = array<i64: 1, 64>}, {pipeline_mode = #tpu.pipeline_mode<synchronous>, transform_indices = @transform_16, window_bounds = array<i64: 32, 32>}, {pipeline_mode = #tpu.pipeline_mode<synchronous>, transform_indices = @transform_17, window_bounds = array<i64: 1, 32>}, {pipeline_mode = #tpu.pipeline_mode<synchronous>, transform_indices = @transform_18, window_bounds = array<i64: 1, 32>}, {pipeline_mode = #tpu.pipeline_mode<synchronous>, transform_indices = @transform_19, window_bounds = array<i64: 1, 32>}, {pipeline_mode = #tpu.pipeline_mode<synchronous>, transform_indices = @transform_20, window_bounds = array<i64: 32, 64>}, {pipeline_mode = #tpu.pipeline_mode<synchronous>, transform_indices = @transform_21, window_bounds = array<i64: 1, 64>}, {pipeline_mode = #tpu.pipeline_mode<synchronous>, transform_indices = @transform_22, window_bounds = array<i64: 64, 32>}, {pipeline_mode = #tpu.pipeline_mode<synchronous>, transform_indices = @transform_23, window_bounds = array<i64: 1, 32>}, {transform_indices = @transform_24, window_bounds = array<i64: 1, 8, 32>}]} {
    %c0 = arith.constant 0 : index
    %c0_0 = arith.constant 0 : index
    %c0_1 = arith.constant 0 : index
    %0 = vector.load %arg1[%c0, %c0_0, %c0_1] : memref<1x8x32xbf16, #tpu.memory_space<vmem>>, vector<1x8x32xbf16>
    %1 = vector.shape_cast %0 : vector<1x8x32xbf16> to vector<8x32xbf16>
    %2 = arith.extf %1 : vector<8x32xbf16> to vector<8x32xf32>
    %c0_2 = arith.constant 0 : index
    %c0_3 = arith.constant 0 : index
    %c0_4 = arith.constant 0 : index
    %3 = vector.load %arg2[%c0_2, %c0_3, %c0_4] : memref<1x16x32xbf16, #tpu.memory_space<vmem>>, vector<1x16x32xbf16>
    %4 = vector.shape_cast %3 : vector<1x16x32xbf16> to vector<16x32xbf16>
    %c0_5 = arith.constant 0 : index
    %c0_6 = arith.constant 0 : index
    %c0_7 = arith.constant 0 : index
    %5 = vector.load %arg3[%c0_5, %c0_6, %c0_7] : memref<1x1x8xf32, #tpu.memory_space<vmem>>, vector<1x1x8xf32>
    %6 = vector.shape_cast %5 : vector<1x1x8xf32> to vector<1x8xf32>
    %cst = arith.constant 5.000000e-01 : f32
    %7 = vector.broadcast %cst : f32 to vector<1x8xf32>
    %8 = arith.cmpf ogt, %6, %7 : vector<1x8xf32>
    %c0_8 = arith.constant 0 : index
    %c0_9 = arith.constant 0 : index
    %c0_10 = arith.constant 0 : index
    %9 = vector.load %arg4[%c0_8, %c0_9, %c0_10] : memref<1x8x1xf32, #tpu.memory_space<vmem>>, vector<1x8x1xf32>
    %10 = vector.shape_cast %9 : vector<1x8x1xf32> to vector<8x1xf32>
    %cst_11 = arith.constant 5.000000e-01 : f32
    %11 = vector.broadcast %cst_11 : f32 to vector<8x1xf32>
    %12 = arith.cmpf ogt, %10, %11 : vector<8x1xf32>
    %13 = tpu.iota {dimensions = array<i32: 0>} : vector<8x8xi32>
    %14 = tpu.iota {dimensions = array<i32: 1>} : vector<8x8xi32>
    %15 = vector.broadcast %8 : vector<1x8xi1> to vector<8x8xi1>
    %16 = vector.broadcast %12 : vector<8x1xi1> to vector<8x8xi1>
    %17 = arith.ori %15, %16 : vector<8x8xi1>
    %18 = arith.cmpi sgt, %14, %13 : vector<8x8xi32>
    %19 = arith.ori %17, %18 : vector<8x8xi1>
    %cst_12 = arith.constant -1.000000e+09 : f32
    %cst_13 = arith.constant 0.000000e+00 : f32
    %20 = vector.broadcast %cst_12 : f32 to vector<8x8xf32>
    %21 = vector.broadcast %cst_13 : f32 to vector<8x8xf32>
    %22 = arith.select %19, %20, %21 : vector<8x8xi1>, vector<8x8xf32>
    %c0_14 = arith.constant 0 : index
    %c0_15 = arith.constant 0 : index
    %23 = vector.load %arg5[%c0_14, %c0_15] : memref<1x32xf32, #tpu.memory_space<vmem>>, vector<1x32xf32>
    %c0_16 = arith.constant 0 : index
    %c0_17 = arith.constant 0 : index
    %24 = vector.load %arg6[%c0_16, %c0_17] : memref<1x32xf32, #tpu.memory_space<vmem>>, vector<1x32xf32>
    %cst_18 = arith.constant dense<0.000000e+00> : vector<8xf32>
    %25 = vector.multi_reduction <add>, %2, %cst_18 [1] : vector<8x32xf32> to vector<8xf32>
    %26 = vector.shape_cast %25 : vector<8xf32> to vector<8x1xf32>
    %cst_19 = arith.constant 3.200000e+01 : f32
    %27 = vector.broadcast %cst_19 : f32 to vector<8x1xf32>
    %28 = arith.divf %26, %27 : vector<8x1xf32>
    %29 = vector.broadcast %28 : vector<8x1xf32> to vector<8x32xf32>
    %30 = arith.subf %2, %29 : vector<8x32xf32>
    %31 = arith.mulf %30, %30 : vector<8x32xf32>
    %cst_20 = arith.constant dense<0.000000e+00> : vector<8xf32>
    %32 = vector.multi_reduction <add>, %31, %cst_20 [1] : vector<8x32xf32> to vector<8xf32>
    %33 = vector.shape_cast %32 : vector<8xf32> to vector<8x1xf32>
    %cst_21 = arith.constant 3.200000e+01 : f32
    %34 = vector.broadcast %cst_21 : f32 to vector<8x1xf32>
    %35 = arith.divf %33, %34 : vector<8x1xf32>
    %36 = vector.broadcast %28 : vector<8x1xf32> to vector<8x32xf32>
    %37 = arith.subf %2, %36 : vector<8x32xf32>
    %cst_22 = arith.constant 9.99999974E-6 : f32
    %38 = vector.broadcast %cst_22 : f32 to vector<8x1xf32>
    %39 = arith.addf %35, %38 : vector<8x1xf32>
    %40 = math.rsqrt %39 : vector<8x1xf32>
    %41 = vector.broadcast %40 : vector<8x1xf32> to vector<8x32xf32>
    %42 = arith.mulf %37, %41 : vector<8x32xf32>
    %43 = vector.broadcast %23 : vector<1x32xf32> to vector<8x32xf32>
    %44 = arith.mulf %42, %43 : vector<8x32xf32>
    %45 = vector.broadcast %24 : vector<1x32xf32> to vector<8x32xf32>
    %46 = arith.addf %44, %45 : vector<8x32xf32>
    %47 = arith.truncf %46 : vector<8x32xf32> to vector<8x32xbf16>
    %c0_23 = arith.constant 0 : index
    %c0_24 = arith.constant 0 : index
    %48 = vector.load %arg7[%c0_23, %c0_24] : memref<32x96xbf16, #tpu.memory_space<vmem>>, vector<32x96xbf16>
    %cst_25 = arith.constant dense<0.000000e+00> : vector<8x96xf32>
    %49 = tpu.matmul %47, %48, %cst_25 {dimension_numbers = #tpu.dot_dimension_numbers<[1], [0], [0], [1], [0, 0, 1, 1], [], []>} : vector<8x32xbf16>, vector<32x96xbf16>, vector<8x96xf32> -> vector<8x96xf32>
    %c0_26 = arith.constant 0 : index
    %c0_27 = arith.constant 0 : index
    %50 = vector.load %arg8[%c0_26, %c0_27] : memref<1x96xf32, #tpu.memory_space<vmem>>, vector<1x96xf32>
    %51 = vector.broadcast %50 : vector<1x96xf32> to vector<8x96xf32>
    %52 = arith.addf %49, %51 : vector<8x96xf32>
    %53 = vector.extract_strided_slice %52 {offsets = [0, 0], sizes = [8, 32], strides = [1, 1]} : vector<8x96xf32> to vector<8x32xf32>
    %54 = vector.extract_strided_slice %52 {offsets = [0, 32], sizes = [8, 32], strides = [1, 1]} : vector<8x96xf32> to vector<8x32xf32>
    %55 = vector.extract_strided_slice %52 {offsets = [0, 64], sizes = [8, 32], strides = [1, 1]} : vector<8x96xf32> to vector<8x32xf32>
    %56 = arith.truncf %53 : vector<8x32xf32> to vector<8x32xbf16>
    %57 = vector.extract_strided_slice %56 {offsets = [0, 0], sizes = [8, 8], strides = [1, 1]} : vector<8x32xbf16> to vector<8x8xbf16>
    %58 = vector.extract_strided_slice %56 {offsets = [0, 8], sizes = [8, 8], strides = [1, 1]} : vector<8x32xbf16> to vector<8x8xbf16>
    %59 = vector.extract_strided_slice %56 {offsets = [0, 16], sizes = [8, 8], strides = [1, 1]} : vector<8x32xbf16> to vector<8x8xbf16>
    %60 = vector.extract_strided_slice %56 {offsets = [0, 24], sizes = [8, 8], strides = [1, 1]} : vector<8x32xbf16> to vector<8x8xbf16>
    %61 = vector.shape_cast %57 : vector<8x8xbf16> to vector<1x8x8xbf16>
    %62 = vector.shape_cast %58 : vector<8x8xbf16> to vector<1x8x8xbf16>
    %63 = vector.shape_cast %59 : vector<8x8xbf16> to vector<1x8x8xbf16>
    %64 = vector.shape_cast %60 : vector<8x8xbf16> to vector<1x8x8xbf16>
    %65 = tpu.concatenate %61, %62, %63, %64 in 0 : vector<1x8x8xbf16>, vector<1x8x8xbf16>, vector<1x8x8xbf16>, vector<1x8x8xbf16> -> vector<4x8x8xbf16>
    %66 = arith.truncf %54 : vector<8x32xf32> to vector<8x32xbf16>
    %67 = vector.extract_strided_slice %66 {offsets = [0, 0], sizes = [8, 8], strides = [1, 1]} : vector<8x32xbf16> to vector<8x8xbf16>
    %68 = vector.extract_strided_slice %66 {offsets = [0, 8], sizes = [8, 8], strides = [1, 1]} : vector<8x32xbf16> to vector<8x8xbf16>
    %69 = vector.extract_strided_slice %66 {offsets = [0, 16], sizes = [8, 8], strides = [1, 1]} : vector<8x32xbf16> to vector<8x8xbf16>
    %70 = vector.extract_strided_slice %66 {offsets = [0, 24], sizes = [8, 8], strides = [1, 1]} : vector<8x32xbf16> to vector<8x8xbf16>
    %71 = vector.shape_cast %67 : vector<8x8xbf16> to vector<1x8x8xbf16>
    %72 = vector.shape_cast %68 : vector<8x8xbf16> to vector<1x8x8xbf16>
    %73 = vector.shape_cast %69 : vector<8x8xbf16> to vector<1x8x8xbf16>
    %74 = vector.shape_cast %70 : vector<8x8xbf16> to vector<1x8x8xbf16>
    %75 = tpu.concatenate %71, %72, %73, %74 in 0 : vector<1x8x8xbf16>, vector<1x8x8xbf16>, vector<1x8x8xbf16>, vector<1x8x8xbf16> -> vector<4x8x8xbf16>
    %76 = arith.truncf %55 : vector<8x32xf32> to vector<8x32xbf16>
    %77 = vector.extract_strided_slice %76 {offsets = [0, 0], sizes = [8, 8], strides = [1, 1]} : vector<8x32xbf16> to vector<8x8xbf16>
    %78 = vector.extract_strided_slice %76 {offsets = [0, 8], sizes = [8, 8], strides = [1, 1]} : vector<8x32xbf16> to vector<8x8xbf16>
    %79 = vector.extract_strided_slice %76 {offsets = [0, 16], sizes = [8, 8], strides = [1, 1]} : vector<8x32xbf16> to vector<8x8xbf16>
    %80 = vector.extract_strided_slice %76 {offsets = [0, 24], sizes = [8, 8], strides = [1, 1]} : vector<8x32xbf16> to vector<8x8xbf16>
    %81 = vector.shape_cast %77 : vector<8x8xbf16> to vector<1x8x8xbf16>
    %82 = vector.shape_cast %78 : vector<8x8xbf16> to vector<1x8x8xbf16>
    %83 = vector.shape_cast %79 : vector<8x8xbf16> to vector<1x8x8xbf16>
    %84 = vector.shape_cast %80 : vector<8x8xbf16> to vector<1x8x8xbf16>
    %85 = tpu.concatenate %81, %82, %83, %84 in 0 : vector<1x8x8xbf16>, vector<1x8x8xbf16>, vector<1x8x8xbf16>, vector<1x8x8xbf16> -> vector<4x8x8xbf16>
    "tpu.trace_start"() <{level = 10 : i32, message = "hqd,hkd->hqk"}> : () -> ()
    %cst_28 = arith.constant dense<0.000000e+00> : vector<4x8x8xf32>
    %86 = tpu.matmul %65, %75, %cst_28 {dimension_numbers = #tpu.dot_dimension_numbers<[2], [2], [1], [1], [0, 0, 0, 1, 1, 1], [0], [0]>} : vector<4x8x8xbf16>, vector<4x8x8xbf16>, vector<4x8x8xf32> -> vector<4x8x8xf32>
    "tpu.trace_stop"() : () -> ()
    %87 = vector.shape_cast %22 : vector<8x8xf32> to vector<1x8x8xf32>
    %88 = vector.broadcast %87 : vector<1x8x8xf32> to vector<4x8x8xf32>
    %89 = arith.addf %86, %88 : vector<4x8x8xf32>
    %cst_29 = arith.constant dense<0xFF800000> : vector<4x8xf32>
    %90 = vector.multi_reduction <maximumf>, %89, %cst_29 [2] : vector<4x8x8xf32> to vector<4x8xf32>
    %91 = vector.shape_cast %90 : vector<4x8xf32> to vector<4x8x1xf32>
    %92 = vector.broadcast %91 : vector<4x8x1xf32> to vector<4x8x8xf32>
    %93 = arith.subf %89, %92 : vector<4x8x8xf32>
    %94 = math.exp %93 : vector<4x8x8xf32>
    %cst_30 = arith.constant dense<0.000000e+00> : vector<4x8xf32>
    %95 = vector.multi_reduction <add>, %94, %cst_30 [2] : vector<4x8x8xf32> to vector<4x8xf32>
    %96 = vector.shape_cast %95 : vector<4x8xf32> to vector<4x8x1xf32>
    %97 = tpu.reciprocal %96 {approx = true} : vector<4x8x1xf32> -> vector<4x8x1xf32>
    %98 = vector.broadcast %97 : vector<4x8x1xf32> to vector<4x8x8xf32>
    %99 = arith.mulf %94, %98 : vector<4x8x8xf32>
    %100 = arith.truncf %99 : vector<4x8x8xf32> to vector<4x8x8xbf16>
    "tpu.trace_start"() <{level = 10 : i32, message = "hqk,hkd->hqd"}> : () -> ()
    %cst_31 = arith.constant dense<0.000000e+00> : vector<4x8x8xf32>
    %101 = tpu.matmul %100, %85, %cst_31 {dimension_numbers = #tpu.dot_dimension_numbers<[2], [1], [1], [2], [0, 0, 0, 1, 1, 2], [0], [0]>} : vector<4x8x8xbf16>, vector<4x8x8xbf16>, vector<4x8x8xf32> -> vector<4x8x8xf32>
    "tpu.trace_stop"() : () -> ()
    %102 = vector.extract_strided_slice %101 {offsets = [0, 0, 0], sizes = [1, 8, 8], strides = [1, 1, 1]} : vector<4x8x8xf32> to vector<1x8x8xf32>
    %103 = vector.shape_cast %102 : vector<1x8x8xf32> to vector<8x8xf32>
    %104 = vector.extract_strided_slice %101 {offsets = [1, 0, 0], sizes = [1, 8, 8], strides = [1, 1, 1]} : vector<4x8x8xf32> to vector<1x8x8xf32>
    %105 = vector.shape_cast %104 : vector<1x8x8xf32> to vector<8x8xf32>
    %106 = vector.extract_strided_slice %101 {offsets = [2, 0, 0], sizes = [1, 8, 8], strides = [1, 1, 1]} : vector<4x8x8xf32> to vector<1x8x8xf32>
    %107 = vector.shape_cast %106 : vector<1x8x8xf32> to vector<8x8xf32>
    %108 = vector.extract_strided_slice %101 {offsets = [3, 0, 0], sizes = [1, 8, 8], strides = [1, 1, 1]} : vector<4x8x8xf32> to vector<1x8x8xf32>
    %109 = vector.shape_cast %108 : vector<1x8x8xf32> to vector<8x8xf32>
    %110 = tpu.concatenate %103, %105, %107, %109 in 1 : vector<8x8xf32>, vector<8x8xf32>, vector<8x8xf32>, vector<8x8xf32> -> vector<8x32xf32>
    %111 = arith.truncf %110 : vector<8x32xf32> to vector<8x32xbf16>
    %c0_32 = arith.constant 0 : index
    %c0_33 = arith.constant 0 : index
    %112 = vector.load %arg9[%c0_32, %c0_33] : memref<32x32xbf16, #tpu.memory_space<vmem>>, vector<32x32xbf16>
    %cst_34 = arith.constant dense<0.000000e+00> : vector<8x32xf32>
    %113 = tpu.matmul %111, %112, %cst_34 {dimension_numbers = #tpu.dot_dimension_numbers<[1], [0], [0], [1], [0, 0, 1, 1], [], []>} : vector<8x32xbf16>, vector<32x32xbf16>, vector<8x32xf32> -> vector<8x32xf32>
    %114 = arith.addf %2, %113 : vector<8x32xf32>
    %c0_35 = arith.constant 0 : index
    %c0_36 = arith.constant 0 : index
    %115 = vector.load %arg10[%c0_35, %c0_36] : memref<1x32xf32, #tpu.memory_space<vmem>>, vector<1x32xf32>
    %116 = vector.broadcast %115 : vector<1x32xf32> to vector<8x32xf32>
    %117 = arith.addf %114, %116 : vector<8x32xf32>
    %c0_37 = arith.constant 0 : index
    %c0_38 = arith.constant 0 : index
    %118 = vector.load %arg11[%c0_37, %c0_38] : memref<1x32xf32, #tpu.memory_space<vmem>>, vector<1x32xf32>
    %c0_39 = arith.constant 0 : index
    %c0_40 = arith.constant 0 : index
    %119 = vector.load %arg12[%c0_39, %c0_40] : memref<1x32xf32, #tpu.memory_space<vmem>>, vector<1x32xf32>
    %cst_41 = arith.constant dense<0.000000e+00> : vector<8xf32>
    %120 = vector.multi_reduction <add>, %117, %cst_41 [1] : vector<8x32xf32> to vector<8xf32>
    %121 = vector.shape_cast %120 : vector<8xf32> to vector<8x1xf32>
    %cst_42 = arith.constant 3.200000e+01 : f32
    %122 = vector.broadcast %cst_42 : f32 to vector<8x1xf32>
    %123 = arith.divf %121, %122 : vector<8x1xf32>
    %124 = vector.broadcast %123 : vector<8x1xf32> to vector<8x32xf32>
    %125 = arith.subf %117, %124 : vector<8x32xf32>
    %126 = arith.mulf %125, %125 : vector<8x32xf32>
    %cst_43 = arith.constant dense<0.000000e+00> : vector<8xf32>
    %127 = vector.multi_reduction <add>, %126, %cst_43 [1] : vector<8x32xf32> to vector<8xf32>
    %128 = vector.shape_cast %127 : vector<8xf32> to vector<8x1xf32>
    %cst_44 = arith.constant 3.200000e+01 : f32
    %129 = vector.broadcast %cst_44 : f32 to vector<8x1xf32>
    %130 = arith.divf %128, %129 : vector<8x1xf32>
    %131 = vector.broadcast %123 : vector<8x1xf32> to vector<8x32xf32>
    %132 = arith.subf %117, %131 : vector<8x32xf32>
    %cst_45 = arith.constant 9.99999974E-6 : f32
    %133 = vector.broadcast %cst_45 : f32 to vector<8x1xf32>
    %134 = arith.addf %130, %133 : vector<8x1xf32>
    %135 = math.rsqrt %134 : vector<8x1xf32>
    %136 = vector.broadcast %135 : vector<8x1xf32> to vector<8x32xf32>
    %137 = arith.mulf %132, %136 : vector<8x32xf32>
    %138 = vector.broadcast %118 : vector<1x32xf32> to vector<8x32xf32>
    %139 = arith.mulf %137, %138 : vector<8x32xf32>
    %140 = vector.broadcast %119 : vector<1x32xf32> to vector<8x32xf32>
    %141 = arith.addf %139, %140 : vector<8x32xf32>
    %142 = arith.truncf %141 : vector<8x32xf32> to vector<8x32xbf16>
    %c0_46 = arith.constant 0 : index
    %c0_47 = arith.constant 0 : index
    %143 = vector.load %arg13[%c0_46, %c0_47] : memref<32x32xbf16, #tpu.memory_space<vmem>>, vector<32x32xbf16>
    %cst_48 = arith.constant dense<0.000000e+00> : vector<8x32xf32>
    %144 = tpu.matmul %142, %143, %cst_48 {dimension_numbers = #tpu.dot_dimension_numbers<[1], [0], [0], [1], [0, 0, 1, 1], [], []>} : vector<8x32xbf16>, vector<32x32xbf16>, vector<8x32xf32> -> vector<8x32xf32>
    %c0_49 = arith.constant 0 : index
    %c0_50 = arith.constant 0 : index
    %145 = vector.load %arg14[%c0_49, %c0_50] : memref<1x32xf32, #tpu.memory_space<vmem>>, vector<1x32xf32>
    %146 = vector.broadcast %145 : vector<1x32xf32> to vector<8x32xf32>
    %147 = arith.addf %144, %146 : vector<8x32xf32>
    %c0_51 = arith.constant 0 : index
    %c0_52 = arith.constant 0 : index
    %148 = vector.load %arg15[%c0_51, %c0_52] : memref<32x64xbf16, #tpu.memory_space<vmem>>, vector<32x64xbf16>
    %cst_53 = arith.constant dense<0.000000e+00> : vector<16x64xf32>
    %149 = tpu.matmul %4, %148, %cst_53 {dimension_numbers = #tpu.dot_dimension_numbers<[1], [0], [0], [1], [0, 0, 1, 1], [], []>} : vector<16x32xbf16>, vector<32x64xbf16>, vector<16x64xf32> -> vector<16x64xf32>
    %c0_54 = arith.constant 0 : index
    %c0_55 = arith.constant 0 : index
    %150 = vector.load %arg16[%c0_54, %c0_55] : memref<1x64xf32, #tpu.memory_space<vmem>>, vector<1x64xf32>
    %151 = vector.broadcast %150 : vector<1x64xf32> to vector<16x64xf32>
    %152 = arith.addf %149, %151 : vector<16x64xf32>
    %153 = vector.extract_strided_slice %152 {offsets = [0, 0], sizes = [16, 32], strides = [1, 1]} : vector<16x64xf32> to vector<16x32xf32>
    %154 = vector.extract_strided_slice %152 {offsets = [0, 32], sizes = [16, 32], strides = [1, 1]} : vector<16x64xf32> to vector<16x32xf32>
    %155 = arith.truncf %147 : vector<8x32xf32> to vector<8x32xbf16>
    %156 = vector.extract_strided_slice %155 {offsets = [0, 0], sizes = [8, 8], strides = [1, 1]} : vector<8x32xbf16> to vector<8x8xbf16>
    %157 = vector.extract_strided_slice %155 {offsets = [0, 8], sizes = [8, 8], strides = [1, 1]} : vector<8x32xbf16> to vector<8x8xbf16>
    %158 = vector.extract_strided_slice %155 {offsets = [0, 16], sizes = [8, 8], strides = [1, 1]} : vector<8x32xbf16> to vector<8x8xbf16>
    %159 = vector.extract_strided_slice %155 {offsets = [0, 24], sizes = [8, 8], strides = [1, 1]} : vector<8x32xbf16> to vector<8x8xbf16>
    %160 = vector.shape_cast %156 : vector<8x8xbf16> to vector<1x8x8xbf16>
    %161 = vector.shape_cast %157 : vector<8x8xbf16> to vector<1x8x8xbf16>
    %162 = vector.shape_cast %158 : vector<8x8xbf16> to vector<1x8x8xbf16>
    %163 = vector.shape_cast %159 : vector<8x8xbf16> to vector<1x8x8xbf16>
    %164 = tpu.concatenate %160, %161, %162, %163 in 0 : vector<1x8x8xbf16>, vector<1x8x8xbf16>, vector<1x8x8xbf16>, vector<1x8x8xbf16> -> vector<4x8x8xbf16>
    %165 = arith.truncf %153 : vector<16x32xf32> to vector<16x32xbf16>
    %166 = vector.extract_strided_slice %165 {offsets = [0, 0], sizes = [16, 8], strides = [1, 1]} : vector<16x32xbf16> to vector<16x8xbf16>
    %167 = vector.extract_strided_slice %165 {offsets = [0, 8], sizes = [16, 8], strides = [1, 1]} : vector<16x32xbf16> to vector<16x8xbf16>
    %168 = vector.extract_strided_slice %165 {offsets = [0, 16], sizes = [16, 8], strides = [1, 1]} : vector<16x32xbf16> to vector<16x8xbf16>
    %169 = vector.extract_strided_slice %165 {offsets = [0, 24], sizes = [16, 8], strides = [1, 1]} : vector<16x32xbf16> to vector<16x8xbf16>
    %170 = vector.shape_cast %166 : vector<16x8xbf16> to vector<1x16x8xbf16>
    %171 = vector.shape_cast %167 : vector<16x8xbf16> to vector<1x16x8xbf16>
    %172 = vector.shape_cast %168 : vector<16x8xbf16> to vector<1x16x8xbf16>
    %173 = vector.shape_cast %169 : vector<16x8xbf16> to vector<1x16x8xbf16>
    %174 = tpu.concatenate %170, %171, %172, %173 in 0 : vector<1x16x8xbf16>, vector<1x16x8xbf16>, vector<1x16x8xbf16>, vector<1x16x8xbf16> -> vector<4x16x8xbf16>
    %175 = arith.truncf %154 : vector<16x32xf32> to vector<16x32xbf16>
    %176 = vector.extract_strided_slice %175 {offsets = [0, 0], sizes = [16, 8], strides = [1, 1]} : vector<16x32xbf16> to vector<16x8xbf16>
    %177 = vector.extract_strided_slice %175 {offsets = [0, 8], sizes = [16, 8], strides = [1, 1]} : vector<16x32xbf16> to vector<16x8xbf16>
    %178 = vector.extract_strided_slice %175 {offsets = [0, 16], sizes = [16, 8], strides = [1, 1]} : vector<16x32xbf16> to vector<16x8xbf16>
    %179 = vector.extract_strided_slice %175 {offsets = [0, 24], sizes = [16, 8], strides = [1, 1]} : vector<16x32xbf16> to vector<16x8xbf16>
    %180 = vector.shape_cast %176 : vector<16x8xbf16> to vector<1x16x8xbf16>
    %181 = vector.shape_cast %177 : vector<16x8xbf16> to vector<1x16x8xbf16>
    %182 = vector.shape_cast %178 : vector<16x8xbf16> to vector<1x16x8xbf16>
    %183 = vector.shape_cast %179 : vector<16x8xbf16> to vector<1x16x8xbf16>
    %184 = tpu.concatenate %180, %181, %182, %183 in 0 : vector<1x16x8xbf16>, vector<1x16x8xbf16>, vector<1x16x8xbf16>, vector<1x16x8xbf16> -> vector<4x16x8xbf16>
    "tpu.trace_start"() <{level = 10 : i32, message = "hqd,hkd->hqk"}> : () -> ()
    %cst_56 = arith.constant dense<0.000000e+00> : vector<4x8x16xf32>
    %185 = tpu.matmul %164, %174, %cst_56 {dimension_numbers = #tpu.dot_dimension_numbers<[2], [2], [1], [1], [0, 0, 0, 1, 1, 1], [0], [0]>} : vector<4x8x8xbf16>, vector<4x16x8xbf16>, vector<4x8x16xf32> -> vector<4x8x16xf32>
    "tpu.trace_stop"() : () -> ()
    %cst_57 = arith.constant dense<0xFF800000> : vector<4x8xf32>
    %186 = vector.multi_reduction <maximumf>, %185, %cst_57 [2] : vector<4x8x16xf32> to vector<4x8xf32>
    %187 = vector.shape_cast %186 : vector<4x8xf32> to vector<4x8x1xf32>
    %188 = vector.broadcast %187 : vector<4x8x1xf32> to vector<4x8x16xf32>
    %189 = arith.subf %185, %188 : vector<4x8x16xf32>
    %190 = math.exp %189 : vector<4x8x16xf32>
    %cst_58 = arith.constant dense<0.000000e+00> : vector<4x8xf32>
    %191 = vector.multi_reduction <add>, %190, %cst_58 [2] : vector<4x8x16xf32> to vector<4x8xf32>
    %192 = vector.shape_cast %191 : vector<4x8xf32> to vector<4x8x1xf32>
    %193 = tpu.reciprocal %192 {approx = true} : vector<4x8x1xf32> -> vector<4x8x1xf32>
    %194 = vector.broadcast %193 : vector<4x8x1xf32> to vector<4x8x16xf32>
    %195 = arith.mulf %190, %194 : vector<4x8x16xf32>
    %196 = arith.truncf %195 : vector<4x8x16xf32> to vector<4x8x16xbf16>
    "tpu.trace_start"() <{level = 10 : i32, message = "hqk,hkd->hqd"}> : () -> ()
    %cst_59 = arith.constant dense<0.000000e+00> : vector<4x8x8xf32>
    %197 = tpu.matmul %196, %184, %cst_59 {dimension_numbers = #tpu.dot_dimension_numbers<[2], [1], [1], [2], [0, 0, 0, 1, 1, 2], [0], [0]>} : vector<4x8x16xbf16>, vector<4x16x8xbf16>, vector<4x8x8xf32> -> vector<4x8x8xf32>
    "tpu.trace_stop"() : () -> ()
    %198 = vector.extract_strided_slice %197 {offsets = [0, 0, 0], sizes = [1, 8, 8], strides = [1, 1, 1]} : vector<4x8x8xf32> to vector<1x8x8xf32>
    %199 = vector.shape_cast %198 : vector<1x8x8xf32> to vector<8x8xf32>
    %200 = vector.extract_strided_slice %197 {offsets = [1, 0, 0], sizes = [1, 8, 8], strides = [1, 1, 1]} : vector<4x8x8xf32> to vector<1x8x8xf32>
    %201 = vector.shape_cast %200 : vector<1x8x8xf32> to vector<8x8xf32>
    %202 = vector.extract_strided_slice %197 {offsets = [2, 0, 0], sizes = [1, 8, 8], strides = [1, 1, 1]} : vector<4x8x8xf32> to vector<1x8x8xf32>
    %203 = vector.shape_cast %202 : vector<1x8x8xf32> to vector<8x8xf32>
    %204 = vector.extract_strided_slice %197 {offsets = [3, 0, 0], sizes = [1, 8, 8], strides = [1, 1, 1]} : vector<4x8x8xf32> to vector<1x8x8xf32>
    %205 = vector.shape_cast %204 : vector<1x8x8xf32> to vector<8x8xf32>
    %206 = tpu.concatenate %199, %201, %203, %205 in 1 : vector<8x8xf32>, vector<8x8xf32>, vector<8x8xf32>, vector<8x8xf32> -> vector<8x32xf32>
    %207 = arith.truncf %206 : vector<8x32xf32> to vector<8x32xbf16>
    %c0_60 = arith.constant 0 : index
    %c0_61 = arith.constant 0 : index
    %208 = vector.load %arg17[%c0_60, %c0_61] : memref<32x32xbf16, #tpu.memory_space<vmem>>, vector<32x32xbf16>
    %cst_62 = arith.constant dense<0.000000e+00> : vector<8x32xf32>
    %209 = tpu.matmul %207, %208, %cst_62 {dimension_numbers = #tpu.dot_dimension_numbers<[1], [0], [0], [1], [0, 0, 1, 1], [], []>} : vector<8x32xbf16>, vector<32x32xbf16>, vector<8x32xf32> -> vector<8x32xf32>
    %210 = arith.addf %117, %209 : vector<8x32xf32>
    %c0_63 = arith.constant 0 : index
    %c0_64 = arith.constant 0 : index
    %211 = vector.load %arg18[%c0_63, %c0_64] : memref<1x32xf32, #tpu.memory_space<vmem>>, vector<1x32xf32>
    %212 = vector.broadcast %211 : vector<1x32xf32> to vector<8x32xf32>
    %213 = arith.addf %210, %212 : vector<8x32xf32>
    %c0_65 = arith.constant 0 : index
    %c0_66 = arith.constant 0 : index
    %214 = vector.load %arg19[%c0_65, %c0_66] : memref<1x32xf32, #tpu.memory_space<vmem>>, vector<1x32xf32>
    %c0_67 = arith.constant 0 : index
    %c0_68 = arith.constant 0 : index
    %215 = vector.load %arg20[%c0_67, %c0_68] : memref<1x32xf32, #tpu.memory_space<vmem>>, vector<1x32xf32>
    %cst_69 = arith.constant dense<0.000000e+00> : vector<8xf32>
    %216 = vector.multi_reduction <add>, %213, %cst_69 [1] : vector<8x32xf32> to vector<8xf32>
    %217 = vector.shape_cast %216 : vector<8xf32> to vector<8x1xf32>
    %cst_70 = arith.constant 3.200000e+01 : f32
    %218 = vector.broadcast %cst_70 : f32 to vector<8x1xf32>
    %219 = arith.divf %217, %218 : vector<8x1xf32>
    %220 = vector.broadcast %219 : vector<8x1xf32> to vector<8x32xf32>
    %221 = arith.subf %213, %220 : vector<8x32xf32>
    %222 = arith.mulf %221, %221 : vector<8x32xf32>
    %cst_71 = arith.constant dense<0.000000e+00> : vector<8xf32>
    %223 = vector.multi_reduction <add>, %222, %cst_71 [1] : vector<8x32xf32> to vector<8xf32>
    %224 = vector.shape_cast %223 : vector<8xf32> to vector<8x1xf32>
    %cst_72 = arith.constant 3.200000e+01 : f32
    %225 = vector.broadcast %cst_72 : f32 to vector<8x1xf32>
    %226 = arith.divf %224, %225 : vector<8x1xf32>
    %227 = vector.broadcast %219 : vector<8x1xf32> to vector<8x32xf32>
    %228 = arith.subf %213, %227 : vector<8x32xf32>
    %cst_73 = arith.constant 9.99999974E-6 : f32
    %229 = vector.broadcast %cst_73 : f32 to vector<8x1xf32>
    %230 = arith.addf %226, %229 : vector<8x1xf32>
    %231 = math.rsqrt %230 : vector<8x1xf32>
    %232 = vector.broadcast %231 : vector<8x1xf32> to vector<8x32xf32>
    %233 = arith.mulf %228, %232 : vector<8x32xf32>
    %234 = vector.broadcast %214 : vector<1x32xf32> to vector<8x32xf32>
    %235 = arith.mulf %233, %234 : vector<8x32xf32>
    %236 = vector.broadcast %215 : vector<1x32xf32> to vector<8x32xf32>
    %237 = arith.addf %235, %236 : vector<8x32xf32>
    %238 = arith.truncf %237 : vector<8x32xf32> to vector<8x32xbf16>
    %c0_74 = arith.constant 0 : index
    %c0_75 = arith.constant 0 : index
    %239 = vector.load %arg21[%c0_74, %c0_75] : memref<32x64xbf16, #tpu.memory_space<vmem>>, vector<32x64xbf16>
    %cst_76 = arith.constant dense<0.000000e+00> : vector<8x64xf32>
    %240 = tpu.matmul %238, %239, %cst_76 {dimension_numbers = #tpu.dot_dimension_numbers<[1], [0], [0], [1], [0, 0, 1, 1], [], []>} : vector<8x32xbf16>, vector<32x64xbf16>, vector<8x64xf32> -> vector<8x64xf32>
    %c0_77 = arith.constant 0 : index
    %c0_78 = arith.constant 0 : index
    %241 = vector.load %arg22[%c0_77, %c0_78] : memref<1x64xf32, #tpu.memory_space<vmem>>, vector<1x64xf32>
    %242 = vector.broadcast %241 : vector<1x64xf32> to vector<8x64xf32>
    %243 = arith.addf %240, %242 : vector<8x64xf32>
    %cst_79 = arith.constant 0.000000e+00 : f32
    %244 = vector.broadcast %cst_79 : f32 to vector<8x64xf32>
    %245 = arith.maximumf %243, %244 : vector<8x64xf32>
    %246 = arith.truncf %245 : vector<8x64xf32> to vector<8x64xbf16>
    %c0_80 = arith.constant 0 : index
    %c0_81 = arith.constant 0 : index
    %247 = vector.load %arg23[%c0_80, %c0_81] : memref<64x32xbf16, #tpu.memory_space<vmem>>, vector<64x32xbf16>
    %cst_82 = arith.constant dense<0.000000e+00> : vector<8x32xf32>
    %248 = tpu.matmul %246, %247, %cst_82 {dimension_numbers = #tpu.dot_dimension_numbers<[1], [0], [0], [1], [0, 0, 1, 1], [], []>} : vector<8x64xbf16>, vector<64x32xbf16>, vector<8x32xf32> -> vector<8x32xf32>
    %249 = arith.addf %213, %248 : vector<8x32xf32>
    %c0_83 = arith.constant 0 : index
    %c0_84 = arith.constant 0 : index
    %250 = vector.load %arg24[%c0_83, %c0_84] : memref<1x32xf32, #tpu.memory_space<vmem>>, vector<1x32xf32>
    %251 = vector.broadcast %250 : vector<1x32xf32> to vector<8x32xf32>
    %252 = arith.addf %249, %251 : vector<8x32xf32>
    %253 = arith.truncf %252 : vector<8x32xf32> to vector<8x32xbf16>
    %c0_85 = arith.constant 0 : index
    %c0_86 = arith.constant 0 : index
    %c0_87 = arith.constant 0 : index
    %254 = vector.load %arg25[%c0_85, %c0_86, %c0_87] : memref<1x8x32xbf16, #tpu.memory_space<vmem>>, vector<1x8x32xbf16>
    %255 = vector.shape_cast %254 : vector<1x8x32xbf16> to vector<8x32xbf16>
    %256 = vector.shape_cast %253 : vector<8x32xbf16> to vector<1x8x32xbf16>
    tpu.vector_store %arg25[%c0_85, %c0_86, %c0_87], %256 {strides = array<i32>} : memref<1x8x32xbf16, #tpu.memory_space<vmem>>, vector<1x8x32xbf16>,
    return
  }
  func.func @transform_0(%arg0: i32) -> (i32, i32, i32) {
    %c0_i32 = arith.constant 0 : i32
    %c0_i32_0 = arith.constant 0 : i32
    %c0_i32_1 = arith.constant 0 : i32
    return %arg0, %c0_i32, %c0_i32_0 : i32, i32, i32
  }
  func.func @transform_1(%arg0: i32) -> (i32, i32, i32) {
    %c0_i32 = arith.constant 0 : i32
    %c0_i32_0 = arith.constant 0 : i32
    %c0_i32_1 = arith.constant 0 : i32
    return %arg0, %c0_i32, %c0_i32_0 : i32, i32, i32
  }
  func.func @transform_2(%arg0: i32) -> (i32, i32, i32) {
    %c0_i32 = arith.constant 0 : i32
    %c0_i32_0 = arith.constant 0 : i32
    %c0_i32_1 = arith.constant 0 : i32
    return %arg0, %c0_i32, %c0_i32_0 : i32, i32, i32
  }
  func.func @transform_3(%arg0: i32) -> (i32, i32, i32) {
    %c0_i32 = arith.constant 0 : i32
    %c0_i32_0 = arith.constant 0 : i32
    %c0_i32_1 = arith.constant 0 : i32
    return %arg0, %c0_i32, %c0_i32_0 : i32, i32, i32
  }
  func.func @transform_4(%arg0: i32) -> (i32, i32) {
    %c0_i32 = arith.constant 0 : i32
    %c0_i32_0 = arith.constant 0 : i32
    %c0_i32_1 = arith.constant 0 : i32
    return %c0_i32, %c0_i32_0 : i32, i32
  }
  func.func @transform_5(%arg0: i32) -> (i32, i32) {
    %c0_i32 = arith.constant 0 : i32
    %c0_i32_0 = arith.constant 0 : i32
    %c0_i32_1 = arith.constant 0 : i32
    return %c0_i32, %c0_i32_0 : i32, i32
  }
  func.func @transform_6(%arg0: i32) -> (i32, i32) {
    %c0_i32 = arith.constant 0 : i32
    %c0_i32_0 = arith.constant 0 : i32
    %c0_i32_1 = arith.constant 0 : i32
    return %c0_i32, %c0_i32_0 : i32, i32
  }
  func.func @transform_7(%arg0: i32) -> (i32, i32) {
    %c0_i32 = arith.constant 0 : i32
    %c0_i32_0 = arith.constant 0 : i32
    %c0_i32_1 = arith.constant 0 : i32
    return %c0_i32, %c0_i32_0 : i32, i32
  }
  func.func @transform_8(%arg0: i32) -> (i32, i32) {
    %c0_i32 = arith.constant 0 : i32
    %c0_i32_0 = arith.constant 0 : i32
    %c0_i32_1 = arith.constant 0 : i32
    return %c0_i32, %c0_i32_0 : i32, i32
  }
  func.func @transform_9(%arg0: i32) -> (i32, i32) {
    %c0_i32 = arith.constant 0 : i32
    %c0_i32_0 = arith.constant 0 : i32
    %c0_i32_1 = arith.constant 0 : i32
    return %c0_i32, %c0_i32_0 : i32, i32
  }
  func.func @transform_10(%arg0: i32) -> (i32, i32) {
    %c0_i32 = arith.constant 0 : i32
    %c0_i32_0 = arith.constant 0 : i32
    %c0_i32_1 = arith.constant 0 : i32
    return %c0_i32, %c0_i32_0 : i32, i32
  }
  func.func @transform_11(%arg0: i32) -> (i32, i32) {
    %c0_i32 = arith.constant 0 : i32
    %c0_i32_0 = arith.constant 0 : i32
    %c0_i32_1 = arith.constant 0 : i32
    return %c0_i32, %c0_i32_0 : i32, i32
  }
  func.func @transform_12(%arg0: i32) -> (i32, i32) {
    %c0_i32 = arith.constant 0 : i32
    %c0_i32_0 = arith.constant 0 : i32
    %c0_i32_1 = arith.constant 0 : i32
    return %c0_i32, %c0_i32_0 : i32, i32
  }
  func.func @transform_13(%arg0: i32) -> (i32, i32) {
    %c0_i32 = arith.constant 0 : i32
    %c0_i32_0 = arith.constant 0 : i32
    %c0_i32_1 = arith.constant 0 : i32
    return %c0_i32, %c0_i32_0 : i32, i32
  }
  func.func @transform_14(%arg0: i32) -> (i32, i32) {
    %c0_i32 = arith.constant 0 : i32
    %c0_i32_0 = arith.constant 0 : i32
    %c0_i32_1 = arith.constant 0 : i32
    return %c0_i32, %c0_i32_0 : i32, i32
  }
  func.func @transform_15(%arg0: i32) -> (i32, i32) {
    %c0_i32 = arith.constant 0 : i32
    %c0_i32_0 = arith.constant 0 : i32
    %c0_i32_1 = arith.constant 0 : i32
    return %c0_i32, %c0_i32_0 : i32, i32
  }
  func.func @transform_16(%arg0: i32) -> (i32, i32) {
    %c0_i32 = arith.constant 0 : i32
    %c0_i32_0 = arith.constant 0 : i32
    %c0_i32_1 = arith.constant 0 : i32
    return %c0_i32, %c0_i32_0 : i32, i32
  }
  func.func @transform_17(%arg0: i32) -> (i32, i32) {
    %c0_i32 = arith.constant 0 : i32
    %c0_i32_0 = arith.constant 0 : i32
    %c0_i32_1 = arith.constant 0 : i32
    return %c0_i32, %c0_i32_0 : i32, i32
  }
  func.func @transform_18(%arg0: i32) -> (i32, i32) {
    %c0_i32 = arith.constant 0 : i32
    %c0_i32_0 = arith.constant 0 : i32
    %c0_i32_1 = arith.constant 0 : i32
    return %c0_i32, %c0_i32_0 : i32, i32
  }
  func.func @transform_19(%arg0: i32) -> (i32, i32) {
    %c0_i32 = arith.constant 0 : i32
    %c0_i32_0 = arith.constant 0 : i32
    %c0_i32_1 = arith.constant 0 : i32
    return %c0_i32, %c0_i32_0 : i32, i32
  }
  func.func @transform_20(%arg0: i32) -> (i32, i32) {
    %c0_i32 = arith.constant 0 : i32
    %c0_i32_0 = arith.constant 0 : i32
    %c0_i32_1 = arith.constant 0 : i32
    return %c0_i32, %c0_i32_0 : i32, i32
  }
  func.func @transform_21(%arg0: i32) -> (i32, i32) {
    %c0_i32 = arith.constant 0 : i32
    %c0_i32_0 = arith.constant 0 : i32
    %c0_i32_1 = arith.constant 0 : i32
    return %c0_i32, %c0_i32_0 : i32, i32
  }
  func.func @transform_22(%arg0: i32) -> (i32, i32) {
    %c0_i32 = arith.constant 0 : i32
    %c0_i32_0 = arith.constant 0 : i32
    %c0_i32_1 = arith.constant 0 : i32
    return %c0_i32, %c0_i32_0 : i32, i32
  }
  func.func @transform_23(%arg0: i32) -> (i32, i32) {
    %c0_i32 = arith.constant 0 : i32
    %c0_i32_0 = arith.constant 0 : i32
    %c0_i32_1 = arith.constant 0 : i32
    return %c0_i32, %c0_i32_0 : i32, i32
  }
  func.func @transform_24(%arg0: i32) -> (i32, i32, i32) {
    %c0_i32 = arith.constant 0 : i32
    %c0_i32_0 = arith.constant 0 : i32
    %c0_i32_1 = arith.constant 0 : i32
    return %arg0, %c0_i32, %c0_i32_0 : i32, i32, i32
  }
}

module attributes {stable_mosaic.version = 11 : i64} {
  func.func @_decoder_layer_kernel(%arg0: i32, %arg1: memref<1x8x32xbf16, #tpu.memory_space<vmem>>, %arg2: memref<1x16x32xbf16, #tpu.memory_space<vmem>>, %arg3: memref<1x1x8xf32, #tpu.memory_space<vmem>>, %arg4: memref<1x8x1xf32, #tpu.memory_space<vmem>>, %arg5: memref<1x32xf32, #tpu.memory_space<vmem>>, %arg6: memref<1x32xf32, #tpu.memory_space<vmem>>, %arg7: memref<32x96xbf16, #tpu.memory_space<vmem>>, %arg8: memref<1x96xf32, #tpu.memory_space<vmem>>, %arg9: memref<32x32xbf16, #tpu.memory_space<vmem>>, %arg10: memref<1x32xf32, #tpu.memory_space<vmem>>, %arg11: memref<1x32xf32, #tpu.memory_space<vmem>>, %arg12: memref<1x32xf32, #tpu.memory_space<vmem>>, %arg13: memref<32x32xbf16, #tpu.memory_space<vmem>>, %arg14: memref<1x32xf32, #tpu.memory_space<vmem>>, %arg15: memref<32x64xbf16, #tpu.memory_space<vmem>>, %arg16: memref<1x64xf32, #tpu.memory_space<vmem>>, %arg17: memref<32x32xbf16, #tpu.memory_space<vmem>>, %arg18: memref<1x32xf32, #tpu.memory_space<vmem>>, %arg19: memref<1x32xf32, #tpu.memory_space<vmem>>, %arg20: memref<1x32xf32, #tpu.memory_space<vmem>>, %arg21: memref<32x64xbf16, #tpu.memory_space<vmem>>, %arg22: memref<1x64xf32, #tpu.memory_space<vmem>>, %arg23: memref<64x32xbf16, #tpu.memory_space<vmem>>, %arg24: memref<1x32xf32, #tpu.memory_space<vmem>>, %arg25: memref<1x8x32xbf16, #tpu.memory_space<vmem>>) attributes {dimension_semantics = [#tpu.dimension_semantics<parallel>], iteration_bounds = array<i64: 2>, scalar_prefetch = 0 : i64, scratch_operands = 0 : i64, tpu.core_type = #tpu.core_type<tc>, window_params = [{transform_indices = @transform_0, window_bounds = array<i64: 1, 8, 32>}, {transform_indices = @transform_1, window_bounds = array<i64: 1, 16, 32>}, {transform_indices = @transform_2, window_bounds = array<i64: 1, 1, 8>}, {transform_indices = @transform_3, window_bounds = array<i64: 1, 8, 1>}, {pipeline_mode = #tpu.pipeline_mode<synchronous>, transform_indices = @transform_4, window_bounds = array<i64: 1, 32>}, {pipeline_mode = #tpu.pipeline_mode<synchronous>, transform_indices = @transform_5, window_bounds = array<i64: 1, 32>}, {pipeline_mode = #tpu.pipeline_mode<synchronous>, transform_indices = @transform_6, window_bounds = array<i64: 32, 96>}, {pipeline_mode = #tpu.pipeline_mode<synchronous>, transform_indices = @transform_7, window_bounds = array<i64: 1, 96>}, {pipeline_mode = #tpu.pipeline_mode<synchronous>, transform_indices = @transform_8, window_bounds = array<i64: 32, 32>}, {pipeline_mode = #tpu.pipeline_mode<synchronous>, transform_indices = @transform_9, window_bounds = array<i64: 1, 32>}, {pipeline_mode = #tpu.pipeline_mode<synchronous>, transform_indices = @transform_10, window_bounds = array<i64: 1, 32>}, {pipeline_mode = #tpu.pipeline_mode<synchronous>, transform_indices = @transform_11, window_bounds = array<i64: 1, 32>}, {pipeline_mode = #tpu.pipeline_mode<synchronous>, transform_indices = @transform_12, window_bounds = array<i64: 32, 32>}, {pipeline_mode = #tpu.pipeline_mode<synchronous>, transform_indices = @transform_13, window_bounds = array<i64: 1, 32>}, {pipeline_mode = #tpu.pipeline_mode<synchronous>, transform_indices = @transform_14, window_bounds = array<i64: 32, 64>}, {pipeline_mode = #tpu.pipeline_mode<synchronous>, transform_indices = @transform_15, window_bounds = array<i64: 1, 64>}, {pipeline_mode = #tpu.pipeline_mode<synchronous>, transform_indices = @transform_16, window_bounds = array<i64: 32, 32>}, {pipeline_mode = #tpu.pipeline_mode<synchronous>, transform_indices = @transform_17, window_bounds = array<i64: 1, 32>}, {pipeline_mode = #tpu.pipeline_mode<synchronous>, transform_indices = @transform_18, window_bounds = array<i64: 1, 32>}, {pipeline_mode = #tpu.pipeline_mode<synchronous>, transform_indices = @transform_19, window_bounds = array<i64: 1, 32>}, {pipeline_mode = #tpu.pipeline_mode<synchronous>, transform_indices = @transform_20, window_bounds = array<i64: 32, 64>}, {pipeline_mode = #tpu.pipeline_mode<synchronous>, transform_indices = @transform_21, window_bounds = array<i64: 1, 64>}, {pipeline_mode = #tpu.pipeline_mode<synchronous>, transform_indices = @transform_22, window_bounds = array<i64: 64, 32>}, {pipeline_mode = #tpu.pipeline_mode<synchronous>, transform_indices = @transform_23, window_bounds = array<i64: 1, 32>}, {transform_indices = @transform_24, window_bounds = array<i64: 1, 8, 32>}]} {
    %c0 = arith.constant 0 : index
    %c0_0 = arith.constant 0 : index
    %c0_1 = arith.constant 0 : index
    %0 = vector.load %arg1[%c0, %c0_0, %c0_1] : memref<1x8x32xbf16, #tpu.memory_space<vmem>>, vector<1x8x32xbf16>
    %1 = vector.shape_cast %0 : vector<1x8x32xbf16> to vector<8x32xbf16>
    %2 = arith.extf %1 : vector<8x32xbf16> to vector<8x32xf32>
    %c0_2 = arith.constant 0 : index
    %c0_3 = arith.constant 0 : index
    %c0_4 = arith.constant 0 : index
    %3 = vector.load %arg2[%c0_2, %c0_3, %c0_4] : memref<1x16x32xbf16, #tpu.memory_space<vmem>>, vector<1x16x32xbf16>
    %4 = vector.shape_cast %3 : vector<1x16x32xbf16> to vector<16x32xbf16>
    %c0_5 = arith.constant 0 : index
    %c0_6 = arith.constant 0 : index
    %c0_7 = arith.constant 0 : index
    %5 = vector.load %arg3[%c0_5, %c0_6, %c0_7] : memref<1x1x8xf32, #tpu.memory_space<vmem>>, vector<1x1x8xf32>
    %6 = vector.shape_cast %5 : vector<1x1x8xf32> to vector<1x8xf32>
    %cst = arith.constant 5.000000e-01 : f32
    %7 = vector.broadcast %cst : f32 to vector<1x8xf32>
    %8 = arith.cmpf ogt, %6, %7 : vector<1x8xf32>
    %c0_8 = arith.constant 0 : index
    %c0_9 = arith.constant 0 : index
    %c0_10 = arith.constant 0 : index
    %9 = vector.load %arg4[%c0_8, %c0_9, %c0_10] : memref<1x8x1xf32, #tpu.memory_space<vmem>>, vector<1x8x1xf32>
    %10 = vector.shape_cast %9 : vector<1x8x1xf32> to vector<8x1xf32>
    %cst_11 = arith.constant 5.000000e-01 : f32
    %11 = vector.broadcast %cst_11 : f32 to vector<8x1xf32>
    %12 = arith.cmpf ogt, %10, %11 : vector<8x1xf32>
    %13 = tpu.iota {dimensions = array<i32: 0>} : vector<8x8xi32>
    %14 = tpu.iota {dimensions = array<i32: 1>} : vector<8x8xi32>
    %15 = vector.broadcast %8 : vector<1x8xi1> to vector<8x8xi1>
    %16 = vector.broadcast %12 : vector<8x1xi1> to vector<8x8xi1>
    %17 = arith.ori %15, %16 : vector<8x8xi1>
    %18 = arith.cmpi sgt, %14, %13 : vector<8x8xi32>
    %19 = arith.ori %17, %18 : vector<8x8xi1>
    %cst_12 = arith.constant -1.000000e+09 : f32
    %cst_13 = arith.constant 0.000000e+00 : f32
    %20 = vector.broadcast %cst_12 : f32 to vector<8x8xf32>
    %21 = vector.broadcast %cst_13 : f32 to vector<8x8xf32>
    %22 = arith.select %19, %20, %21 : vector<8x8xi1>, vector<8x8xf32>
    %c0_14 = arith.constant 0 : index
    %c0_15 = arith.constant 0 : index
    %23 = vector.load %arg5[%c0_14, %c0_15] : memref<1x32xf32, #tpu.memory_space<vmem>>, vector<1x32xf32>
    %c0_16 = arith.constant 0 : index
    %c0_17 = arith.constant 0 : index
    %24 = vector.load %arg6[%c0_16, %c0_17] : memref<1x32xf32, #tpu.memory_space<vmem>>, vector<1x32xf32>
    %cst_18 = arith.constant dense<0.000000e+00> : vector<8xf32>
    %25 = vector.multi_reduction <add>, %2, %cst_18 [1] : vector<8x32xf32> to vector<8xf32>
    %26 = vector.shape_cast %25 : vector<8xf32> to vector<8x1xf32>
    %cst_19 = arith.constant 3.200000e+01 : f32
    %27 = vector.broadcast %cst_19 : f32 to vector<8x1xf32>
    %28 = arith.divf %26, %27 : vector<8x1xf32>
    %29 = vector.broadcast %28 : vector<8x1xf32> to vector<8x32xf32>
    %30 = arith.subf %2, %29 : vector<8x32xf32>
    %31 = arith.mulf %30, %30 : vector<8x32xf32>
    %cst_20 = arith.constant dense<0.000000e+00> : vector<8xf32>
    %32 = vector.multi_reduction <add>, %31, %cst_20 [1] : vector<8x32xf32> to vector<8xf32>
    %33 = vector.shape_cast %32 : vector<8xf32> to vector<8x1xf32>
    %cst_21 = arith.constant 3.200000e+01 : f32
    %34 = vector.broadcast %cst_21 : f32 to vector<8x1xf32>
    %35 = arith.divf %33, %34 : vector<8x1xf32>
    %36 = vector.broadcast %28 : vector<8x1xf32> to vector<8x32xf32>
    %37 = arith.subf %2, %36 : vector<8x32xf32>
    %cst_22 = arith.constant 9.99999974E-6 : f32
    %38 = vector.broadcast %cst_22 : f32 to vector<8x1xf32>
    %39 = arith.addf %35, %38 : vector<8x1xf32>
    %40 = math.rsqrt %39 : vector<8x1xf32>
    %41 = vector.broadcast %40 : vector<8x1xf32> to vector<8x32xf32>
    %42 = arith.mulf %37, %41 : vector<8x32xf32>
    %43 = vector.broadcast %23 : vector<1x32xf32> to vector<8x32xf32>
    %44 = arith.mulf %42, %43 : vector<8x32xf32>
    %45 = vector.broadcast %24 : vector<1x32xf32> to vector<8x32xf32>
    %46 = arith.addf %44, %45 : vector<8x32xf32>
    %47 = arith.truncf %46 : vector<8x32xf32> to vector<8x32xbf16>
    %c0_23 = arith.constant 0 : index
    %c0_24 = arith.constant 0 : index
    %48 = vector.load %arg7[%c0_23, %c0_24] : memref<32x96xbf16, #tpu.memory_space<vmem>>, vector<32x96xbf16>
    %cst_25 = arith.constant dense<0.000000e+00> : vector<8x96xf32>
    %49 = tpu.matmul %47, %48, %cst_25 {dimension_numbers = #tpu.dot_dimension_numbers<[1], [0], [0], [1], [0, 0, 1, 1], [], []>} : vector<8x32xbf16>, vector<32x96xbf16>, vector<8x96xf32> -> vector<8x96xf32>
    %c0_26 = arith.constant 0 : index
    %c0_27 = arith.constant 0 : index
    %50 = vector.load %arg8[%c0_26, %c0_27] : memref<1x96xf32, #tpu.memory_space<vmem>>, vector<1x96xf32>
    %51 = vector.broadcast %50 : vector<1x96xf32> to vector<8x96xf32>
    %52 = arith.addf %49, %51 : vector<8x96xf32>
    %53 = vector.extract_strided_slice %52 {offsets = [0, 0], sizes = [8, 32], strides = [1, 1]} : vector<8x96xf32> to vector<8x32xf32>
    %54 = vector.extract_strided_slice %52 {offsets = [0, 32], sizes = [8, 32], strides = [1, 1]} : vector<8x96xf32> to vector<8x32xf32>
    %55 = vector.extract_strided_slice %52 {offsets = [0, 64], sizes = [8, 32], strides = [1, 1]} : vector<8x96xf32> to vector<8x32xf32>
    %56 = arith.truncf %53 : vector<8x32xf32> to vector<8x32xbf16>
    %57 = vector.extract_strided_slice %56 {offsets = [0, 0], sizes = [8, 8], strides = [1, 1]} : vector<8x32xbf16> to vector<8x8xbf16>
    %58 = vector.extract_strided_slice %56 {offsets = [0, 8], sizes = [8, 8], strides = [1, 1]} : vector<8x32xbf16> to vector<8x8xbf16>
    %59 = vector.extract_strided_slice %56 {offsets = [0, 16], sizes = [8, 8], strides = [1, 1]} : vector<8x32xbf16> to vector<8x8xbf16>
    %60 = vector.extract_strided_slice %56 {offsets = [0, 24], sizes = [8, 8], strides = [1, 1]} : vector<8x32xbf16> to vector<8x8xbf16>
    %61 = vector.shape_cast %57 : vector<8x8xbf16> to vector<1x8x8xbf16>
    %62 = vector.shape_cast %58 : vector<8x8xbf16> to vector<1x8x8xbf16>
    %63 = vector.shape_cast %59 : vector<8x8xbf16> to vector<1x8x8xbf16>
    %64 = vector.shape_cast %60 : vector<8x8xbf16> to vector<1x8x8xbf16>
    %65 = tpu.concatenate %61, %62, %63, %64 in 0 : vector<1x8x8xbf16>, vector<1x8x8xbf16>, vector<1x8x8xbf16>, vector<1x8x8xbf16> -> vector<4x8x8xbf16>
    %66 = arith.truncf %54 : vector<8x32xf32> to vector<8x32xbf16>
    %67 = vector.extract_strided_slice %66 {offsets = [0, 0], sizes = [8, 8], strides = [1, 1]} : vector<8x32xbf16> to vector<8x8xbf16>
    %68 = vector.extract_strided_slice %66 {offsets = [0, 8], sizes = [8, 8], strides = [1, 1]} : vector<8x32xbf16> to vector<8x8xbf16>
    %69 = vector.extract_strided_slice %66 {offsets = [0, 16], sizes = [8, 8], strides = [1, 1]} : vector<8x32xbf16> to vector<8x8xbf16>
    %70 = vector.extract_strided_slice %66 {offsets = [0, 24], sizes = [8, 8], strides = [1, 1]} : vector<8x32xbf16> to vector<8x8xbf16>
    %71 = vector.shape_cast %67 : vector<8x8xbf16> to vector<1x8x8xbf16>
    %72 = vector.shape_cast %68 : vector<8x8xbf16> to vector<1x8x8xbf16>
    %73 = vector.shape_cast %69 : vector<8x8xbf16> to vector<1x8x8xbf16>
    %74 = vector.shape_cast %70 : vector<8x8xbf16> to vector<1x8x8xbf16>
    %75 = tpu.concatenate %71, %72, %73, %74 in 0 : vector<1x8x8xbf16>, vector<1x8x8xbf16>, vector<1x8x8xbf16>, vector<1x8x8xbf16> -> vector<4x8x8xbf16>
    %76 = arith.truncf %55 : vector<8x32xf32> to vector<8x32xbf16>
    %77 = vector.extract_strided_slice %76 {offsets = [0, 0], sizes = [8, 8], strides = [1, 1]} : vector<8x32xbf16> to vector<8x8xbf16>
    %78 = vector.extract_strided_slice %76 {offsets = [0, 8], sizes = [8, 8], strides = [1, 1]} : vector<8x32xbf16> to vector<8x8xbf16>
    %79 = vector.extract_strided_slice %76 {offsets = [0, 16], sizes = [8, 8], strides = [1, 1]} : vector<8x32xbf16> to vector<8x8xbf16>
    %80 = vector.extract_strided_slice %76 {offsets = [0, 24], sizes = [8, 8], strides = [1, 1]} : vector<8x32xbf16> to vector<8x8xbf16>
    %81 = vector.shape_cast %77 : vector<8x8xbf16> to vector<1x8x8xbf16>
    %82 = vector.shape_cast %78 : vector<8x8xbf16> to vector<1x8x8xbf16>
    %83 = vector.shape_cast %79 : vector<8x8xbf16> to vector<1x8x8xbf16>
    %84 = vector.shape_cast %80 : vector<8x8xbf16> to vector<1x8x8xbf16>
    %85 = tpu.concatenate %81, %82, %83, %84 in 0 : vector<1x8x8xbf16>, vector<1x8x8xbf16>, vector<1x8x8xbf16>, vector<1x8x8xbf16> -> vector<4x8x8xbf16>
    "tpu.trace_start"() <{level = 10 : i32, message = "hqd,hkd->hqk"}> : () -> ()
    %cst_28 = arith.constant dense<0.000000e+00> : vector<4x8x8xf32>
    %86 = tpu.matmul %65, %75, %cst_28 {dimension_numbers = #tpu.dot_dimension_numbers<[2], [2], [1], [1], [0, 0, 0, 1, 1, 1], [0], [0]>} : vector<4x8x8xbf16>, vector<4x8x8xbf16>, vector<4x8x8xf32> -> vector<4x8x8xf32>
    "tpu.trace_stop"() : () -> ()
    %87 = vector.shape_cast %22 : vector<8x8xf32> to vector<1x8x8xf32>
    %88 = vector.broadcast %87 : vector<1x8x8xf32> to vector<4x8x8xf32>
    %89 = arith.addf %86, %88 : vector<4x8x8xf32>
    %cst_29 = arith.constant dense<0xFF800000> : vector<4x8xf32>
    %90 = vector.multi_reduction <maximumf>, %89, %cst_29 [2] : vector<4x8x8xf32> to vector<4x8xf32>
    %91 = vector.shape_cast %90 : vector<4x8xf32> to vector<4x8x1xf32>
    %92 = vector.broadcast %91 : vector<4x8x1xf32> to vector<4x8x8xf32>
    %93 = arith.subf %89, %92 : vector<4x8x8xf32>
    %94 = math.exp %93 : vector<4x8x8xf32>
    %cst_30 = arith.constant dense<0.000000e+00> : vector<4x8xf32>
    %95 = vector.multi_reduction <add>, %94, %cst_30 [2] : vector<4x8x8xf32> to vector<4x8xf32>
    %96 = vector.shape_cast %95 : vector<4x8xf32> to vector<4x8x1xf32>
    %97 = tpu.reciprocal %96 {approx = true} : vector<4x8x1xf32> -> vector<4x8x1xf32>
    %98 = vector.broadcast %97 : vector<4x8x1xf32> to vector<4x8x8xf32>
    %99 = arith.mulf %94, %98 : vector<4x8x8xf32>
    %100 = arith.truncf %99 : vector<4x8x8xf32> to vector<4x8x8xbf16>
    "tpu.trace_start"() <{level = 10 : i32, message = "hqk,hkd->hqd"}> : () -> ()
    %cst_31 = arith.constant dense<0.000000e+00> : vector<4x8x8xf32>
    %101 = tpu.matmul %100, %85, %cst_31 {dimension_numbers = #tpu.dot_dimension_numbers<[2], [1], [1], [2], [0, 0, 0, 1, 1, 2], [0], [0]>} : vector<4x8x8xbf16>, vector<4x8x8xbf16>, vector<4x8x8xf32> -> vector<4x8x8xf32>
    "tpu.trace_stop"() : () -> ()
    %102 = vector.extract_strided_slice %101 {offsets = [0, 0, 0], sizes = [1, 8, 8], strides = [1, 1, 1]} : vector<4x8x8xf32> to vector<1x8x8xf32>
    %103 = vector.shape_cast %102 : vector<1x8x8xf32> to vector<8x8xf32>
    %104 = vector.extract_strided_slice %101 {offsets = [1, 0, 0], sizes = [1, 8, 8], strides = [1, 1, 1]} : vector<4x8x8xf32> to vector<1x8x8xf32>
    %105 = vector.shape_cast %104 : vector<1x8x8xf32> to vector<8x8xf32>
    %106 = vector.extract_strided_slice %101 {offsets = [2, 0, 0], sizes = [1, 8, 8], strides = [1, 1, 1]} : vector<4x8x8xf32> to vector<1x8x8xf32>
    %107 = vector.shape_cast %106 : vector<1x8x8xf32> to vector<8x8xf32>
    %108 = vector.extract_strided_slice %101 {offsets = [3, 0, 0], sizes = [1, 8, 8], strides = [1, 1, 1]} : vector<4x8x8xf32> to vector<1x8x8xf32>
    %109 = vector.shape_cast %108 : vector<1x8x8xf32> to vector<8x8xf32>
    %110 = tpu.concatenate %103, %105, %107, %109 in 1 : vector<8x8xf32>, vector<8x8xf32>, vector<8x8xf32>, vector<8x8xf32> -> vector<8x32xf32>
    %111 = arith.truncf %110 : vector<8x32xf32> to vector<8x32xbf16>
    %c0_32 = arith.constant 0 : index
    %c0_33 = arith.constant 0 : index
    %112 = vector.load %arg9[%c0_32, %c0_33] : memref<32x32xbf16, #tpu.memory_space<vmem>>, vector<32x32xbf16>
    %cst_34 = arith.constant dense<0.000000e+00> : vector<8x32xf32>
    %113 = tpu.matmul %111, %112, %cst_34 {dimension_numbers = #tpu.dot_dimension_numbers<[1], [0], [0], [1], [0, 0, 1, 1], [], []>} : vector<8x32xbf16>, vector<32x32xbf16>, vector<8x32xf32> -> vector<8x32xf32>
    %114 = arith.addf %2, %113 : vector<8x32xf32>
    %c0_35 = arith.constant 0 : index
    %c0_36 = arith.constant 0 : index
    %115 = vector.load %arg10[%c0_35, %c0_36] : memref<1x32xf32, #tpu.memory_space<vmem>>, vector<1x32xf32>
    %116 = vector.broadcast %115 : vector<1x32xf32> to vector<8x32xf32>
    %117 = arith.addf %114, %116 : vector<8x32xf32>
    %c0_37 = arith.constant 0 : index
    %c0_38 = arith.constant 0 : index
    %118 = vector.load %arg11[%c0_37, %c0_38] : memref<1x32xf32, #tpu.memory_space<vmem>>, vector<1x32xf32>
    %c0_39 = arith.constant 0 : index
    %c0_40 = arith.constant 0 : index
    %119 = vector.load %arg12[%c0_39, %c0_40] : memref<1x32xf32, #tpu.memory_space<vmem>>, vector<1x32xf32>
    %cst_41 = arith.constant dense<0.000000e+00> : vector<8xf32>
    %120 = vector.multi_reduction <add>, %117, %cst_41 [1] : vector<8x32xf32> to vector<8xf32>
    %121 = vector.shape_cast %120 : vector<8xf32> to vector<8x1xf32>
    %cst_42 = arith.constant 3.200000e+01 : f32
    %122 = vector.broadcast %cst_42 : f32 to vector<8x1xf32>
    %123 = arith.divf %121, %122 : vector<8x1xf32>
    %124 = vector.broadcast %123 : vector<8x1xf32> to vector<8x32xf32>
    %125 = arith.subf %117, %124 : vector<8x32xf32>
    %126 = arith.mulf %125, %125 : vector<8x32xf32>
    %cst_43 = arith.constant dense<0.000000e+00> : vector<8xf32>
    %127 = vector.multi_reduction <add>, %126, %cst_43 [1] : vector<8x32xf32> to vector<8xf32>
    %128 = vector.shape_cast %127 : vector<8xf32> to vector<8x1xf32>
    %cst_44 = arith.constant 3.200000e+01 : f32
    %129 = vector.broadcast %cst_44 : f32 to vector<8x1xf32>
    %130 = arith.divf %128, %129 : vector<8x1xf32>
    %131 = vector.broadcast %123 : vector<8x1xf32> to vector<8x32xf32>
    %132 = arith.subf %117, %131 : vector<8x32xf32>
    %cst_45 = arith.constant 9.99999974E-6 : f32
    %133 = vector.broadcast %cst_45 : f32 to vector<8x1xf32>
    %134 = arith.addf %130, %133 : vector<8x1xf32>
    %135 = math.rsqrt %134 : vector<8x1xf32>
    %136 = vector.broadcast %135 : vector<8x1xf32> to vector<8x32xf32>
    %137 = arith.mulf %132, %136 : vector<8x32xf32>
    %138 = vector.broadcast %118 : vector<1x32xf32> to vector<8x32xf32>
    %139 = arith.mulf %137, %138 : vector<8x32xf32>
    %140 = vector.broadcast %119 : vector<1x32xf32> to vector<8x32xf32>
    %141 = arith.addf %139, %140 : vector<8x32xf32>
    %142 = arith.truncf %141 : vector<8x32xf32> to vector<8x32xbf16>
    %c0_46 = arith.constant 0 : index
    %c0_47 = arith.constant 0 : index
    %143 = vector.load %arg13[%c0_46, %c0_47] : memref<32x32xbf16, #tpu.memory_space<vmem>>, vector<32x32xbf16>
    %cst_48 = arith.constant dense<0.000000e+00> : vector<8x32xf32>
    %144 = tpu.matmul %142, %143, %cst_48 {dimension_numbers = #tpu.dot_dimension_numbers<[1], [0], [0], [1], [0, 0, 1, 1], [], []>} : vector<8x32xbf16>, vector<32x32xbf16>, vector<8x32xf32> -> vector<8x32xf32>
    %c0_49 = arith.constant 0 : index
    %c0_50 = arith.constant 0 : index
    %145 = vector.load %arg14[%c0_49, %c0_50] : memref<1x32xf32, #tpu.memory_space<vmem>>, vector<1x32xf32>
    %146 = vector.broadcast %145 : vector<1x32xf32> to vector<8x32xf32>
    %147 = arith.addf %144, %146 : vector<8x32xf32>
    %c0_51 = arith.constant 0 : index
    %c0_52 = arith.constant 0 : index
    %148 = vector.load %arg15[%c0_51, %c0_52] : memref<32x64xbf16, #tpu.memory_space<vmem>>, vector<32x64xbf16>
    %cst_53 = arith.constant dense<0.000000e+00> : vector<16x64xf32>
    %149 = tpu.matmul %4, %148, %cst_53 {dimension_numbers = #tpu.dot_dimension_numbers<[1], [0], [0], [1], [0, 0, 1, 1], [], []>} : vector<16x32xbf16>, vector<32x64xbf16>, vector<16x64xf32> -> vector<16x64xf32>
    %c0_54 = arith.constant 0 : index
    %c0_55 = arith.constant 0 : index
    %150 = vector.load %arg16[%c0_54, %c0_55] : memref<1x64xf32, #tpu.memory_space<vmem>>, vector<1x64xf32>
    %151 = vector.broadcast %150 : vector<1x64xf32> to vector<16x64xf32>
    %152 = arith.addf %149, %151 : vector<16x64xf32>
    %153 = vector.extract_strided_slice %152 {offsets = [0, 0], sizes = [16, 32], strides = [1, 1]} : vector<16x64xf32> to vector<16x32xf32>
    %154 = vector.extract_strided_slice %152 {offsets = [0, 32], sizes = [16, 32], strides = [1, 1]} : vector<16x64xf32> to vector<16x32xf32>
    %155 = arith.truncf %147 : vector<8x32xf32> to vector<8x32xbf16>
    %156 = vector.extract_strided_slice %155 {offsets = [0, 0], sizes = [8, 8], strides = [1, 1]} : vector<8x32xbf16> to vector<8x8xbf16>
    %157 = vector.extract_strided_slice %155 {offsets = [0, 8], sizes = [8, 8], strides = [1, 1]} : vector<8x32xbf16> to vector<8x8xbf16>
    %158 = vector.extract_strided_slice %155 {offsets = [0, 16], sizes = [8, 8], strides = [1, 1]} : vector<8x32xbf16> to vector<8x8xbf16>
    %159 = vector.extract_strided_slice %155 {offsets = [0, 24], sizes = [8, 8], strides = [1, 1]} : vector<8x32xbf16> to vector<8x8xbf16>
    %160 = vector.shape_cast %156 : vector<8x8xbf16> to vector<1x8x8xbf16>
    %161 = vector.shape_cast %157 : vector<8x8xbf16> to vector<1x8x8xbf16>
    %162 = vector.shape_cast %158 : vector<8x8xbf16> to vector<1x8x8xbf16>
    %163 = vector.shape_cast %159 : vector<8x8xbf16> to vector<1x8x8xbf16>
    %164 = tpu.concatenate %160, %161, %162, %163 in 0 : vector<1x8x8xbf16>, vector<1x8x8xbf16>, vector<1x8x8xbf16>, vector<1x8x8xbf16> -> vector<4x8x8xbf16>
    %165 = arith.truncf %153 : vector<16x32xf32> to vector<16x32xbf16>
    %166 = vector.extract_strided_slice %165 {offsets = [0, 0], sizes = [16, 8], strides = [1, 1]} : vector<16x32xbf16> to vector<16x8xbf16>
    %167 = vector.extract_strided_slice %165 {offsets = [0, 8], sizes = [16, 8], strides = [1, 1]} : vector<16x32xbf16> to vector<16x8xbf16>
    %168 = vector.extract_strided_slice %165 {offsets = [0, 16], sizes = [16, 8], strides = [1, 1]} : vector<16x32xbf16> to vector<16x8xbf16>
    %169 = vector.extract_strided_slice %165 {offsets = [0, 24], sizes = [16, 8], strides = [1, 1]} : vector<16x32xbf16> to vector<16x8xbf16>
    %170 = vector.shape_cast %166 : vector<16x8xbf16> to vector<1x16x8xbf16>
    %171 = vector.shape_cast %167 : vector<16x8xbf16> to vector<1x16x8xbf16>
    %172 = vector.shape_cast %168 : vector<16x8xbf16> to vector<1x16x8xbf16>
    %173 = vector.shape_cast %169 : vector<16x8xbf16> to vector<1x16x8xbf16>
    %174 = tpu.concatenate %170, %171, %172, %173 in 0 : vector<1x16x8xbf16>, vector<1x16x8xbf16>, vector<1x16x8xbf16>, vector<1x16x8xbf16> -> vector<4x16x8xbf16>
    %175 = arith.truncf %154 : vector<16x32xf32> to vector<16x32xbf16>
    %176 = vector.extract_strided_slice %175 {offsets = [0, 0], sizes = [16, 8], strides = [1, 1]} : vector<16x32xbf16> to vector<16x8xbf16>
    %177 = vector.extract_strided_slice %175 {offsets = [0, 8], sizes = [16, 8], strides = [1, 1]} : vector<16x32xbf16> to vector<16x8xbf16>
    %178 = vector.extract_strided_slice %175 {offsets = [0, 16], sizes = [16, 8], strides = [1, 1]} : vector<16x32xbf16> to vector<16x8xbf16>
    %179 = vector.extract_strided_slice %175 {offsets = [0, 24], sizes = [16, 8], strides = [1, 1]} : vector<16x32xbf16> to vector<16x8xbf16>
    %180 = vector.shape_cast %176 : vector<16x8xbf16> to vector<1x16x8xbf16>
    %181 = vector.shape_cast %177 : vector<16x8xbf16> to vector<1x16x8xbf16>
    %182 = vector.shape_cast %178 : vector<16x8xbf16> to vector<1x16x8xbf16>
    %183 = vector.shape_cast %179 : vector<16x8xbf16> to vector<1x16x8xbf16>
    %184 = tpu.concatenate %180, %181, %182, %183 in 0 : vector<1x16x8xbf16>, vector<1x16x8xbf16>, vector<1x16x8xbf16>, vector<1x16x8xbf16> -> vector<4x16x8xbf16>
    "tpu.trace_start"() <{level = 10 : i32, message = "hqd,hkd->hqk"}> : () -> ()
    %cst_56 = arith.constant dense<0.000000e+00> : vector<4x8x16xf32>
    %185 = tpu.matmul %164, %174, %cst_56 {dimension_numbers = #tpu.dot_dimension_numbers<[2], [2], [1], [1], [0, 0, 0, 1, 1, 1], [0], [0]>} : vector<4x8x8xbf16>, vector<4x16x8xbf16>, vector<4x8x16xf32> -> vector<4x8x16xf32>
    "tpu.trace_stop"() : () -> ()
    %cst_57 = arith.constant dense<0xFF800000> : vector<4x8xf32>
    %186 = vector.multi_reduction <maximumf>, %185, %cst_57 [2] : vector<4x8x16xf32> to vector<4x8xf32>
    %187 = vector.shape_cast %186 : vector<4x8xf32> to vector<4x8x1xf32>
    %188 = vector.broadcast %187 : vector<4x8x1xf32> to vector<4x8x16xf32>
    %189 = arith.subf %185, %188 : vector<4x8x16xf32>
    %190 = math.exp %189 : vector<4x8x16xf32>
    %cst_58 = arith.constant dense<0.000000e+00> : vector<4x8xf32>
    %191 = vector.multi_reduction <add>, %190, %cst_58 [2] : vector<4x8x16xf32> to vector<4x8xf32>
    %192 = vector.shape_cast %191 : vector<4x8xf32> to vector<4x8x1xf32>
    %193 = tpu.reciprocal %192 {approx = true} : vector<4x8x1xf32> -> vector<4x8x1xf32>
    %194 = vector.broadcast %193 : vector<4x8x1xf32> to vector<4x8x16xf32>
    %195 = arith.mulf %190, %194 : vector<4x8x16xf32>
    %196 = arith.truncf %195 : vector<4x8x16xf32> to vector<4x8x16xbf16>
    "tpu.trace_start"() <{level = 10 : i32, message = "hqk,hkd->hqd"}> : () -> ()
    %cst_59 = arith.constant dense<0.000000e+00> : vector<4x8x8xf32>
    %197 = tpu.matmul %196, %184, %cst_59 {dimension_numbers = #tpu.dot_dimension_numbers<[2], [1], [1], [2], [0, 0, 0, 1, 1, 2], [0], [0]>} : vector<4x8x16xbf16>, vector<4x16x8xbf16>, vector<4x8x8xf32> -> vector<4x8x8xf32>
    "tpu.trace_stop"() : () -> ()
    %198 = vector.extract_strided_slice %197 {offsets = [0, 0, 0], sizes = [1, 8, 8], strides = [1, 1, 1]} : vector<4x8x8xf32> to vector<1x8x8xf32>
    %199 = vector.shape_cast %198 : vector<1x8x8xf32> to vector<8x8xf32>
    %200 = vector.extract_strided_slice %197 {offsets = [1, 0, 0], sizes = [1, 8, 8], strides = [1, 1, 1]} : vector<4x8x8xf32> to vector<1x8x8xf32>
    %201 = vector.shape_cast %200 : vector<1x8x8xf32> to vector<8x8xf32>
    %202 = vector.extract_strided_slice %197 {offsets = [2, 0, 0], sizes = [1, 8, 8], strides = [1, 1, 1]} : vector<4x8x8xf32> to vector<1x8x8xf32>
    %203 = vector.shape_cast %202 : vector<1x8x8xf32> to vector<8x8xf32>
    %204 = vector.extract_strided_slice %197 {offsets = [3, 0, 0], sizes = [1, 8, 8], strides = [1, 1, 1]} : vector<4x8x8xf32> to vector<1x8x8xf32>
    %205 = vector.shape_cast %204 : vector<1x8x8xf32> to vector<8x8xf32>
    %206 = tpu.concatenate %199, %201, %203, %205 in 1 : vector<8x8xf32>, vector<8x8xf32>, vector<8x8xf32>, vector<8x8xf32> -> vector<8x32xf32>
    %207 = arith.truncf %206 : vector<8x32xf32> to vector<8x32xbf16>
    %c0_60 = arith.constant 0 : index
    %c0_61 = arith.constant 0 : index
    %208 = vector.load %arg17[%c0_60, %c0_61] : memref<32x32xbf16, #tpu.memory_space<vmem>>, vector<32x32xbf16>
    %cst_62 = arith.constant dense<0.000000e+00> : vector<8x32xf32>
    %209 = tpu.matmul %207, %208, %cst_62 {dimension_numbers = #tpu.dot_dimension_numbers<[1], [0], [0], [1], [0, 0, 1, 1], [], []>} : vector<8x32xbf16>, vector<32x32xbf16>, vector<8x32xf32> -> vector<8x32xf32>
    %210 = arith.addf %117, %209 : vector<8x32xf32>
    %c0_63 = arith.constant 0 : index
    %c0_64 = arith.constant 0 : index
    %211 = vector.load %arg18[%c0_63, %c0_64] : memref<1x32xf32, #tpu.memory_space<vmem>>, vector<1x32xf32>
    %212 = vector.broadcast %211 : vector<1x32xf32> to vector<8x32xf32>
    %213 = arith.addf %210, %212 : vector<8x32xf32>
    %c0_65 = arith.constant 0 : index
    %c0_66 = arith.constant 0 : index
    %214 = vector.load %arg19[%c0_65, %c0_66] : memref<1x32xf32, #tpu.memory_space<vmem>>, vector<1x32xf32>
    %c0_67 = arith.constant 0 : index
    %c0_68 = arith.constant 0 : index
    %215 = vector.load %arg20[%c0_67, %c0_68] : memref<1x32xf32, #tpu.memory_space<vmem>>, vector<1x32xf32>
    %cst_69 = arith.constant dense<0.000000e+00> : vector<8xf32>
    %216 = vector.multi_reduction <add>, %213, %cst_69 [1] : vector<8x32xf32> to vector<8xf32>
    %217 = vector.shape_cast %216 : vector<8xf32> to vector<8x1xf32>
    %cst_70 = arith.constant 3.200000e+01 : f32
    %218 = vector.broadcast %cst_70 : f32 to vector<8x1xf32>
    %219 = arith.divf %217, %218 : vector<8x1xf32>
    %220 = vector.broadcast %219 : vector<8x1xf32> to vector<8x32xf32>
    %221 = arith.subf %213, %220 : vector<8x32xf32>
    %222 = arith.mulf %221, %221 : vector<8x32xf32>
    %cst_71 = arith.constant dense<0.000000e+00> : vector<8xf32>
    %223 = vector.multi_reduction <add>, %222, %cst_71 [1] : vector<8x32xf32> to vector<8xf32>
    %224 = vector.shape_cast %223 : vector<8xf32> to vector<8x1xf32>
    %cst_72 = arith.constant 3.200000e+01 : f32
    %225 = vector.broadcast %cst_72 : f32 to vector<8x1xf32>
    %226 = arith.divf %224, %225 : vector<8x1xf32>
    %227 = vector.broadcast %219 : vector<8x1xf32> to vector<8x32xf32>
    %228 = arith.subf %213, %227 : vector<8x32xf32>
    %cst_73 = arith.constant 9.99999974E-6 : f32
    %229 = vector.broadcast %cst_73 : f32 to vector<8x1xf32>
    %230 = arith.addf %226, %229 : vector<8x1xf32>
    %231 = math.rsqrt %230 : vector<8x1xf32>
    %232 = vector.broadcast %231 : vector<8x1xf32> to vector<8x32xf32>
    %233 = arith.mulf %228, %232 : vector<8x32xf32>
    %234 = vector.broadcast %214 : vector<1x32xf32> to vector<8x32xf32>
    %235 = arith.mulf %233, %234 : vector<8x32xf32>
    %236 = vector.broadcast %215 : vector<1x32xf32> to vector<8x32xf32>
    %237 = arith.addf %235, %236 : vector<8x32xf32>
    %238 = arith.truncf %237 : vector<8x32xf32> to vector<8x32xbf16>
    %c0_74 = arith.constant 0 : index
    %c0_75 = arith.constant 0 : index
    %239 = vector.load %arg21[%c0_74, %c0_75] : memref<32x64xbf16, #tpu.memory_space<vmem>>, vector<32x64xbf16>
    %cst_76 = arith.constant dense<0.000000e+00> : vector<8x64xf32>
    %240 = tpu.matmul %238, %239, %cst_76 {dimension_numbers = #tpu.dot_dimension_numbers<[1], [0], [0], [1], [0, 0, 1, 1], [], []>} : vector<8x32xbf16>, vector<32x64xbf16>, vector<8x64xf32> -> vector<8x64xf32>
    %c0_77 = arith.constant 0 : index
    %c0_78 = arith.constant 0 : index
    %241 = vector.load %arg22[%c0_77, %c0_78] : memref<1x64xf32, #tpu.memory_space<vmem>>, vector<1x64xf32>
    %242 = vector.broadcast %241 : vector<1x64xf32> to vector<8x64xf32>
    %243 = arith.addf %240, %242 : vector<8x64xf32>
    %cst_79 = arith.constant 0.000000e+00 : f32
    %244 = vector.broadcast %cst_79 : f32 to vector<8x64xf32>
    %245 = arith.maximumf %243, %244 : vector<8x64xf32>
    %246 = arith.truncf %245 : vector<8x64xf32> to vector<8x64xbf16>
    %c0_80 = arith.constant 0 : index
    %c0_81 = arith.constant 0 : index
    %247 = vector.load %arg23[%c0_80, %c0_81] : memref<64x32xbf16, #tpu.memory_space<vmem>>, vector<64x32xbf16>
    %cst_82 = arith.constant dense<0.000000e+00> : vector<8x32xf32>
    %248 = tpu.matmul %246, %247, %cst_82 {dimension_numbers = #tpu.dot_dimension_numbers<[1], [0], [0], [1], [0, 0, 1, 1], [], []>} : vector<8x64xbf16>, vector<64x32xbf16>, vector<8x32xf32> -> vector<8x32xf32>
    %249 = arith.addf %213, %248 : vector<8x32xf32>
    %c0_83 = arith.constant 0 : index
    %c0_84 = arith.constant 0 : index
    %250 = vector.load %arg24[%c0_83, %c0_84] : memref<1x32xf32, #tpu.memory_space<vmem>>, vector<1x32xf32>
    %251 = vector.broadcast %250 : vector<1x32xf32> to vector<8x32xf32>
    %252 = arith.addf %249, %251 : vector<8x32xf32>
    %253 = arith.truncf %252 : vector<8x32xf32> to vector<8x32xbf16>
    %c0_85 = arith.constant 0 : index
    %c0_86 = arith.constant 0 : index
    %c0_87 = arith.constant 0 : index
    %254 = vector.load %arg25[%c0_85, %c0_86, %c0_87] : memref<1x8x32xbf16, #tpu.memory_space<vmem>>, vector<1x8x32xbf16>
    %255 = vector.shape_cast %254 : vector<1x8x32xbf16> to vector<8x32xbf16>
    %256 = vector.shape_cast %253 : vector<8x32xbf16> to vector<1x8x32xbf16>
    tpu.vector_store %arg25[%c0_85, %c0_86, %c0_87], %256 {strides = array<i32>} : memref<1x8x32xbf16, #tpu.memory_space<vmem>>, vector<1x8x32xbf16>,
    return
  }
  func.func @transform_0(%arg0: i32) -> (i32, i32, i32) {
    %c0_i32 = arith.constant 0 : i32
    %c0_i32_0 = arith.constant 0 : i32
    %c0_i32_1 = arith.constant 0 : i32
    return %arg0, %c0_i32, %c0_i32_0 : i32, i32, i32
  }
  func.func @transform_1(%arg0: i32) -> (i32, i32, i32) {
    %c0_i32 = arith.constant 0 : i32
    %c0_i32_0 = arith.constant 0 : i32
    %c0_i32_1 = arith.constant 0 : i32
    return %arg0, %c0_i32, %c0_i32_0 : i32, i32, i32
  }
  func.func @transform_2(%arg0: i32) -> (i32, i32, i32) {
    %c0_i32 = arith.constant 0 : i32
    %c0_i32_0 = arith.constant 0 : i32
    %c0_i32_1 = arith.constant 0 : i32
    return %arg0, %c0_i32, %c0_i32_0 : i32, i32, i32
  }
  func.func @transform_3(%arg0: i32) -> (i32, i32, i32) {
    %c0_i32 = arith.constant 0 : i32
    %c0_i32_0 = arith.constant 0 : i32
    %c0_i32_1 = arith.constant 0 : i32
    return %arg0, %c0_i32, %c0_i32_0 : i32, i32, i32
  }
  func.func @transform_4(%arg0: i32) -> (i32, i32) {
    %c0_i32 = arith.constant 0 : i32
    %c0_i32_0 = arith.constant 0 : i32
    %c0_i32_1 = arith.constant 0 : i32
    return %c0_i32, %c0_i32_0 : i32, i32
  }
  func.func @transform_5(%arg0: i32) -> (i32, i32) {
    %c0_i32 = arith.constant 0 : i32
    %c0_i32_0 = arith.constant 0 : i32
    %c0_i32_1 = arith.constant 0 : i32
    return %c0_i32, %c0_i32_0 : i32, i32
  }
  func.func @transform_6(%arg0: i32) -> (i32, i32) {
    %c0_i32 = arith.constant 0 : i32
    %c0_i32_0 = arith.constant 0 : i32
    %c0_i32_1 = arith.constant 0 : i32
    return %c0_i32, %c0_i32_0 : i32, i32
  }
  func.func @transform_7(%arg0: i32) -> (i32, i32) {
    %c0_i32 = arith.constant 0 : i32
    %c0_i32_0 = arith.constant 0 : i32
    %c0_i32_1 = arith.constant 0 : i32
    return %c0_i32, %c0_i32_0 : i32, i32
  }
  func.func @transform_8(%arg0: i32) -> (i32, i32) {
    %c0_i32 = arith.constant 0 : i32
    %c0_i32_0 = arith.constant 0 : i32
    %c0_i32_1 = arith.constant 0 : i32
    return %c0_i32, %c0_i32_0 : i32, i32
  }
  func.func @transform_9(%arg0: i32) -> (i32, i32) {
    %c0_i32 = arith.constant 0 : i32
    %c0_i32_0 = arith.constant 0 : i32
    %c0_i32_1 = arith.constant 0 : i32
    return %c0_i32, %c0_i32_0 : i32, i32
  }
  func.func @transform_10(%arg0: i32) -> (i32, i32) {
    %c0_i32 = arith.constant 0 : i32
    %c0_i32_0 = arith.constant 0 : i32
    %c0_i32_1 = arith.constant 0 : i32
    return %c0_i32, %c0_i32_0 : i32, i32
  }
  func.func @transform_11(%arg0: i32) -> (i32, i32) {
    %c0_i32 = arith.constant 0 : i32
    %c0_i32_0 = arith.constant 0 : i32
    %c0_i32_1 = arith.constant 0 : i32
    return %c0_i32, %c0_i32_0 : i32, i32
  }
  func.func @transform_12(%arg0: i32) -> (i32, i32) {
    %c0_i32 = arith.constant 0 : i32
    %c0_i32_0 = arith.constant 0 : i32
    %c0_i32_1 = arith.constant 0 : i32
    return %c0_i32, %c0_i32_0 : i32, i32
  }
  func.func @transform_13(%arg0: i32) -> (i32, i32) {
    %c0_i32 = arith.constant 0 : i32
    %c0_i32_0 = arith.constant 0 : i32
    %c0_i32_1 = arith.constant 0 : i32
    return %c0_i32, %c0_i32_0 : i32, i32
  }
  func.func @transform_14(%arg0: i32) -> (i32, i32) {
    %c0_i32 = arith.constant 0 : i32
    %c0_i32_0 = arith.constant 0 : i32
    %c0_i32_1 = arith.constant 0 : i32
    return %c0_i32, %c0_i32_0 : i32, i32
  }
  func.func @transform_15(%arg0: i32) -> (i32, i32) {
    %c0_i32 = arith.constant 0 : i32
    %c0_i32_0 = arith.constant 0 : i32
    %c0_i32_1 = arith.constant 0 : i32
    return %c0_i32, %c0_i32_0 : i32, i32
  }
  func.func @transform_16(%arg0: i32) -> (i32, i32) {
    %c0_i32 = arith.constant 0 : i32
    %c0_i32_0 = arith.constant 0 : i32
    %c0_i32_1 = arith.constant 0 : i32
    return %c0_i32, %c0_i32_0 : i32, i32
  }
  func.func @transform_17(%arg0: i32) -> (i32, i32) {
    %c0_i32 = arith.constant 0 : i32
    %c0_i32_0 = arith.constant 0 : i32
    %c0_i32_1 = arith.constant 0 : i32
    return %c0_i32, %c0_i32_0 : i32, i32
  }
  func.func @transform_18(%arg0: i32) -> (i32, i32) {
    %c0_i32 = arith.constant 0 : i32
    %c0_i32_0 = arith.constant 0 : i32
    %c0_i32_1 = arith.constant 0 : i32
    return %c0_i32, %c0_i32_0 : i32, i32
  }
  func.func @transform_19(%arg0: i32) -> (i32, i32) {
    %c0_i32 = arith.constant 0 : i32
    %c0_i32_0 = arith.constant 0 : i32
    %c0_i32_1 = arith.constant 0 : i32
    return %c0_i32, %c0_i32_0 : i32, i32
  }
  func.func @transform_20(%arg0: i32) -> (i32, i32) {
    %c0_i32 = arith.constant 0 : i32
    %c0_i32_0 = arith.constant 0 : i32
    %c0_i32_1 = arith.constant 0 : i32
    return %c0_i32, %c0_i32_0 : i32, i32
  }
  func.func @transform_21(%arg0: i32) -> (i32, i32) {
    %c0_i32 = arith.constant 0 : i32
    %c0_i32_0 = arith.constant 0 : i32
    %c0_i32_1 = arith.constant 0 : i32
    return %c0_i32, %c0_i32_0 : i32, i32
  }
  func.func @transform_22(%arg0: i32) -> (i32, i32) {
    %c0_i32 = arith.constant 0 : i32
    %c0_i32_0 = arith.constant 0 : i32
    %c0_i32_1 = arith.constant 0 : i32
    return %c0_i32, %c0_i32_0 : i32, i32
  }
  func.func @transform_23(%arg0: i32) -> (i32, i32) {
    %c0_i32 = arith.constant 0 : i32
    %c0_i32_0 = arith.constant 0 : i32
    %c0_i32_1 = arith.constant 0 : i32
    return %c0_i32, %c0_i32_0 : i32, i32
  }
  func.func @transform_24(%arg0: i32) -> (i32, i32, i32) {
    %c0_i32 = arith.constant 0 : i32
    %c0_i32_0 = arith.constant 0 : i32
    %c0_i32_1 = arith.constant 0 : i32
    return %arg0, %c0_i32, %c0_i32_0 : i32, i32, i32
  }
}

</mosaic_0001>

<bundles_post_ra>
// kernel: decoder_forward.5
= control target key start
LH: loop header
LB: loop body
LE: loop exit
PB: predicated region body
PF: predicated region fallthrough
CT: control target
= control target key end

     0   :  { %9 = vsyncpa [#allocation3], 0  ;;  %s873_s0 = inlined_call_operand.vmem [shape: bf16[2,8,32], index: 0, kind: input, shape index: {}]   ;;  %s874_s1 = inlined_call_operand.hbm [shape: f32[1,32], index: 1, kind: input, shape index: {}]   ;;  %s875_s2 = inlined_call_operand.hbm [shape: f32[1,32], index: 2, kind: input, shape index: {}]   ;;  %s876_s3 = inlined_call_operand.vmem [shape: bf16[32,128], index: 3, kind: input, shape index: {}]   ;;  %s877_s4 = inlined_call_operand.hbm [shape: f32[2,8,128], index: 4, kind: output, shape index: {}]  }
   0x1   :  { %10 = vsyncpa [#allocation6], 0 }
   0x2   :  { %11 = vsyncpa [#allocation4], 0 }
   0x3   :  { %13 = vsyncpa [#allocation4 + $0x1], 0  ;;  %s739_s15 = smov 0   ;;  %s741_s16 = smov 0  }
   0x4   :  { %s743_s17 = smov 0   ;;  %s745_s18 = smov 0  }
   0x5   :  { %s747_s19 = smov 0   ;;  %s749_s20 = smov 0  }
   0x6 LB: > { %s453_s21 = sadd.s32 4294967295, %s709_s20   ;;  %s454_s22 = sadd.s32 4294967294, %s709_s20   ;;  %s709_s20 = sphi %s749_s20, %s19_s20   ;;  %s705_s19 = sphi %s747_s19, %s886_s19   ;;  %s701_s18 = sphi %s745_s18, %s885_s18   ;;  %s697_s17 = sphi %s743_s17, %s884_s17   ;;  %s693_s16 = sphi %s741_s16, %s883_s16   ;;  %s689_s15 = sphi %s739_s15, %s882_s15  }
   0x7   : > { %s31_s23 = sadd.s32 1, %s705_s19  ;;  %s134_s24 = sadd.s32 1, %s697_s17 }
   0x8   : > { %p33_p0 = scmp.ge.s32.totalorder %s31_s23, 2  ;;  %p144_p1 = scmp.ne.s32.totalorder %s697_s17, %s693_s16 }
   0x9   : > { %p145_p2 = scmp.eq.s32.totalorder %s453_s21, 1  ;;  %p150_p3 = scmp.ne.s32.totalorder %s693_s16, %s689_s15 }
   0xa   : > { %s888_s23 = smov (%p33_p0, %s31_s23), 0  ;;  %p151_p5 = scmp.eq.s32.totalorder %s454_s22, 1 }
   0xb   : > { %p779_p4 = por %p145_p2, %p144_p1  ;;  %s129_s26 = ssub.s32 %s705_s19, %s888_s23 }
   0xc   : > { %p455_p6 = scmp.ge.s32.totalorder %s709_s20, 1  ;;  %p132_p7 = scmp.eq.s32.totalorder %s129_s26, 0 }
   0xd   : > { %p786_p8 = por %p151_p5, %p150_p3  ;;  %p158_p9 = scmp.lt.s32.totalorder %s709_s20, 3 }
   0xe   : > { %s792_s28 = scalar_select %p132_p7, %s697_s17, %s134_s24  }
   0xf   : > { %p794_p10 = pnand %p455_p6, %p158_p9  ;;  %p798_p11 = scmp.eq.s32.totalorder %s453_s21, 0 }
  0x10   : > { %s170_s7 = sshll.u32 %s874_s1, 4  ;;  %s711_s8 = smov [#allocation2]   ;;  %s171_s7 = int_to_ptr.hbm [resolvable:$true] %s170_s7 }
  0x11   : > { %p490_p12 = pneg %p794_p10  ;;  %s172_s9 = sshll.u32 %s711_s8, 4  ;;  %s173_s9 = int_to_ptr.vmem [resolvable:$true] %s172_s9 }
  0x12   : > { %s182_s12 = sshll.u32 %s875_s2, 4  ;;  %s712_s13 = smov [#allocation5]   ;;  %s183_s12 = int_to_ptr.hbm [resolvable:$true] %s182_s12 }
  0x13   : > { %p491_p13 = pnand %p798_p11, %p490_p12  ;;  %s184_s14 = sshll.u32 %s712_s13, 4  ;;  %s185_s14 = int_to_ptr.vmem [resolvable:$true] %s184_s14 }
  0x14   : > { %211 = sbr.rel (%p794_p10) target bundleno = 441 (0x1b9), region = 36 }
  0x15   : > { %493 = dma.hbm_to_vmem [thread:$0]  (!%p491_p13), %s171_s7, 16, %s173_s9, [#allocation3]  }
  0x16   : > { %496 = dma.hbm_to_vmem [thread:$0]  (!%p491_p13), %s183_s12, 16, %s185_s14, [#allocation6]  }
  0x19   : > { %676 = dma.done.wait (%p798_p11), [#allocation3], 16  }
  0x1a   : > { %678 = vsyncadd (%p798_p11), [#allocation3], 4294967280 }
  0x1b   : > { %680 = dma.done.wait (%p798_p11), [#allocation6], 16  }
  0x1c   : > { %682 = vsyncadd (%p798_p11), [#allocation6], 4294967280  ;;  %p246_p0 = scmp.lt.s32.totalorder %s701_s18, 1  ;;  %vm259_vm0 = vcmask 261120   ;;  %v713_v3 = vmov 32.0   ;;  %v479_v15 = vld [vmem:[%s876_s3 + $0x8] sm:$0xff] }
  0x1d   : > { %559 = vrcp.f32 %v713_v3  ;;  %323 = vmatpush.bf16.msra.mxu0 %v479_v15  ;;  %v478_v16 = vld [vmem:[%s876_s3] sm:$0xff]  ;;  %s243_s8 = sand.u32 1, %s693_s16   ;;  %s475_s9 = sshll.u32 %s701_s18, 3 }
  0x1e   : > { %s247_s21 = scalar_select %p246_p0, %s701_s18, 1  ;;  %v557_v26 = vld [vmem:[#allocation2] ss:$0 sm:$0xff]  ;;  %v558_v29 = vld [vmem:[#allocation5] ss:$0 sm:$0xff] }
  0x1f   : > { %s463_s10 = sshll.u32 %s243_s8, 3  ;;  %s343_s13 = scalar_lea.hbm %s877_s4, %s475_s9 }
  0x20   : > { %s464_s22 = sshll.u32 %s247_s21, 2  ;;  %s245_s14 = scalar_lea.vmem [#allocation7], %s463_s10 }
  0x21   : > { %s249_s29 = scalar_lea.vmem %s873_s0, %s464_s22  ;;  %324 = vmatpush.bf16.msra.mxu0 %v478_v16  ;;  %s345_s21 = sshll.u32 %s245_s14, 4  ;;  %s346_s21 = int_to_ptr.vmem [resolvable:$true] %s345_s21 }
  0x22   : > { %v255_v0 = vld [vmem:[%s249_s29] sm:$0xf]  ;;  %s347_s22 = sshll.u32 %s343_s13, 4  ;;  %s332_s24 = scalar_lea.sflag [#allocation4], %s243_s8  ;;  %s348_s22 = int_to_ptr.hbm [resolvable:$true] %s347_s22 }
  0x23   : > { %v256_v1 = vunpack.c.l.bf16 %v255_v0  ;;  %v560_v4 = vpop.eup %559  ;;  %s637_s26 = sshra.s32 %s348_s22, 4  ;;  %s643_s5 = scalar_lea.hbm %s877_s4, 16  ;;  %s638_s26 = int_to_ptr.hbm [resolvable:$true] %s637_s26 }
  0x24   : > { %v264_v5 = vmul.f32 32.0, %v560_v4  ;;  %vm268_vm1 = vweird.f32 %v560_v4  ;;  %s639_s29 = scalar_lea.hbm %s638_s26, 8  ;;  %p644_p5 = scmp.lt.s32.totalorder %s638_s26, %s877_s4 }
  0x25   : > { %v260_v2 = vsel %vm259_vm0, %v256_v1, 0.0  ;;  %p640_p1 = scmp.ne.s32.totalorder %s638_s26, %s639_s29  ;;  %p645_p6 = scmp.lt.s32.totalorder %s643_s5, %s639_s29 }
  0x26   : > { %261 = vadd.xlane.f32.xlu0 %v260_v2  ;;  %v265_v6 = vsub.f32 1.0, %v264_v5 }
  0x27   : > { %p641_p2 = pnand %p640_p1, %p779_p4  ;;  %p646_p7 = por %p645_p6, %p644_p5 }
  0x28   : > { %v266_v7 = vmul.f32 %v560_v4, %v265_v6 }
  0x29   : > { %p642_p3 = pneg %p641_p2 }
  0x2a   : > { %v267_v8 = vadd.f32 %v560_v4, %v266_v7 }
  0x2b   : > { %p647_p9 = pnand %p646_p7, %p642_p3 }
  0x2c   : > { %v269_v9 = vsel %vm268_vm1, %v560_v4, %v267_v8 }
  0x99   : > { %v262_v10 = vpop.xlane.xlu0 %261 }
  0x9a   : > { %v270_v11 = vmul.f32 %v269_v9, %v262_v10 }
  0x9c   : > { %v271_v12 = vsub.f32 %v256_v1, %v270_v11 }
  0x9e   : > { %v272_v13 = vmul.f32 %v271_v12, %v271_v12 }
  0xa0   : > { %v273_v14 = vsel %vm259_vm0, %v272_v13, 0.0 }
  0xa1   : > { %274 = vadd.xlane.f32.xlu0 %v273_v14 }
 0x114   : > { %v275_v17 = vpop.xlane.xlu0 %274 }
 0x115   : > { %v276_v18 = vmul.f32 %v275_v17, %v269_v9 }
 0x117   : > { %v277_v19 = vadd.f32 1e-05, %v276_v18 }
 0x119   : > { %561 = vrsqrt.f32 %v277_v19  ;;  %vm284_vm3 = vweird.f32 %v277_v19 }
 0x11f   : > { %v562_v20 = vpop.eup %561 }
 0x120   : > { %v279_v21 = vmul.f32 %v562_v20, %v277_v19  ;;  %vm285_vm2 = vweird.f32 %v562_v20 }
 0x121   : > { %vm286_vm4 = vmor %vm284_vm3, %vm285_vm2 }
 0x122   : > { %v280_v22 = vmul.f32 %v562_v20, %v279_v21 }
 0x124   : > { %v281_v23 = vmul.f32 0.5, %v280_v22 }
 0x126   : > { %v282_v24 = vsub.f32 1.5, %v281_v23 }
 0x128   : > { %v283_v25 = vmul.f32 %v562_v20, %v282_v24 }
 0x12a   : > { %v287_v27 = vsel %vm286_vm4, %v562_v20, %v283_v25 }
 0x12b   : > { %v288_v28 = vmul.f32 %v287_v27, %v271_v12 }
 0x12d   : > { %v292_v30 = vmul.f32 %v557_v26, %v288_v28 }
 0x12f   : > { %v296_v31 = vadd.f32 %v558_v29, %v292_v30 }
 0x131   : > { %v297_v32 = vpack.c.bf16 %v296_v31, %v296_v31 }
 0x133   : > { %473 = vmatmul.msk.bf16.vlgmr.msra.gmra.mxu0 %vm259_vm0, %v297_v32 }
 0x1b0   : > { %v326_v33 = vpop.f32.mrf.mxu0 }
 0x1b1   : > { %330 = vst [vmem:[%s245_s14] sm:$0xff] %v326_v33 }
 0x1b2   : > { %650 = shalt.err (!%p647_p9)
}
 0x1b3   : > { %488 = dma.vmem_to_hbm [thread:$0]  (%p779_p4), %s346_s21, 128, %s348_s22, %s332_s24  }
 0x1b8   : > { %v328_v34 = vpop.f32.mrf.mxu0 }
 0x1b9 PF: > { %p505_p10 = scmp.ge.s32.totalorder %s709_s20, 2  ;;  %s359_s8 = sand.u32 1, %s689_s15  }
 0x1ba   : > { %s360_s9 = scalar_lea.sflag [#allocation4], %s359_s8 }
 0x1bb   : > { %p498_p11 = pnand %p505_p10, %p786_p8 }
 0x1bd   : > { %p499_p12 = pneg %p498_p11 }
 0x1bf   : > { %684 = dma.done.wait (%p499_p12), %s360_s9, 128  }
 0x1c0   : > { %686 = vsyncadd (%p499_p12), %s360_s9, 4294967168  ;;  %s19_s20 = sadd.s32 1, %s709_s20   ;;  %s882_s15 = smov %s693_s16 }
 0x1c1   : > { %p16_p13 = scmp.ge.s32.totalorder %s19_s20, 4   ;;  %s883_s16 = smov %s697_s17 }
 0x1c2   : > { %s884_s17 = smov %s792_s28  ;;  %s885_s18 = smov %s705_s19 }
 0x1c3   : > { %s886_s19 = smov %s888_s23  ;;  %18 = sbr.rel (!%p16_p13) target bundleno = 6 (0x6), region = 83 }
 0x1c8   :  { %366 = vsyncpa [#allocation3], 1 }
 0x1c9   :  { %368 = vsyncpa [#allocation3 + $0x1], 1 }
 0x1ca   :  { %369 = vsyncpa [#allocation6], 1 }
 0x1cb   :  { %370 = vsyncpa [#allocation4], 1 }
 0x1cc   :  { %372 = vsyncpa [#allocation4 + $0x1], 1 }

// kernel: decoder_forward.4
= control target key start
LH: loop header
LB: loop body
LE: loop exit
PB: predicated region body
PF: predicated region fallthrough
CT: control target
= control target key end

     0   :  { %s2715_s0 = inlined_call_operand.vmem [shape: bf16[2,8,32], index: 0, kind: input, shape index: {}]   ;;  %s2716_s1 = inlined_call_operand.vmem [shape: bf16[2,16,32], index: 1, kind: input, shape index: {}]   ;;  %s2717_s2 = inlined_call_operand.vmem [shape: f32[2,1,8], index: 2, kind: input, shape index: {}]   ;;  %s2718_s3 = inlined_call_operand.vmem [shape: f32[2,8,1], index: 3, kind: input, shape index: {}]   ;;  %s2719_s4 = inlined_call_operand.vmem [shape: f32[1,32], index: 4, kind: input, shape index: {}]   ;;  %s2720_s5 = inlined_call_operand.vmem [shape: f32[1,32], index: 5, kind: input, shape index: {}]   ;;  %s2721_s6 = inlined_call_operand.vmem [shape: bf16[32,96], index: 6, kind: input, shape index: {}]   ;;  %s2722_s7 = inlined_call_operand.vmem [shape: f32[1,96], index: 7, kind: input, shape index: {}]   ;;  %s2723_s8 = inlined_call_operand.vmem [shape: bf16[32,32], index: 8, kind: input, shape index: {}]   ;;  %s2724_s9 = inlined_call_operand.vmem [shape: f32[1,32], index: 9, kind: input, shape index: {}]   ;;  %s2725_s10 = inlined_call_operand.vmem [shape: f32[1,32], index: 10, kind: input, shape index: {}]   ;;  %s2726_s11 = inlined_call_operand.vmem [shape: f32[1,32], index: 11, kind: input, shape index: {}]   ;;  %s2727_s12 = inlined_call_operand.vmem [shape: bf16[32,32], index: 12, kind: input, shape index: {}]   ;;  %s2728_s13 = inlined_call_operand.vmem [shape: f32[1,32], index: 13, kind: input, shape index: {}]   ;;  %s2729_s14 = inlined_call_operand.vmem [shape: bf16[32,64], index: 14, kind: input, shape index: {}]   ;;  %s2730_s15 = inlined_call_operand.vmem [shape: f32[1,64], index: 15, kind: input, shape index: {}]   ;;  %s2731_s16 = inlined_call_operand.vmem [shape: bf16[32,32], index: 16, kind: input, shape index: {}]   ;;  %s2732_s17 = inlined_call_operand.vmem [shape: f32[1,32], index: 17, kind: input, shape index: {}]   ;;  %s2733_s18 = inlined_call_operand.hbm [shape: f32[1,32], index: 18, kind: input, shape index: {}]   ;;  %s2734_s19 = inlined_call_operand.hbm [shape: f32[1,32], index: 19, kind: input, shape index: {}]   ;;  %s2735_s20 = inlined_call_operand.vmem [shape: bf16[32,64], index: 20, kind: input, shape index: {}]   ;;  %s2736_s21 = inlined_call_operand.hbm [shape: f32[1,64], index: 21, kind: input, shape index: {}]   ;;  %s2737_s22 = inlined_call_operand.vmem [shape: bf16[64,32], index: 22, kind: input, shape index: {}]   ;;  %s2738_s23 = inlined_call_operand.hbm [shape: f32[1,32], index: 23, kind: input, shape index: {}]   ;;  %s2739_s24 = inlined_call_operand.vmem [shape: bf16[2,8,32], index: 24, kind: output, shape index: {}]  }
   0x1   :  { %2746 = sst [smem:[#allocation12_spill]] %s2715_s0 }
   0x2   :  { %2747 = sst [smem:[#allocation13_spill]] %s2716_s1 }
   0x3   :  { %2748 = sst [smem:[#allocation14_spill]] %s2717_s2 }
   0x4   :  { %2749 = sst [smem:[#allocation15_spill]] %s2718_s3 }
   0x5   :  { %2750 = sst [smem:[#allocation16_spill]] %s2719_s4 }
   0x6   :  { %2751 = sst [smem:[#allocation17_spill]] %s2720_s5 }
   0x7   :  { %2752 = sst [smem:[#allocation18_spill]] %s2721_s6 }
   0x8   :  { %2753 = sst [smem:[#allocation19_spill]] %s2722_s7 }
   0x9   :  { %2754 = sst [smem:[#allocation20_spill]] %s2723_s8 }
   0xa   :  { %2755 = sst [smem:[#allocation21_spill]] %s2733_s18 }
   0xb   :  { %2756 = sst [smem:[#allocation22_spill]] %s2734_s19 }
   0xc   :  { %29 = vsyncpa [#allocation3], 0 }
   0xd   :  { %30 = vsyncpa [#allocation5], 0 }
   0xe   :  { %31 = vsyncpa [#allocation8], 0  ;;  %s2416_s5 = smov 0  }
   0xf LB: > { %s2757_s19 = sld [smem:[#allocation22_spill]]  ;;  %s2425_s6 = sadd.s32 4294967295, %s2274_s5   ;;  %s2274_s5 = sphi %s2416_s5, %s37_s5  }
  0x10   : > { %p1894_p0 = scmp.ge.s32.totalorder %s2274_s5, 1  ;;  %p592_p1 = scmp.lt.s32.totalorder %s2274_s5, 3 }
  0x11   : > { %p2050_p2 = scmp.eq.s32.totalorder %s2425_s6, 0  ;;  %s2276_s29 = smov [#allocation4]  }
  0x12   : > { %p2430_p3 = pnand %p1894_p0, %p592_p1  ;;  %s660_s0 = sshll.u32 %s2276_s29, 4  ;;  %s661_s0 = int_to_ptr.vmem [resolvable:$true] %s660_s0 }
  0x13   : > { %s2759_s18 = sld [smem:[#allocation21_spill]]  ;;  %s673_s4 = sshll.u32 %s2736_s21, 4  ;;  %s674_s4 = int_to_ptr.hbm [resolvable:$true] %s673_s4 }
  0x14   : > { %p2037_p4 = pneg %p2430_p3  ;;  %s2277_s26 = smov [#allocation2]  }
  0x15   : > { %s658_s28 = sshll.u32 %s2757_s19, 4  ;;  %s648_s27 = sshll.u32 %s2277_s26, 4  ;;  %s659_s28 = int_to_ptr.hbm [resolvable:$true] %s658_s28  ;;  %s649_s27 = int_to_ptr.vmem [resolvable:$true] %s648_s27 }
  0x16   : > { %p2444_p5 = pnand %p2050_p2, %p2037_p4  ;;  %s2278_s29 = smov [#allocation6]  }
  0x17   : > { %s675_s7 = sshll.u32 %s2278_s29, 4  ;;  %s688_s8 = sshll.u32 %s2738_s23, 4  ;;  %s676_s7 = int_to_ptr.vmem [resolvable:$true] %s675_s7  ;;  %s689_s8 = int_to_ptr.hbm [resolvable:$true] %s688_s8 }
  0x18   : > { %2043 = dma.hbm_to_vmem [thread:$0]  (!%p2444_p5), %s659_s28, 16, %s661_s0, [#allocation5]  }
  0x19   : > { %s646_s3 = sshll.u32 %s2759_s18, 4  ;;  %s2279_s18 = smov [#allocation7]   ;;  %s647_s3 = int_to_ptr.hbm [resolvable:$true] %s646_s3 }
  0x1a   : > { %2040 = dma.hbm_to_vmem [thread:$0]  (!%p2444_p5), %s647_s3, 16, %s649_s27, [#allocation3]  }
  0x1b   : > { %2046 = dma.hbm_to_vmem [thread:$0]  (!%p2444_p5), %s674_s4, 16, %s676_s7, [#allocation5]  }
  0x1c   : > { %s690_s19 = sshll.u32 %s2279_s18, 4  ;;  %731 = sbr.rel (%p2430_p3) target bundleno = 3311 (0xcef), region = 116  ;;  %s691_s19 = int_to_ptr.vmem [resolvable:$true] %s690_s19 }
  0x1d   : > { %2049 = dma.hbm_to_vmem [thread:$0]  (!%p2444_p5), %s689_s8, 16, %s691_s19, [#allocation8]  }
  0x21   : > { %2261 = dma.done.wait (%p2050_p2), [#allocation3], 16  }
  0x22   : > { %2263 = vsyncadd (%p2050_p2), [#allocation3], 4294967280 }
  0x23   : > { %2265 = dma.done.wait (%p2050_p2), [#allocation5], 32  }
  0x24   : > { %2267 = vsyncadd (%p2050_p2), [#allocation5], 4294967264 }
  0x25   : > { %2269 = dma.done.wait (%p2050_p2), [#allocation8], 16  }
  0x26   : > { %2271 = vsyncadd (%p2050_p2), [#allocation8], 4294967280  ;;  %p823_p6 = scmp.lt.s32.totalorder %s2425_s6, 1  ;;  %s2761_s2 = sld [smem:[#allocation12_spill]]  ;;  %vm870_vm0 = vcmask 261120   ;;  %v2280_v3 = vmov 32.0   ;;  %v852_v62 = vlaneseq }
  0x27   : > { %2096 = vrcp.f32 %v2280_v3  ;;  %s2762_s1 = sld [smem:[#allocation18_spill]]  ;;  %s2281_s3 = smov 104   ;;  %v2285_v50 = vmov 0   ;;  %vm957_vm6 = vcmask 64512   ;;  %vm1099_vm13 = vcmask 1043456  }
  0x28   : > { %s2775_s6 = smov (!%p823_p6, %s2425_s6), 1  ;;  %s2763_s30 = sld [smem:[#allocation16_spill]]  ;;  %2081 = vset.pattern.permute.xlu1 %v2285_v50  ;;  %2082 = vset.pattern.permute.xlu0 %v2285_v50  ;;  %v855_v3 = vand.u32 127, %v852_v62  ;;  %vm1192_vm14 = vcmask 130048   ;;  %vm1194_vm15 = vcmask 195584  }
  0x29   : > { %s2742_s18 = sshll.u32 %s2775_s6, 2  ;;  %s2764_s19 = sld [smem:[#allocation17_spill]] }
  0x2a   : > { %s2282_s4 = smov 120   ;;  %s2283_s26 = smov 112  }
  0x2b   : > { %s2284_s27 = smov 96   ;;  %s2003_s29 = sshll.u32 %s2775_s6, 3 }
  0x2c   : > { %s826_s0 = scalar_lea.vmem %s2761_s2, %s2742_s18  ;;  %s2766_s25 = sld [smem:[#allocation15_spill]] }
  0x2d   : > { %v844_v0 = vld [vmem:[%s826_s0] sm:$0xf]  ;;  %v2097_v4 = vpop.eup %2096  ;;  %v2006_v15 = vld [vmem:[%s2762_s1 + $0x8] sm:$0xff]  ;;  %s2765_s0 = sld [smem:[#allocation19_spill]]  ;;  %s2287_s7 = smov 64  }
  0x2e   : > { %v2483_v1 = vunpack.c.l.bf16 %v844_v0  ;;  %v875_v5 = vmul.f32 32.0, %v2097_v4  ;;  %vm879_vm1 = vweird.f32 %v2097_v4  ;;  %938 = vmatpush.bf16.msra.mxu0 %v2006_v15  ;;  %v2005_v16 = vld [vmem:[%s2762_s1] sm:$0xff]  ;;  %s2767_s2 = sld [smem:[#allocation14_spill]] }
  0x2f   : > { %v2083_v26 = vld [vmem:[%s2763_s30] ss:$0 sm:$0xff]  ;;  %s2745_s30 = smov 8  }
  0x30   : > { %v871_v2 = vsel %vm870_vm0, %v2483_v1, 0.0  ;;  %v876_v6 = vsub.f32 1.0, %v875_v5  ;;  %v2084_v29 = vld [vmem:[%s2764_s19] ss:$0 sm:$0xff] }
  0x31   : > { %872 = vadd.xlane.f32.xlu0 %v871_v2  ;;  %v853_v2 = vshrl.u32 %v852_v62, 7 }
  0x32   : > { %v877_v7 = vmul.f32 %v2097_v4, %v876_v6  ;;  %939 = vmatpush.bf16.msra.mxu0 %v2005_v16  ;;  %s838_s8 = scalar_lea.vmem %s2766_s25, %s2003_s29  ;;  %s2743_s25 = smov 24  }
  0x33   : > { %v2085_v33 = vld [vmem:[%s2765_s0] ss:$0 sm:$0xff]  ;;  %vm865_vm10 = vcmp.gt.s32.totalorder %v855_v3, %v853_v2 }
  0x34   : > { %v878_v8 = vadd.f32 %v2097_v4, %v877_v7  ;;  %v850_v49 = vld [vmem:[%s838_s8] sm:$0xff]  ;;  %s834_s0 = scalar_lea.vmem %s2767_s2, %s2775_s6  ;;  %s2744_s8 = smov 16  }
  0x35   : > { %vm851_vm5 = vcmp.gt.f32.partialorder %v850_v49, 0.5  ;;  %v848_v60 = vld [vmem:[%s834_s0] sm:$0x1]  ;;  %s2768_s2 = sld [smem:[#allocation20_spill]] }
  0x36   : > { %v2487_v9 = vsel %vm879_vm1, %v2097_v4, %v878_v8  ;;  %v859_v51 = vsel %vm851_vm5, 1, %v2285_v50  ;;  %vm849_vm7 = vcmp.gt.f32.partialorder %v848_v60, 0.5  ;;  %v2286_v4 = vmov 0.0  }
  0x37   : > { %v856_v61 = vsel %vm849_vm7, 1, %v2285_v50  ;;  %vm1739_vm7 = vcmask 523264  }
  0x38   : > { %v857_v63 = vperm.slane %v856_v61, 0 }
  0x3a   : > { %vm858_vm8 = vcmp.eq.s32.totalorder %v857_v63, 1 }
  0xa4   : > { %v873_v10 = vpop.xlane.xlu0 %872 }
  0xa5   : > { %v881_v11 = vmul.f32 %v2487_v9, %v873_v10 }
  0xa7   : > { %v882_v12 = vsub.f32 %v2483_v1, %v881_v11 }
  0xa9   : > { %v883_v13 = vmul.f32 %v882_v12, %v882_v12 }
  0xab   : > { %v884_v14 = vsel %vm870_vm0, %v883_v13, 0.0 }
  0xac   : > { %885 = vadd.xlane.f32.xlu0 %v884_v14 }
 0x11f   : > { %v886_v17 = vpop.xlane.xlu0 %885 }
 0x120   : > { %v887_v18 = vmul.f32 %v886_v17, %v2487_v9 }
 0x122   : > { %v888_v19 = vadd.f32 1e-05, %v887_v18 }
 0x124   : > { %2098 = vrsqrt.f32 %v888_v19  ;;  %vm895_vm3 = vweird.f32 %v888_v19 }
 0x12a   : > { %v2099_v20 = vpop.eup %2098 }
 0x12b   : > { %v890_v21 = vmul.f32 %v2099_v20, %v888_v19  ;;  %vm896_vm2 = vweird.f32 %v2099_v20 }
 0x12c   : > { %vm897_vm4 = vmor %vm895_vm3, %vm896_vm2 }
 0x12d   : > { %v891_v22 = vmul.f32 %v2099_v20, %v890_v21 }
 0x12f   : > { %v892_v23 = vmul.f32 0.5, %v891_v22 }
 0x131   : > { %v893_v24 = vsub.f32 1.5, %v892_v23 }
 0x133   : > { %v894_v25 = vmul.f32 %v2099_v20, %v893_v24 }
 0x135   : > { %v898_v27 = vsel %vm897_vm4, %v2099_v20, %v894_v25 }
 0x136   : > { %v899_v28 = vmul.f32 %v898_v27, %v882_v12 }
 0x138   : > { %v903_v30 = vmul.f32 %v2083_v26, %v899_v28 }
 0x13a   : > { %v907_v31 = vadd.f32 %v2084_v29, %v903_v30 }
 0x13c   : > { %v908_v32 = vpack.c.bf16 %v907_v31, %v907_v31 }
 0x13e   : > { %1918 = vmatmul.msk.bf16.vlgmr.msra.gmra.mxu0 %vm870_vm0, %v908_v32 }
 0x1bb   : > { %v941_v34 = vpop.f32.mrf.mxu0 }
 0x1bc   : > { %v942_v35 = vadd.f32 %v2085_v33, %v941_v34 }
 0x1be   : > { %v945_v36 = vpack.c.bf16 %v942_v35, %v942_v35 }
 0x1c0   : > { %951 = vrot.lane.b32.xlu2 %v945_v36, %s2281_s3  ;;  %947 = vrot.lane.b32.xlu1 %v945_v36, %s2282_s4  ;;  %v953_v44 = vunpack.c.l.b16 %v945_v36 }
 0x1c2   : > { %v2522_v48 = vpack.c.b16 %v953_v44, %v953_v44 }
 0x1c3   : > { %v943_v37 = vpop.f32.mrf.mxu0 }
 0x1c8   : > { %949 = vrot.lane.b32.xlu1 %v945_v36, %s2283_s26 }
 0x21a   : > { %v952_v38 = vpop.permute.xlu2 %951 }
 0x21b   : > { %v1023_v39 = vunpack.c.l.b16 %v952_v38 }
 0x21d   : > { %v2512_v40 = vpack.c.b16 %v1023_v39, %v1023_v39 }
 0x21f   : > { %1025 = vrot.lane.b32.xlu1 %v2512_v40, %s2284_s27 }
 0x227   : > { %861 = vperm.xlu1 %2081, %v859_v51  }
 0x232   : > { %v948_v41 = vpop.permute.xlu1 %947 }
 0x233   : > { %v977_v42 = vunpack.c.l.b16 %v948_v41 }
 0x235   : > { %v2516_v43 = vpack.c.b16 %v977_v42, %v977_v42 }
 0x237   : > { %979 = vrot.lane.b32.xlu2 %v2516_v43, %s2284_s27 }
 0x23a   : > { %v950_v45 = vpop.permute.xlu1 %949 }
 0x23b   : > { %v1000_v46 = vunpack.c.l.b16 %v950_v45 }
 0x23d   : > { %v2520_v47 = vpack.c.b16 %v1000_v46, %v1000_v46 }
 0x23f   : > { %1002 = vrot.lane.b32.xlu0 %v2520_v47, %s2284_s27  ;;  %955 = vrot.lane.b32.xlu2 %v2522_v48, %s2284_s27 }
 0x291   : > { %v980_v52 = vpop.permute.xlu2 %979  ;;  %v1026_v53 = vpop.permute.xlu1 %1025 }
 0x292   : > { %v985_v54 = vsel %vm957_vm6, %v980_v52, 0  ;;  %v1031_v55 = vsel %vm957_vm6, %v1026_v53, 0 }
 0x293   : > { %994 = vmatpush.bf16.xpose.msra.mxu2 %v985_v54  ;;  %1040 = vmatpush.bf16.xpose.msrb.mxu0 %v1031_v55 }
 0x299   : > { %v956_v56 = vpop.permute.xlu2 %955  ;;  %v862_v0 = vpop.permute.xlu1 %861 }
 0x29a   : > { %1920 = vmatmul.msk.bf16.vlgmr.msra.gmra.mxu2 %vm957_vm6, %v948_v41  ;;  %1922 = vmatmul.msk.bf16.vlgmr.msrb.gmra.mxu0 %vm957_vm6, %v952_v38  ;;  %v962_v57 = vsel %vm957_vm6, %v956_v56, 0  ;;  %vm863_vm9 = vcmp.eq.s32.totalorder %v862_v0, 1 }
 0x29b   : > { %971 = vmatpush.bf16.xpose.msra.mxu1 %v962_v57  ;;  %vm864_vm11 = vmor %vm858_vm8, %vm863_vm9 }
 0x29c   : > { %vm866_vm12 = vmor %vm864_vm11, %vm865_vm10 }
 0x29d   : > { %v867_v5 = vsel %vm866_vm12, -1e+09, %v2286_v4 }
 0x2a2   : > { %1919 = vmatmul.msk.bf16.vlgmr.msra.gmra.mxu1 %vm957_vm6, %v945_v36 }
 0x2b1   : > { %v1003_v58 = vpop.permute.xlu0 %1002 }
 0x2b2   : > { %v1008_v59 = vsel %vm957_vm6, %v1003_v58, 0 }
 0x2b3   : > { %1017 = vmatpush.bf16.xpose.msra.mxu3 %v1008_v59 }
 0x2ba   : > { %1921 = vmatmul.msk.bf16.vlgmr.msra.gmra.mxu3 %vm957_vm6, %v950_v45 }
 0x317   : > { %v1042_v6 = vpop.f32.mrf.mxu0 }
 0x318   : > { %v1043_v7 = vadd.f32 %v1042_v6, %v867_v5 }
 0x31a   : > { %v1055_v8 = vsel %vm957_vm6, %v1043_v7, -inf }
 0x31b   : > { %1056 = vmax.xlane.f32.xlu0 %v1055_v8 }
 0x31d   : > { %v996_v10 = vpop.f32.mrf.mxu2 }
 0x31e   : > { %v997_v11 = vadd.f32 %v996_v10, %v867_v5 }
 0x31f   : > { %v973_v12 = vpop.f32.mrf.mxu1  ;;  %v1044_v13 = vpop.f32.mrf.mxu0 }
 0x320   : > { %v1049_v14 = vsel %vm957_vm6, %v997_v11, -inf  ;;  %v974_v15 = vadd.f32 %v973_v12, %v867_v5  ;;  %v2008_v13 = vld [vmem:[%s2768_s2 + $0x8] sm:$0xff] }
 0x321   : > { %1050 = vmax.xlane.f32.xlu2 %v1049_v14  ;;  %v2007_v14 = vld [vmem:[%s2768_s2] sm:$0xff] }
 0x322   : > { %v1046_v18 = vsel %vm957_vm6, %v974_v15, -inf }
 0x325   : > { %v998_v16 = vpop.f32.mrf.mxu2 }
 0x327   : > { %v975_v17 = vpop.f32.mrf.mxu1 }
 0x329   : > { %1047 = vmax.xlane.f32.xlu2 %v1046_v18 }
 0x33d   : > { %v1019_v19 = vpop.f32.mrf.mxu3 }
 0x33e   : > { %v1020_v20 = vadd.f32 %v1019_v19, %v867_v5 }
 0x340   : > { %v1052_v21 = vsel %vm957_vm6, %v1020_v20, -inf }
 0x341   : > { %1053 = vmax.xlane.f32.xlu1 %v1052_v21 }
 0x345   : > { %v1021_v22 = vpop.f32.mrf.mxu3 }
 0x346   : > { %v2086_v22 = vld [vmem:[%s2724_s9] ss:$0 sm:$0xff] }
 0x38e   : > { %v1057_v23 = vpop.xlane.xlu0 %1056 }
 0x38f   : > { %v1061_v24 = vsub.f32 %v1043_v7, %v1057_v23 }
 0x391   : > { %v1068_v25 = vmul.f32 1.442695, %v1061_v24 }
 0x393   : > { %2100 = vpow2.f32 %v1068_v25 }
 0x394   : > { %v1051_v26 = vpop.xlane.xlu2 %1050 }
 0x395   : > { %v1059_v27 = vsub.f32 %v997_v11, %v1051_v26 }
 0x397   : > { %v1064_v28 = vmul.f32 1.442695, %v1059_v27 }
 0x399   : > { %v2101_v29 = vpop.eup %2100  ;;  %2102 = vpow2.f32 %v1064_v28  ;;  %v2012_v28 = vld [vmem:[%s2729_s14 + $0x8] sm:$0xff] }
 0x39a   : > { %v1079_v30 = vsel %vm957_vm6, %v2101_v29, 0.0 }
 0x39b   : > { %1080 = vadd.xlane.f32.xlu0 %v1079_v30 }
 0x39c   : > { %v1048_v38 = vpop.xlane.xlu2 %1047 }
 0x39d   : > { %v1058_v39 = vsub.f32 %v974_v15, %v1048_v38 }
 0x39f   : > { %v2103_v31 = vpop.eup %2102  ;;  %v1062_v41 = vmul.f32 1.442695, %v1058_v39 }
 0x3a0   : > { %v1073_v32 = vsel %vm957_vm6, %v2103_v31, 0.0 }
 0x3a1   : > { %1074 = vadd.xlane.f32.xlu2 %v1073_v32 }
 0x3af   : > { %1158 = vrot.lane.b32.xlu0 %v2512_v40, %s2287_s7 }
 0x3b4   : > { %v1054_v33 = vpop.xlane.xlu1 %1053 }
 0x3b5   : > { %v1060_v34 = vsub.f32 %v1020_v20, %v1054_v33 }
 0x3b7   : > { %v1066_v35 = vmul.f32 1.442695, %v1060_v34  ;;  %1094 = vrot.lane.b32.xlu0 %v2522_v48, %s2287_s7 }
 0x3b9   : > { %2104 = vpow2.f32 %v1066_v35  ;;  %1116 = vrot.lane.b32.xlu2 %v2516_v43, %s2287_s7  ;;  %v2010_v35 = vld [vmem:[%s2727_s12 + $0x8] sm:$0xff] }
 0x3ba   : > { %2106 = vpow2.f32 %v1062_v41 }
 0x3bf   : > { %v2105_v36 = vpop.eup %2104 }
 0x3c0   : > { %v1076_v37 = vsel %vm957_vm6, %v2105_v36, 0.0  ;;  %v2107_v42 = vpop.eup %2106 }
 0x3c1   : > { %1077 = vadd.xlane.f32.xlu1 %v1076_v37  ;;  %v1070_v40 = vsel %vm957_vm6, %v2107_v42, 0.0  ;;  %v2089_v37 = vld [vmem:[%s2730_s15] ss:$0 sm:$0xff] }
 0x3da   : > { %1137 = vrot.lane.b32.xlu1 %v2520_v47, %s2287_s7 }
 0x3e2   : > { %1071 = vadd.xlane.f32.xlu2 %v1070_v40 }
 0x40e   : > { %v1081_v44 = vpop.xlane.xlu0 %1080 }
 0x414   : > { %v1075_v45 = vpop.xlane.xlu2 %1074 }
 0x415   : > { %2108 = vrcp.f32 %v1075_v45 }
 0x416   : > { %2110 = vrcp.f32 %v1081_v44 }
 0x41b   : > { %v2109_v43 = vpop.eup %2108 }
 0x41c   : > { %v1087_v46 = vmul.f32 %v2109_v43, %v2103_v31  ;;  %v1117_v48 = vpop.permute.xlu2 %1116  ;;  %v2111_v49 = vpop.eup %2110 }
 0x41d   : > { %v1122_v50 = vsel %vm1099_vm13, %v1117_v48, 0  ;;  %v1089_v52 = vmul.f32 %v2111_v49, %v2101_v29 }
 0x41e   : > { %1131 = vmatpush.bf16.msrb.mxu2 %v1122_v50  ;;  %v1091_v51 = vpack.c.bf16 %v1087_v46, %v1087_v46 }
 0x41f   : > { %v1093_v54 = vpack.c.bf16 %v1089_v52, %v1089_v52 }
 0x421   : > { %v1159_v53 = vpop.permute.xlu0 %1158  ;;  %1924 = vmatmul.msk.bf16.vlgmr.msrb.gmra.mxu2 %vm957_vm6, %v1091_v51 }
 0x422   : > { %v1164_v47 = vsel %vm1099_vm13, %v1159_v53, 0  ;;  %1297 = vmatpush.bf16.msra.mxu2 %v2010_v35 }
 0x423   : > { %1173 = vmatpush.bf16.msra.mxu0 %v1164_v47 }
 0x426   : > { %1926 = vmatmul.msk.bf16.vlgmr.msra.gmra.mxu0 %vm957_vm6, %v1093_v54 }
 0x429   : > { %v1095_v55 = vpop.permute.xlu0 %1094 }
 0x42a   : > { %v1101_v56 = vsel %vm1099_vm13, %v1095_v55, 0 }
 0x42b   : > { %1110 = vmatpush.bf16.msrb.mxu1 %v1101_v56 }
 0x42f   : > { %1222 = vmatpush.bf16.msra.mxu1 %v2008_v13 }
 0x433   : > { %1223 = vmatpush.bf16.msra.mxu1 %v2007_v14 }
 0x434   : > { %v1078_v57 = vpop.xlane.xlu1 %1077 }
 0x435   : > { %2112 = vrcp.f32 %v1078_v57  ;;  %v2087_v57 = vld [vmem:[%s2725_s10] ss:$0 sm:$0xff] }
 0x43b   : > { %v2113_v58 = vpop.eup %2112 }
 0x43c   : > { %v1088_v59 = vmul.f32 %v2113_v58, %v2105_v36  ;;  %v2009_v36 = vld [vmem:[%s2727_s12] sm:$0xff] }
 0x43d   : > { %1298 = vmatpush.bf16.msra.mxu2 %v2009_v36 }
 0x43e   : > { %v1092_v62 = vpack.c.bf16 %v1088_v59, %v1088_v59 }
 0x44c   : > { %v1138_v60 = vpop.permute.xlu1 %1137 }
 0x44d   : > { %v1143_v61 = vsel %vm1099_vm13, %v1138_v60, 0  ;;  %v2088_v60 = vld [vmem:[%s2726_s11] ss:$0 sm:$0xff] }
 0x44e   : > { %1152 = vmatpush.bf16.msrb.mxu3 %v1143_v61 }
 0x451   : > { %1925 = vmatmul.msk.bf16.vlgmr.msrb.gmra.mxu3 %vm957_vm6, %v1092_v62 }
 0x452   : > { %1338 = vmatpush.bf16.msra.mxu3 %v2012_v28 }
 0x455   : > { %v1072_v63 = vpop.xlane.xlu2 %1071 }
 0x456   : > { %2114 = vrcp.f32 %v1072_v63 }
 0x45c   : > { %v2115_v0 = vpop.eup %2114 }
 0x45d   : > { %v1086_v2 = vmul.f32 %v2115_v0, %v2107_v42 }
 0x45f   : > { %v1090_v3 = vpack.c.bf16 %v1086_v2, %v1086_v2 }
 0x461   : > { %1923 = vmatmul.msk.bf16.vlgmr.msrb.gmra.mxu1 %vm957_vm6, %v1090_v3 }
 0x4a3   : > { %v1175_v4 = vpop.f32.mrf.mxu0 }
 0x4a4   : > { %v1133_v5 = vpop.f32.mrf.mxu2 }
 0x4a5   : > { %1180 = vrot.lane.b32.xlu1 %v1133_v5, %s2745_s30 }
 0x4ab   : > { %v1177_v6 = vpop.f32.mrf.mxu0 }
 0x4ac   : > { %v1135_v7 = vpop.f32.mrf.mxu2 }
 0x4ad   : > { %1188 = vrot.lane.b32.xlu1 %v1175_v4, %s2743_s25 }
 0x4d4   : > { %v1154_v8 = vpop.f32.mrf.mxu3 }
 0x4d5   : > { %1184 = vrot.lane.b32.xlu0 %v1154_v8, %s2744_s8  ;;  %s2769_s8 = sld [smem:[#allocation13_spill]] }
 0x4db   : > { %s831_s19 = scalar_lea.vmem %s2769_s8, %s2003_s29 }
 0x4dc   : > { %v1156_v10 = vpop.f32.mrf.mxu3  ;;  %v2004_v29 = vld [vmem:[%s831_s19] sm:$0xff]  ;;  %s2773_s19 = sshll.u32 %s2775_s6, 2 }
 0x4dd   : > { %s842_s29 = scalar_lea.vmem %s2739_s24, %s2773_s19 }
 0x4de   : > { %v1112_v11 = vpop.f32.mrf.mxu1 }
 0x4e6   : > { %v1114_v12 = vpop.f32.mrf.mxu1 }
 0x517   : > { %v1181_v15 = vpop.permute.xlu1 %1180 }
 0x518   : > { %v1191_v16 = vsel %vm957_vm6, %v1112_v11, %v1181_v15 }
 0x51f   : > { %v1189_v18 = vpop.permute.xlu1 %1188 }
 0x547   : > { %v1185_v17 = vpop.permute.xlu0 %1184 }
 0x548   : > { %v1193_v19 = vsel %vm1192_vm14, %v1191_v16, %v1185_v17 }
 0x549   : > { %v1195_v20 = vsel %vm1194_vm15, %v1193_v19, %v1189_v18  ;;  %v2090_v19 = vld [vmem:[%s2728_s13] ss:$0 sm:$0xff] }
 0x54a   : > { %v1196_v21 = vpack.c.bf16 %v1195_v20, %v1195_v20 }
 0x54c   : > { %1935 = vmatmul.msk.bf16.vlgmr.msra.gmra.mxu1 %vm870_vm0, %v1196_v21 }
 0x5c9   : > { %v1225_v23 = vpop.f32.mrf.mxu1 }
 0x5ca   : > { %v1229_v24 = vadd.f32 %v1225_v23, %v2483_v1  ;;  %v2011_v1 = vld [vmem:[%s2729_s14] sm:$0xff] }
 0x5cb   : > { %1339 = vmatpush.bf16.msra.mxu3 %v2011_v1 }
 0x5cc   : > { %v2583_v25 = vadd.f32 %v2086_v22, %v1229_v24 }
 0x5ce   : > { %v1237_v26 = vsel %vm870_vm0, %v2583_v25, 0.0  ;;  %1957 = vmatmul.msk.bf16.vlgmr.msra.gmra.mxu3 %vm870_vm0, %v2004_v29 }
 0x5cf   : > { %1238 = vadd.xlane.f32.xlu0 %v1237_v26 }
 0x5d1   : > { %v1227_v27 = vpop.f32.mrf.mxu1 }
 0x642   : > { %v1239_v30 = vpop.xlane.xlu0 %1238 }
 0x643   : > { %v1240_v31 = vmul.f32 %v1239_v30, %v2487_v9 }
 0x645   : > { %v1241_v32 = vsub.f32 %v2583_v25, %v1240_v31 }
 0x647   : > { %v1242_v33 = vmul.f32 %v1241_v32, %v1241_v32 }
 0x649   : > { %v1243_v34 = vsel %vm870_vm0, %v1242_v33, 0.0 }
 0x64a   : > { %1244 = vadd.xlane.f32.xlu1 %v1243_v34 }
 0x651   : > { %v1341_v38 = vpop.f32.mrf.mxu3 }
 0x652   : > { %v1342_v42 = vadd.f32 %v2089_v37, %v1341_v38 }
 0x654   : > { %v1354_v44 = vpack.c.bf16 %v1342_v42, %v1342_v42 }
 0x656   : > { %1362 = vrot.lane.b32.xlu2 %v1354_v44, %s2283_s26  ;;  %v1370_v48 = vunpack.c.l.b16 %v1354_v44 }
 0x659   : > { %v1343_v45 = vpop.f32.mrf.mxu3 }
 0x65a   : > { %v1344_v43 = vadd.f32 %v2089_v37, %v1343_v45 }
 0x65c   : > { %v1355_v46 = vpack.c.bf16 %v1344_v43, %v1344_v43 }
 0x65e   : > { %1364 = vrot.lane.b32.xlu0 %v1355_v46, %s2283_s26  ;;  %v1371_v51 = vunpack.c.l.b16 %v1355_v46  ;;  %1368 = vrot.lane.b32.xlu2 %v1355_v46, %s2281_s3 }
 0x660   : > { %v2616_v53 = vpack.c.b16 %v1371_v51, %v1370_v48 }
 0x662   : > { %v1377_v54 = vsel %vm957_vm6, %v2616_v53, 0 }
 0x663   : > { %1366 = vrot.lane.b32.xlu1 %v1354_v44, %s2281_s3  ;;  %1386 = vmatpush.bf16.xpose.msrb.mxu0 %v1377_v54 }
 0x666   : > { %1360 = vrot.lane.b32.xlu0 %v1355_v46, %s2282_s4  ;;  %1358 = vrot.lane.b32.xlu2 %v1354_v44, %s2282_s4 }
 0x6b0   : > { %v1363_v0 = vpop.permute.xlu2 %1362 }
 0x6b1   : > { %v1414_v3 = vunpack.c.l.b16 %v1363_v0 }
 0x6b8   : > { %v1369_v10 = vpop.permute.xlu2 %1368 }
 0x6b9   : > { %v1437_v11 = vunpack.c.l.b16 %v1369_v10 }
 0x6bd   : > { %v1245_v39 = vpop.xlane.xlu1 %1244 }
 0x6be   : > { %v1246_v41 = vmul.f32 %v1245_v39, %v2487_v9 }
 0x6c0   : > { %v1247_v40 = vadd.f32 1e-05, %v1246_v41  ;;  %v1359_v16 = vpop.permute.xlu2 %1358 }
 0x6c1   : > { %v1392_v17 = vunpack.c.l.b16 %v1359_v16 }
 0x6c2   : > { %2116 = vrsqrt.f32 %v1247_v40  ;;  %vm1254_vm2 = vweird.f32 %v1247_v40 }
 0x6c8   : > { %v2117_v49 = vpop.eup %2116 }
 0x6c9   : > { %v1249_v50 = vmul.f32 %v2117_v49, %v1247_v40  ;;  %vm1255_vm1 = vweird.f32 %v2117_v49 }
 0x6ca   : > { %vm1256_vm3 = vmor %vm1254_vm2, %vm1255_vm1 }
 0x6cb   : > { %v1250_v52 = vmul.f32 %v2117_v49, %v1249_v50 }
 0x6cd   : > { %v1251_v47 = vmul.f32 0.5, %v1250_v52 }
 0x6cf   : > { %v1252_v55 = vsub.f32 1.5, %v1251_v47 }
 0x6d0   : > { %v1365_v2 = vpop.permute.xlu0 %1364 }
 0x6d1   : > { %v1253_v56 = vmul.f32 %v2117_v49, %v1252_v55  ;;  %v1415_v4 = vunpack.c.l.b16 %v1365_v2 }
 0x6d3   : > { %v1257_v58 = vsel %vm1256_vm3, %v2117_v49, %v1253_v56  ;;  %v2629_v5 = vpack.c.b16 %v1415_v4, %v1414_v3 }
 0x6d4   : > { %v1258_v59 = vmul.f32 %v1257_v58, %v1241_v32 }
 0x6d5   : > { %v1367_v6 = vpop.permute.xlu1 %1366  ;;  %v1421_v7 = vsel %vm957_vm6, %v2629_v5, 0 }
 0x6d6   : > { %v1262_v61 = vmul.f32 %v2087_v57, %v1258_v59  ;;  %1430 = vmatpush.bf16.xpose.msrb.mxu2 %v1421_v7  ;;  %v1436_v8 = vunpack.c.l.b16 %v1367_v6 }
 0x6d8   : > { %v1266_v62 = vadd.f32 %v2088_v60, %v1262_v61  ;;  %v2633_v12 = vpack.c.b16 %v1437_v11, %v1436_v8  ;;  %v1361_v13 = vpop.permute.xlu0 %1360 }
 0x6d9   : > { %v1393_v15 = vunpack.c.l.b16 %v1361_v13 }
 0x6da   : > { %v1267_v63 = vpack.c.bf16 %v1266_v62, %v1266_v62  ;;  %v1443_v14 = vsel %vm957_vm6, %v2633_v12, 0 }
 0x6db   : > { %1452 = vmatpush.bf16.xpose.msrb.mxu3 %v1443_v14  ;;  %v1394_v18 = vpack.c.b16 %v1393_v15, %v1392_v17 }
 0x6dc   : > { %1944 = vmatmul.msk.bf16.vlgmr.msra.gmra.mxu2 %vm870_vm0, %v1267_v63 }
 0x6dd   : > { %v1399_v20 = vsel %vm957_vm6, %v1394_v18, 0 }
 0x6de   : > { %1408 = vmatpush.bf16.xpose.msrb.mxu1 %v1399_v20 }
 0x75f   : > { %v1300_v21 = vpop.f32.mrf.mxu2 }
 0x760   : > { %v1301_v22 = vadd.f32 %v2090_v19, %v1300_v21 }
 0x762   : > { %v1346_v23 = vpack.c.bf16 %v1301_v22, %v1301_v22 }
 0x764   : > { %1348 = vrot.lane.b32.xlu0 %v1346_v23, %s2282_s4  ;;  %1352 = vrot.lane.b32.xlu1 %v1346_v23, %s2281_s3  ;;  %s2770_s3 = smov 8   ;;  %s2771_s4 = smov 16  }
 0x765   : > { %1350 = vrot.lane.b32.xlu2 %v1346_v23, %s2283_s26  ;;  %1958 = vmatmul.msk.bf16.vlgmr.msrb.gmra.mxu0 %vm957_vm6, %v1346_v23  ;;  %s2772_s26 = smov 24  }
 0x767   : > { %v1302_v24 = vpop.f32.mrf.mxu2 }
 0x7bf   : > { %v1351_v26 = vpop.permute.xlu2 %1350 }
 0x7c0   : > { %1960 = vmatmul.msk.bf16.vlgmr.msrb.gmra.mxu2 %vm957_vm6, %v1351_v26 }
 0x7d6   : > { %v1353_v27 = vpop.permute.xlu1 %1352  ;;  %v1349_v28 = vpop.permute.xlu0 %1348 }
 0x7d7   : > { %1959 = vmatmul.msk.bf16.vlgmr.msrb.gmra.mxu1 %vm957_vm6, %v1349_v28  ;;  %1961 = vmatmul.msk.bf16.vlgmr.msrb.gmra.mxu3 %vm957_vm6, %v1353_v27  ;;  %v2014_v27 = vld [vmem:[%s2731_s16 + $0x8] sm:$0xff]  ;;  %v2013_v28 = vld [vmem:[%s2731_s16] sm:$0xff] }
 0x7e2   : > { %v1388_v1 = vpop.f32.mrf.mxu0 }
 0x7e3   : > { %v1458_v33 = vsel %vm1192_vm14, %v1388_v1, -inf }
 0x7ea   : > { %v1390_v29 = vpop.f32.mrf.mxu0 }
 0x843   : > { %v1432_v30 = vpop.f32.mrf.mxu2 }
 0x844   : > { %v1464_v31 = vsel %vm1192_vm14, %v1432_v30, -inf }
 0x845   : > { %1465 = vmax.xlane.f32.xlu2 %v1464_v31 }
 0x84b   : > { %v1434_v32 = vpop.f32.mrf.mxu2 }
 0x84d   : > { %1459 = vmax.xlane.f32.xlu2 %v1458_v33 }
 0x854   : > { %v1410_v34 = vpop.f32.mrf.mxu1 }
 0x855   : > { %v1461_v35 = vsel %vm1192_vm14, %v1410_v34, -inf }
 0x856   : > { %1462 = vmax.xlane.f32.xlu0 %v1461_v35  ;;  %v2091_v35 = vld [vmem:[%s2732_s17] ss:$0 sm:$0xff] }
 0x85a   : > { %v1454_v36 = vpop.f32.mrf.mxu3 }
 0x85b   : > { %v1467_v37 = vsel %vm1192_vm14, %v1454_v36, -inf }
 0x85c   : > { %1468 = vmax.xlane.f32.xlu1 %v1467_v37  ;;  %v1412_v38 = vpop.f32.mrf.mxu1 }
 0x862   : > { %v1456_v39 = vpop.f32.mrf.mxu3 }
 0x8b8   : > { %v1466_v41 = vpop.xlane.xlu2 %1465 }
 0x8b9   : > { %v1472_v42 = vsub.f32 %v1432_v30, %v1466_v41 }
 0x8bb   : > { %v1478_v40 = vmul.f32 1.442695, %v1472_v42 }
 0x8bd   : > { %2118 = vpow2.f32 %v1478_v40 }
 0x8c0   : > { %v1460_v56 = vpop.xlane.xlu2 %1459 }
 0x8c1   : > { %v1470_v57 = vsub.f32 %v1388_v1, %v1460_v56 }
 0x8c3   : > { %v2119_v44 = vpop.eup %2118  ;;  %v1474_v58 = vmul.f32 1.442695, %v1470_v57 }
 0x8c4   : > { %v1488_v45 = vsel %vm1192_vm14, %v2119_v44, 0.0 }
 0x8c5   : > { %1489 = vadd.xlane.f32.xlu1 %v1488_v45 }
 0x8c9   : > { %v1463_v43 = vpop.xlane.xlu0 %1462 }
 0x8ca   : > { %v1471_v46 = vsub.f32 %v1410_v34, %v1463_v43 }
 0x8cc   : > { %v1476_v48 = vmul.f32 1.442695, %v1471_v46  ;;  %v2016_v46 = vld [vmem:[%s2735_s20 + $0x8] sm:$0xff] }
 0x8ce   : > { %2120 = vpow2.f32 %v1476_v48  ;;  %v2020_v48 = vld [vmem:[%s2737_s22 + $0x18] sm:$0xff] }
 0x8cf   : > { %v1469_v49 = vpop.xlane.xlu1 %1468 }
 0x8d0   : > { %v1473_v50 = vsub.f32 %v1454_v36, %v1469_v49 }
 0x8d2   : > { %v1480_v51 = vmul.f32 1.442695, %v1473_v50 }
 0x8d4   : > { %v2121_v52 = vpop.eup %2120  ;;  %2122 = vpow2.f32 %v1480_v51  ;;  %v2019_v51 = vld [vmem:[%s2737_s22 + $0x10] sm:$0xff] }
 0x8d5   : > { %v1485_v47 = vsel %vm1192_vm14, %v2121_v52, 0.0  ;;  %2124 = vpow2.f32 %v1474_v58 }
 0x8d6   : > { %1486 = vadd.xlane.f32.xlu2 %v1485_v47 }
 0x8da   : > { %v2123_v54 = vpop.eup %2122 }
 0x8db   : > { %v1491_v55 = vsel %vm1192_vm14, %v2123_v54, 0.0  ;;  %v2125_v59 = vpop.eup %2124 }
 0x8dc   : > { %1492 = vadd.xlane.f32.xlu0 %v1491_v55  ;;  %v1482_v60 = vsel %vm1192_vm14, %v2125_v59, 0.0 }
 0x8de   : > { %1544 = vrot.lane.b32.xlu1 %v2629_v5, %s2284_s27 }
 0x8e6   : > { %1506 = vrot.lane.b32.xlu1 %v2616_v53, %s2284_s27 }
 0x8ee   : > { %1525 = vrot.lane.b32.xlu2 %v1394_v18, %s2284_s27 }
 0x8f0   : > { %1563 = vrot.lane.b32.xlu0 %v2633_v12, %s2284_s27 }
 0x91a   : > { %1483 = vadd.xlane.f32.xlu0 %v1482_v60 }
 0x938   : > { %v1490_v61 = vpop.xlane.xlu1 %1489 }
 0x939   : > { %2126 = vrcp.f32 %v1490_v61  ;;  %v2093_v61 = vld [vmem:[#allocation4] ss:$0 sm:$0xff] }
 0x93f   : > { %v2127_v63 = vpop.eup %2126 }
 0x940   : > { %v1500_v0 = vmul.f32 %v2127_v63, %v2119_v44 }
 0x942   : > { %v1504_v5 = vpack.c.bf16 %v1500_v0, %v1500_v0 }
 0x949   : > { %v1487_v62 = vpop.xlane.xlu2 %1486 }
 0x94a   : > { %2128 = vrcp.f32 %v1487_v62 }
 0x94f   : > { %v1493_v7 = vpop.xlane.xlu0 %1492 }
 0x950   : > { %v2129_v53 = vpop.eup %2128  ;;  %v1545_v2 = vpop.permute.xlu1 %1544  ;;  %2130 = vrcp.f32 %v1493_v7 }
 0x951   : > { %v1499_v3 = vmul.f32 %v2129_v53, %v2121_v52  ;;  %1557 = vmatpush.bf16.msra.mxu2 %v1545_v2  ;;  %v1526_v4 = vpop.permute.xlu2 %1525  ;;  %v2018_v53 = vld [vmem:[%s2737_s22 + $0x8] sm:$0xff]  ;;  %v2017_v2 = vld [vmem:[%s2737_s22] sm:$0xff] }
 0x952   : > { %1538 = vmatpush.bf16.msra.mxu1 %v1526_v4 }
 0x953   : > { %v1503_v6 = vpack.c.bf16 %v1499_v3, %v1499_v3  ;;  %v2094_v3 = vld [vmem:[#allocation6] ss:$0 sm:$0xff] }
 0x954   : > { %1964 = vmatmul.msk.bf16.vlgmr.msra.gmra.mxu2 %vm1192_vm14, %v1504_v5 }
 0x955   : > { %1963 = vmatmul.msk.bf16.vlgmr.msra.gmra.mxu1 %vm1192_vm14, %v1503_v6  ;;  %1747 = vmatpush.bf16.msrb.mxu2 %v2020_v48 }
 0x956   : > { %v2131_v10 = vpop.eup %2130  ;;  %1698 = vmatpush.bf16.msrb.mxu1 %v2016_v46 }
 0x957   : > { %v1501_v11 = vmul.f32 %v2131_v10, %v2123_v54  ;;  %v2095_v10 = vld [vmem:[#allocation7] ss:$0 sm:$0xff] }
 0x958   : > { %v1507_v8 = vpop.permute.xlu1 %1506 }
 0x959   : > { %1519 = vmatpush.bf16.msra.mxu0 %v1507_v8  ;;  %v1505_v13 = vpack.c.bf16 %v1501_v11, %v1501_v11  ;;  %1748 = vmatpush.bf16.msrb.mxu2 %v2019_v51 }
 0x95d   : > { %1623 = vmatpush.bf16.msrb.mxu0 %v2014_v27  ;;  %1749 = vmatpush.bf16.msrb.mxu2 %v2018_v53 }
 0x961   : > { %1624 = vmatpush.bf16.msrb.mxu0 %v2013_v28  ;;  %1750 = vmatpush.bf16.msrb.mxu2 %v2017_v2 }
 0x962   : > { %v1564_v12 = vpop.permute.xlu0 %1563 }
 0x963   : > { %1576 = vmatpush.bf16.msra.mxu3 %v1564_v12 }
 0x966   : > { %1965 = vmatmul.msk.bf16.vlgmr.msra.gmra.mxu3 %vm1192_vm14, %v1505_v13 }
 0x98d   : > { %v1484_v14 = vpop.xlane.xlu0 %1483 }
 0x98e   : > { %2132 = vrcp.f32 %v1484_v14 }
 0x994   : > { %v2133_v15 = vpop.eup %2132 }
 0x995   : > { %v1498_v16 = vmul.f32 %v2133_v15, %v2125_v59  ;;  %v2092_v59 = vld [vmem:[#allocation2] ss:$0 sm:$0xff] }
 0x997   : > { %v1502_v17 = vpack.c.bf16 %v1498_v16, %v1498_v16 }
 0x999   : > { %1962 = vmatmul.msk.bf16.vlgmr.msra.gmra.mxu0 %vm1192_vm14, %v1502_v17 }
 0x9d2   : > { %v1540_v18 = vpop.f32.mrf.mxu1 }
 0x9d3   : > { %1583 = vrot.lane.b32.xlu2 %v1540_v18, %s2770_s3 }
 0x9d7   : > { %v1559_v19 = vpop.f32.mrf.mxu2 }
 0x9d8   : > { %1587 = vrot.lane.b32.xlu1 %v1559_v19, %s2771_s4 }
 0x9da   : > { %v1542_v20 = vpop.f32.mrf.mxu1 }
 0x9df   : > { %v1561_v21 = vpop.f32.mrf.mxu2 }
 0x9e9   : > { %v1578_v22 = vpop.f32.mrf.mxu3 }
 0x9ea   : > { %1591 = vrot.lane.b32.xlu2 %v1578_v22, %s2772_s26 }
 0x9f1   : > { %v1580_v23 = vpop.f32.mrf.mxu3 }
 0xa16   : > { %v1521_v24 = vpop.f32.mrf.mxu0 }
 0xa1e   : > { %v1523_v26 = vpop.f32.mrf.mxu0 }
 0xa2d   : > { %v1584_v1 = vpop.permute.xlu2 %1583 }
 0xa2e   : > { %v1594_v29 = vsel %vm957_vm6, %v1521_v24, %v1584_v1 }
 0xa44   : > { %v1592_v31 = vpop.permute.xlu2 %1591 }
 0xa4a   : > { %v1588_v30 = vpop.permute.xlu1 %1587 }
 0xa4b   : > { %v1595_v32 = vsel %vm1192_vm14, %v1594_v29, %v1588_v30 }
 0xa4c   : > { %v1596_v33 = vsel %vm1194_vm15, %v1595_v32, %v1592_v31 }
 0xa4d   : > { %v1597_v34 = vpack.c.bf16 %v1596_v33, %v1596_v33 }
 0xa4f   : > { %1974 = vmatmul.msk.bf16.vlgmr.msrb.gmra.mxu0 %vm870_vm0, %v1597_v34 }
 0xacc   : > { %v1626_v36 = vpop.f32.mrf.mxu0 }
 0xacd   : > { %v1630_v37 = vadd.f32 %v1626_v36, %v2583_v25  ;;  %v2015_v25 = vld [vmem:[%s2735_s20] sm:$0xff] }
 0xace   : > { %1699 = vmatpush.bf16.msrb.mxu1 %v2015_v25 }
 0xacf   : > { %v1635_v38 = vadd.f32 %v2091_v35, %v1630_v37 }
 0xad1   : > { %v1638_v39 = vsel %vm870_vm0, %v1635_v38, 0.0 }
 0xad2   : > { %1639 = vadd.xlane.f32.xlu1 %v1638_v39 }
 0xad4   : > { %v1628_v41 = vpop.f32.mrf.mxu0 }
 0xb45   : > { %v1640_v42 = vpop.xlane.xlu1 %1639 }
 0xb46   : > { %v1641_v40 = vmul.f32 %v1640_v42, %v2487_v9 }
 0xb48   : > { %v1642_v44 = vsub.f32 %v1635_v38, %v1641_v40 }
 0xb4a   : > { %v1643_v45 = vmul.f32 %v1642_v44, %v1642_v44 }
 0xb4c   : > { %v1644_v43 = vsel %vm870_vm0, %v1643_v45, 0.0 }
 0xb4d   : > { %1645 = vadd.xlane.f32.xlu2 %v1644_v43 }
 0xbc0   : > { %v1646_v49 = vpop.xlane.xlu2 %1645 }
 0xbc1   : > { %v1647_v50 = vmul.f32 %v1646_v49, %v2487_v9 }
 0xbc3   : > { %v1648_v52 = vadd.f32 1e-05, %v1647_v50 }
 0xbc5   : > { %2134 = vrsqrt.f32 %v1648_v52  ;;  %vm1655_vm5 = vweird.f32 %v1648_v52 }
 0xbcb   : > { %v2135_v47 = vpop.eup %2134 }
 0xbcc   : > { %v1650_v54 = vmul.f32 %v2135_v47, %v1648_v52  ;;  %vm1656_vm4 = vweird.f32 %v2135_v47 }
 0xbcd   : > { %vm1657_vm6 = vmor %vm1655_vm5, %vm1656_vm4 }
 0xbce   : > { %v1651_v55 = vmul.f32 %v2135_v47, %v1650_v54 }
 0xbd0   : > { %v1652_v56 = vmul.f32 0.5, %v1651_v55 }
 0xbd2   : > { %v1653_v57 = vsub.f32 1.5, %v1652_v56 }
 0xbd4   : > { %v1654_v58 = vmul.f32 %v2135_v47, %v1653_v57 }
 0xbd6   : > { %v1658_v60 = vsel %vm1657_vm6, %v2135_v47, %v1654_v58 }
 0xbd7   : > { %v1659_v9 = vmul.f32 %v1658_v60, %v1642_v44 }
 0xbd9   : > { %v1663_v62 = vmul.f32 %v2092_v59, %v1659_v9 }
 0xbdb   : > { %v1667_v63 = vadd.f32 %v2093_v61, %v1663_v62 }
 0xbdd   : > { %v1668_v0 = vpack.c.bf16 %v1667_v63, %v1667_v63 }
 0xbdf   : > { %1983 = vmatmul.msk.bf16.vlgmr.msrb.gmra.mxu1 %vm870_vm0, %v1668_v0  ;;  %vm1763_vm0 = vcmask 257024  }
 0xc5c   : > { %v1701_v4 = vpop.f32.mrf.mxu1 }
 0xc5d   : > { %v1702_v5 = vadd.f32 %v2094_v3, %v1701_v4 }
 0xc5f   : > { %v1705_v6 = vmax.f32 %v1702_v5, 0.0 }
 0xc61   : > { %v1706_v7 = vpack.c.bf16 %v1705_v6, %v1705_v6 }
 0xc63   : > { %2000 = vmatmul.msk.bf16.vlgmr.msrb.gmra.mxu2 %vm1739_vm7, %v1706_v7 }
 0xc64   : > { %v1703_v8 = vpop.f32.mrf.mxu1 }
 0xce6   : > { %v1752_v11 = vpop.f32.mrf.mxu2 }
 0xce7   : > { %v1756_v12 = vadd.f32 %v1752_v11, %v1635_v38 }
 0xce9   : > { %v1761_v13 = vadd.f32 %v2095_v10, %v1756_v12 }
 0xceb   : > { %v1762_v14 = vpack.c.bf16 %v1761_v13, %v1761_v13 }
 0xced   : > { %1764 = vst.msk [vmem:[%s842_s29] sm:$0xf] %vm1763_vm0, %v1762_v14 }
 0xcee   : > { %v1754_v15 = vpop.f32.mrf.mxu2 }
 0xcef PF: > { %s37_s5 = sadd.s32 1, %s2274_s5  }
 0xcf0   : > { %p34_p7 = scmp.ge.s32.totalorder %s37_s5, 4  }
 0xcf2   :  { %36 = sbr.rel (!%p34_p7) target bundleno = 15 (0xf), region = 172 }
 0xcf7   :  { %1784 = vsyncpa [#allocation3], 1 }
 0xcf8   :  { %1786 = vsyncpa [#allocation3 + $0x1], 1 }
 0xcf9   :  { %1787 = vsyncpa [#allocation5], 1 }
 0xcfa   :  { %1788 = vsyncpa [#allocation8], 1 }

// kernel: decoder_forward.3
= control target key start
LH: loop header
LB: loop body
LE: loop exit
PB: predicated region body
PF: predicated region fallthrough
CT: control target
= control target key end

     0   :  { %s2391_s0 = inlined_call_operand.vmem [shape: bf16[2,8,32], index: 0, kind: input, shape index: {}]   ;;  %s2392_s1 = inlined_call_operand.vmem [shape: bf16[2,16,32], index: 1, kind: input, shape index: {}]   ;;  %s2393_s2 = inlined_call_operand.vmem [shape: f32[2,1,8], index: 2, kind: input, shape index: {}]   ;;  %s2394_s3 = inlined_call_operand.vmem [shape: f32[2,8,1], index: 3, kind: input, shape index: {}]   ;;  %s2395_s4 = inlined_call_operand.vmem [shape: f32[1,32], index: 4, kind: input, shape index: {}]   ;;  %s2396_s5 = inlined_call_operand.vmem [shape: f32[1,32], index: 5, kind: input, shape index: {}]   ;;  %s2397_s6 = inlined_call_operand.vmem [shape: bf16[32,96], index: 6, kind: input, shape index: {}]   ;;  %s2398_s7 = inlined_call_operand.vmem [shape: f32[1,96], index: 7, kind: input, shape index: {}]   ;;  %s2399_s8 = inlined_call_operand.vmem [shape: bf16[32,32], index: 8, kind: input, shape index: {}]   ;;  %s2400_s9 = inlined_call_operand.vmem [shape: f32[1,32], index: 9, kind: input, shape index: {}]   ;;  %s2401_s10 = inlined_call_operand.vmem [shape: f32[1,32], index: 10, kind: input, shape index: {}]   ;;  %s2402_s11 = inlined_call_operand.vmem [shape: f32[1,32], index: 11, kind: input, shape index: {}]   ;;  %s2403_s12 = inlined_call_operand.vmem [shape: bf16[32,32], index: 12, kind: input, shape index: {}]   ;;  %s2404_s13 = inlined_call_operand.vmem [shape: f32[1,32], index: 13, kind: input, shape index: {}]   ;;  %s2405_s14 = inlined_call_operand.vmem [shape: bf16[32,64], index: 14, kind: input, shape index: {}]   ;;  %s2406_s15 = inlined_call_operand.vmem [shape: f32[1,64], index: 15, kind: input, shape index: {}]   ;;  %s2407_s16 = inlined_call_operand.vmem [shape: bf16[32,32], index: 16, kind: input, shape index: {}]   ;;  %s2408_s17 = inlined_call_operand.vmem [shape: f32[1,32], index: 17, kind: input, shape index: {}]   ;;  %s2409_s18 = inlined_call_operand.vmem [shape: f32[1,32], index: 18, kind: input, shape index: {}]   ;;  %s2410_s19 = inlined_call_operand.vmem [shape: f32[1,32], index: 19, kind: input, shape index: {}]   ;;  %s2411_s20 = inlined_call_operand.vmem [shape: bf16[32,64], index: 20, kind: input, shape index: {}]   ;;  %s2412_s21 = inlined_call_operand.vmem [shape: f32[1,64], index: 21, kind: input, shape index: {}]   ;;  %s2413_s22 = inlined_call_operand.vmem [shape: bf16[64,32], index: 22, kind: input, shape index: {}]   ;;  %s2414_s23 = inlined_call_operand.vmem [shape: f32[1,32], index: 23, kind: input, shape index: {}]   ;;  %s2415_s24 = inlined_call_operand.vmem [shape: bf16[2,8,32], index: 24, kind: output, shape index: {}]  }
   0x1   :  { %2426 = sst [smem:[#allocation2_spill]] %s2391_s0 }
   0x2   :  { %2427 = sst [smem:[#allocation3_spill]] %s2392_s1 }
   0x3   :  { %2428 = sst [smem:[#allocation4_spill]] %s2393_s2 }
   0x4   :  { %2429 = sst [smem:[#allocation5_spill]] %s2394_s3 }
   0x5   :  { %2430 = sst [smem:[#allocation6_spill]] %s2395_s4 }
   0x6   :  { %2431 = sst [smem:[#allocation7_spill]] %s2396_s5  ;;  %s2131_s5 = smov 0  }
   0x7   :  { %2432 = sst [smem:[#allocation8_spill]] %s2397_s6 }
   0x8   :  { %2433 = sst [smem:[#allocation9_spill]] %s2398_s7 }
   0x9   :  { %2434 = sst [smem:[#allocation10_spill]] %s2399_s8 }
   0xa LB: > { %s1792_s26 = sadd.s32 4294967295, %s1993_s5   ;;  %p1796_p0 = scmp.ge.s32.totalorder %s1993_s5, 1  ;;  %s1993_s5 = sphi %s2131_s5, %s34_s5  }
   0xb   : > { %p688_p1 = scmp.lt.s32.totalorder %s1993_s5, 3 }
   0xd   : > { %p689_p2 = pnand %p1796_p0, %p688_p1 }
   0xe   : > { %p764_p3 = scmp.lt.s32.totalorder (!%p689_p2), %s1792_s26, 1  ;;  %s2435_s2 = sld [smem:[#allocation2_spill]] (!%p689_p2) }
   0xf   : > { %692 = sbr.rel (%p689_p2) target bundleno = 3289 (0xcd9), region = 116  ;;  %s2436_s30 = sld [smem:[#allocation8_spill]] (!%p689_p2) }
  0x10   : > { %s2437_s1 = sld [smem:[#allocation6_spill]] (!%p689_p2)  ;;  %s1996_s3 = smov (!%p689_p2), 104  }
  0x11   : > { %s2439_s7 = sld [smem:[#allocation9_spill]] (!%p689_p2)  ;;  %s2424_s25 = smov (!%p689_p2), 120  }
  0x12   : > { %s1998_s8 = smov (!%p689_p2), 112   ;;  %s2419_s4 = smov (!%p689_p2), 96  }
  0x13   : > { %s2441_s28 = sld [smem:[#allocation4_spill]] (!%p689_p2)  ;;  %s2421_s0 = smov (!%p689_p2), 24  }
  0x14   : > { %s2451_s26 = smov (!%p764_p3, %s1792_s26), 1  ;;  %vm811_vm0 = vcmask 261120   ;;  %v1995_v3 = vmov 32.0   ;;  %v2000_v50 = vmov 0   ;;  %vm898_vm6 = vcmask 64512  }
  0x15   : > { %s2418_s27 = sshll.u32 %s2451_s26, 2  ;;  %1947 = vrcp.f32 %v1995_v3  ;;  %v1898_v15 = vld [vmem:[%s2436_s30 + $0x8] sm:$0xff]  ;;  %v1897_v16 = vld [vmem:[%s2436_s30] sm:$0xff]  ;;  %1932 = vset.pattern.permute.xlu1 %v2000_v50  ;;  %1933 = vset.pattern.permute.xlu0 %v2000_v50  ;;  %v793_v62 = vlaneseq  ;;  %vm1040_vm13 = vcmask 1043456   ;;  %vm1133_vm14 = vcmask 130048  }
  0x16   : > { %s767_s29 = scalar_lea.vmem %s2435_s2, %s2418_s27  ;;  %879 = vmatpush.bf16.msra.mxu0 %v1898_v15  ;;  %v1934_v26 = vld [vmem:[%s2437_s1] ss:$0 sm:$0xff]  ;;  %s2438_s2 = sld [smem:[#allocation7_spill]]  ;;  %vm1135_vm15 = vcmask 195584  }
  0x17   : > { %v785_v0 = vld [vmem:[%s767_s29] sm:$0xf]  ;;  %s1895_s1 = sshll.u32 %s2451_s26, 3  ;;  %v796_v3 = vand.u32 127, %v793_v62  ;;  %s2448_s27 = smov 24  }
  0x18   : > { %v2147_v1 = vunpack.c.l.bf16 %v785_v0  ;;  %v1936_v33 = vld [vmem:[%s2439_s7] ss:$0 sm:$0xff]  ;;  %s2422_s7 = smov 16  }
  0x19   : > { %s775_s6 = scalar_lea.vmem %s2441_s28, %s2451_s26 }
  0x1a   : > { %v812_v2 = vsel %vm811_vm0, %v2147_v1, 0.0  ;;  %880 = vmatpush.bf16.msra.mxu0 %v1897_v16  ;;  %v789_v60 = vld [vmem:[%s775_s6] sm:$0x1] }
  0x1b   : > { %813 = vadd.xlane.f32.xlu0 %v812_v2  ;;  %v1948_v4 = vpop.eup %1947  ;;  %vm790_vm7 = vcmp.gt.f32.partialorder %v789_v60, 0.5  ;;  %v794_v2 = vshrl.u32 %v793_v62, 7 }
  0x1c   : > { %v816_v5 = vmul.f32 32.0, %v1948_v4  ;;  %vm820_vm1 = vweird.f32 %v1948_v4  ;;  %v1935_v29 = vld [vmem:[%s2438_s2] ss:$0 sm:$0xff]  ;;  %s2440_s2 = sld [smem:[#allocation5_spill]]  ;;  %v797_v61 = vsel %vm790_vm7, 1, %v2000_v50  ;;  %vm1680_vm7 = vcmask 523264  }
  0x1d   : > { %v798_v63 = vperm.slane %v797_v61, 0  ;;  %vm806_vm10 = vcmp.gt.s32.totalorder %v796_v3, %v794_v2 }
  0x1e   : > { %v817_v6 = vsub.f32 1.0, %v816_v5 }
  0x1f   : > { %vm799_vm8 = vcmp.eq.s32.totalorder %v798_v63, 1 }
  0x20   : > { %v818_v7 = vmul.f32 %v1948_v4, %v817_v6 }
  0x22   : > { %v819_v8 = vadd.f32 %v1948_v4, %v818_v7  ;;  %s779_s29 = scalar_lea.vmem %s2440_s2, %s1895_s1  ;;  %s2002_s2 = smov 64  }
  0x23   : > { %v791_v49 = vld [vmem:[%s779_s29] sm:$0xff]  ;;  %s2423_s29 = smov 8  }
  0x24   : > { %v2151_v9 = vsel %vm820_vm1, %v1948_v4, %v819_v8  ;;  %vm792_vm5 = vcmp.gt.f32.partialorder %v791_v49, 0.5  ;;  %v2001_v4 = vmov 0.0  }
  0x25   : > { %v800_v51 = vsel %vm792_vm5, 1, %v2000_v50 }
  0x8e   : > { %v814_v10 = vpop.xlane.xlu0 %813 }
  0x8f   : > { %v822_v11 = vmul.f32 %v2151_v9, %v814_v10 }
  0x91   : > { %v823_v12 = vsub.f32 %v2147_v1, %v822_v11 }
  0x93   : > { %v824_v13 = vmul.f32 %v823_v12, %v823_v12 }
  0x95   : > { %v825_v14 = vsel %vm811_vm0, %v824_v13, 0.0 }
  0x96   : > { %826 = vadd.xlane.f32.xlu0 %v825_v14 }
 0x109   : > { %v827_v17 = vpop.xlane.xlu0 %826 }
 0x10a   : > { %v828_v18 = vmul.f32 %v827_v17, %v2151_v9 }
 0x10c   : > { %v829_v19 = vadd.f32 1e-05, %v828_v18 }
 0x10e   : > { %1949 = vrsqrt.f32 %v829_v19  ;;  %vm836_vm3 = vweird.f32 %v829_v19 }
 0x114   : > { %v1950_v20 = vpop.eup %1949 }
 0x115   : > { %v831_v21 = vmul.f32 %v1950_v20, %v829_v19  ;;  %vm837_vm2 = vweird.f32 %v1950_v20 }
 0x116   : > { %vm838_vm4 = vmor %vm836_vm3, %vm837_vm2 }
 0x117   : > { %v832_v22 = vmul.f32 %v1950_v20, %v831_v21 }
 0x119   : > { %v833_v23 = vmul.f32 0.5, %v832_v22 }
 0x11b   : > { %v834_v24 = vsub.f32 1.5, %v833_v23 }
 0x11d   : > { %v835_v25 = vmul.f32 %v1950_v20, %v834_v24 }
 0x11f   : > { %v839_v27 = vsel %vm838_vm4, %v1950_v20, %v835_v25 }
 0x120   : > { %v840_v28 = vmul.f32 %v839_v27, %v823_v12 }
 0x122   : > { %v844_v30 = vmul.f32 %v1934_v26, %v840_v28 }
 0x124   : > { %v848_v31 = vadd.f32 %v1935_v29, %v844_v30 }
 0x126   : > { %v849_v32 = vpack.c.bf16 %v848_v31, %v848_v31 }
 0x128   : > { %1810 = vmatmul.msk.bf16.vlgmr.msra.gmra.mxu0 %vm811_vm0, %v849_v32 }
 0x1a5   : > { %v882_v34 = vpop.f32.mrf.mxu0 }
 0x1a6   : > { %v883_v35 = vadd.f32 %v1936_v33, %v882_v34 }
 0x1a8   : > { %v886_v36 = vpack.c.bf16 %v883_v35, %v883_v35 }
 0x1aa   : > { %892 = vrot.lane.b32.xlu2 %v886_v36, %s1996_s3  ;;  %888 = vrot.lane.b32.xlu1 %v886_v36, %s2424_s25  ;;  %v894_v44 = vunpack.c.l.b16 %v886_v36 }
 0x1ac   : > { %v2186_v48 = vpack.c.b16 %v894_v44, %v894_v44 }
 0x1ad   : > { %v884_v37 = vpop.f32.mrf.mxu0 }
 0x1b2   : > { %890 = vrot.lane.b32.xlu1 %v886_v36, %s1998_s8 }
 0x204   : > { %v893_v38 = vpop.permute.xlu2 %892 }
 0x205   : > { %v964_v39 = vunpack.c.l.b16 %v893_v38 }
 0x207   : > { %v2176_v40 = vpack.c.b16 %v964_v39, %v964_v39 }
 0x209   : > { %966 = vrot.lane.b32.xlu1 %v2176_v40, %s2419_s4 }
 0x211   : > { %802 = vperm.xlu1 %1932, %v800_v51  }
 0x21c   : > { %v889_v41 = vpop.permute.xlu1 %888 }
 0x21d   : > { %v918_v42 = vunpack.c.l.b16 %v889_v41 }
 0x21f   : > { %v2180_v43 = vpack.c.b16 %v918_v42, %v918_v42 }
 0x221   : > { %920 = vrot.lane.b32.xlu2 %v2180_v43, %s2419_s4 }
 0x224   : > { %v891_v45 = vpop.permute.xlu1 %890 }
 0x225   : > { %v941_v46 = vunpack.c.l.b16 %v891_v45 }
 0x227   : > { %v2184_v47 = vpack.c.b16 %v941_v46, %v941_v46 }
 0x229   : > { %943 = vrot.lane.b32.xlu0 %v2184_v47, %s2419_s4  ;;  %896 = vrot.lane.b32.xlu2 %v2186_v48, %s2419_s4  ;;  %s2444_s4 = smov 120  }
 0x27b   : > { %v921_v52 = vpop.permute.xlu2 %920  ;;  %v967_v53 = vpop.permute.xlu1 %966 }
 0x27c   : > { %v926_v54 = vsel %vm898_vm6, %v921_v52, 0  ;;  %v972_v55 = vsel %vm898_vm6, %v967_v53, 0 }
 0x27d   : > { %935 = vmatpush.bf16.xpose.msra.mxu2 %v926_v54  ;;  %981 = vmatpush.bf16.xpose.msrb.mxu0 %v972_v55 }
 0x283   : > { %v897_v56 = vpop.permute.xlu2 %896  ;;  %v803_v0 = vpop.permute.xlu1 %802 }
 0x284   : > { %1812 = vmatmul.msk.bf16.vlgmr.msra.gmra.mxu2 %vm898_vm6, %v889_v41  ;;  %1814 = vmatmul.msk.bf16.vlgmr.msrb.gmra.mxu0 %vm898_vm6, %v893_v38  ;;  %v903_v57 = vsel %vm898_vm6, %v897_v56, 0  ;;  %vm804_vm9 = vcmp.eq.s32.totalorder %v803_v0, 1 }
 0x285   : > { %912 = vmatpush.bf16.xpose.msra.mxu1 %v903_v57  ;;  %vm805_vm11 = vmor %vm799_vm8, %vm804_vm9 }
 0x286   : > { %vm807_vm12 = vmor %vm805_vm11, %vm806_vm10 }
 0x287   : > { %v808_v5 = vsel %vm807_vm12, -1e+09, %v2001_v4 }
 0x28c   : > { %1811 = vmatmul.msk.bf16.vlgmr.msra.gmra.mxu1 %vm898_vm6, %v886_v36 }
 0x29b   : > { %v944_v58 = vpop.permute.xlu0 %943 }
 0x29c   : > { %v949_v59 = vsel %vm898_vm6, %v944_v58, 0 }
 0x29d   : > { %958 = vmatpush.bf16.xpose.msra.mxu3 %v949_v59 }
 0x2a4   : > { %1813 = vmatmul.msk.bf16.vlgmr.msra.gmra.mxu3 %vm898_vm6, %v891_v45 }
 0x301   : > { %v983_v6 = vpop.f32.mrf.mxu0 }
 0x302   : > { %v984_v7 = vadd.f32 %v983_v6, %v808_v5 }
 0x304   : > { %v996_v8 = vsel %vm898_vm6, %v984_v7, -inf }
 0x305   : > { %997 = vmax.xlane.f32.xlu0 %v996_v8 }
 0x307   : > { %v937_v10 = vpop.f32.mrf.mxu2 }
 0x308   : > { %v938_v11 = vadd.f32 %v937_v10, %v808_v5 }
 0x309   : > { %v914_v12 = vpop.f32.mrf.mxu1  ;;  %v985_v13 = vpop.f32.mrf.mxu0 }
 0x30a   : > { %v990_v14 = vsel %vm898_vm6, %v938_v11, -inf  ;;  %v915_v15 = vadd.f32 %v914_v12, %v808_v5 }
 0x30b   : > { %991 = vmax.xlane.f32.xlu2 %v990_v14 }
 0x30c   : > { %v987_v18 = vsel %vm898_vm6, %v915_v15, -inf }
 0x30f   : > { %v939_v16 = vpop.f32.mrf.mxu2 }
 0x311   : > { %v916_v17 = vpop.f32.mrf.mxu1 }
 0x313   : > { %988 = vmax.xlane.f32.xlu2 %v987_v18 }
 0x327   : > { %v960_v19 = vpop.f32.mrf.mxu3 }
 0x328   : > { %v961_v20 = vadd.f32 %v960_v19, %v808_v5 }
 0x32a   : > { %v993_v21 = vsel %vm898_vm6, %v961_v20, -inf }
 0x32b   : > { %994 = vmax.xlane.f32.xlu1 %v993_v21 }
 0x32f   : > { %v962_v22 = vpop.f32.mrf.mxu3 }
 0x330   : > { %v1937_v22 = vld [vmem:[%s2400_s9] ss:$0 sm:$0xff] }
 0x378   : > { %v998_v23 = vpop.xlane.xlu0 %997 }
 0x379   : > { %v1002_v24 = vsub.f32 %v984_v7, %v998_v23 }
 0x37b   : > { %v1009_v25 = vmul.f32 1.442695, %v1002_v24 }
 0x37d   : > { %1951 = vpow2.f32 %v1009_v25 }
 0x37e   : > { %v992_v26 = vpop.xlane.xlu2 %991 }
 0x37f   : > { %v1000_v27 = vsub.f32 %v938_v11, %v992_v26 }
 0x381   : > { %v1005_v28 = vmul.f32 1.442695, %v1000_v27 }
 0x383   : > { %v1952_v29 = vpop.eup %1951  ;;  %1953 = vpow2.f32 %v1005_v28  ;;  %v1904_v28 = vld [vmem:[%s2405_s14 + $0x8] sm:$0xff] }
 0x384   : > { %v1020_v30 = vsel %vm898_vm6, %v1952_v29, 0.0 }
 0x385   : > { %1021 = vadd.xlane.f32.xlu0 %v1020_v30 }
 0x386   : > { %v989_v38 = vpop.xlane.xlu2 %988 }
 0x387   : > { %v999_v39 = vsub.f32 %v915_v15, %v989_v38 }
 0x389   : > { %v1954_v31 = vpop.eup %1953  ;;  %v1003_v41 = vmul.f32 1.442695, %v999_v39 }
 0x38a   : > { %v1014_v32 = vsel %vm898_vm6, %v1954_v31, 0.0 }
 0x38b   : > { %1015 = vadd.xlane.f32.xlu2 %v1014_v32 }
 0x399   : > { %1099 = vrot.lane.b32.xlu0 %v2176_v40, %s2002_s2 }
 0x39e   : > { %v995_v33 = vpop.xlane.xlu1 %994 }
 0x39f   : > { %v1001_v34 = vsub.f32 %v961_v20, %v995_v33 }
 0x3a1   : > { %v1007_v35 = vmul.f32 1.442695, %v1001_v34  ;;  %1035 = vrot.lane.b32.xlu0 %v2186_v48, %s2002_s2 }
 0x3a3   : > { %1955 = vpow2.f32 %v1007_v35  ;;  %1057 = vrot.lane.b32.xlu2 %v2180_v43, %s2002_s2  ;;  %v1902_v35 = vld [vmem:[%s2403_s12 + $0x8] sm:$0xff] }
 0x3a4   : > { %1957 = vpow2.f32 %v1003_v41 }
 0x3a9   : > { %v1956_v36 = vpop.eup %1955 }
 0x3aa   : > { %v1017_v37 = vsel %vm898_vm6, %v1956_v36, 0.0  ;;  %v1958_v42 = vpop.eup %1957 }
 0x3ab   : > { %1018 = vadd.xlane.f32.xlu1 %v1017_v37  ;;  %v1011_v40 = vsel %vm898_vm6, %v1958_v42, 0.0  ;;  %v1940_v37 = vld [vmem:[%s2406_s15] ss:$0 sm:$0xff] }
 0x3c4   : > { %1078 = vrot.lane.b32.xlu1 %v2184_v47, %s2002_s2  ;;  %s2442_s2 = sld [smem:[#allocation10_spill]] }
 0x3ca   : > { %v1900_v13 = vld [vmem:[%s2442_s2 + $0x8] sm:$0xff]  ;;  %v1899_v14 = vld [vmem:[%s2442_s2] sm:$0xff] }
 0x3cc   : > { %1012 = vadd.xlane.f32.xlu2 %v1011_v40 }
 0x3f8   : > { %v1022_v44 = vpop.xlane.xlu0 %1021 }
 0x3fe   : > { %v1016_v45 = vpop.xlane.xlu2 %1015 }
 0x3ff   : > { %1959 = vrcp.f32 %v1016_v45 }
 0x400   : > { %1961 = vrcp.f32 %v1022_v44 }
 0x405   : > { %v1960_v43 = vpop.eup %1959 }
 0x406   : > { %v1028_v46 = vmul.f32 %v1960_v43, %v1954_v31  ;;  %v1058_v48 = vpop.permute.xlu2 %1057  ;;  %v1962_v49 = vpop.eup %1961 }
 0x407   : > { %v1063_v50 = vsel %vm1040_vm13, %v1058_v48, 0  ;;  %v1030_v52 = vmul.f32 %v1962_v49, %v1952_v29 }
 0x408   : > { %1072 = vmatpush.bf16.msrb.mxu2 %v1063_v50  ;;  %v1032_v51 = vpack.c.bf16 %v1028_v46, %v1028_v46 }
 0x409   : > { %v1034_v54 = vpack.c.bf16 %v1030_v52, %v1030_v52 }
 0x40b   : > { %v1100_v53 = vpop.permute.xlu0 %1099  ;;  %1816 = vmatmul.msk.bf16.vlgmr.msrb.gmra.mxu2 %vm898_vm6, %v1032_v51 }
 0x40c   : > { %v1105_v47 = vsel %vm1040_vm13, %v1100_v53, 0  ;;  %1238 = vmatpush.bf16.msra.mxu2 %v1902_v35 }
 0x40d   : > { %1114 = vmatpush.bf16.msra.mxu0 %v1105_v47 }
 0x410   : > { %1818 = vmatmul.msk.bf16.vlgmr.msra.gmra.mxu0 %vm898_vm6, %v1034_v54 }
 0x413   : > { %v1036_v55 = vpop.permute.xlu0 %1035 }
 0x414   : > { %v1042_v56 = vsel %vm1040_vm13, %v1036_v55, 0 }
 0x415   : > { %1051 = vmatpush.bf16.msrb.mxu1 %v1042_v56 }
 0x419   : > { %1163 = vmatpush.bf16.msra.mxu1 %v1900_v13 }
 0x41d   : > { %1164 = vmatpush.bf16.msra.mxu1 %v1899_v14 }
 0x41e   : > { %v1019_v57 = vpop.xlane.xlu1 %1018 }
 0x41f   : > { %1963 = vrcp.f32 %v1019_v57  ;;  %v1938_v57 = vld [vmem:[%s2401_s10] ss:$0 sm:$0xff] }
 0x425   : > { %v1964_v58 = vpop.eup %1963 }
 0x426   : > { %v1029_v59 = vmul.f32 %v1964_v58, %v1956_v36  ;;  %v1901_v36 = vld [vmem:[%s2403_s12] sm:$0xff] }
 0x427   : > { %1239 = vmatpush.bf16.msra.mxu2 %v1901_v36 }
 0x428   : > { %v1033_v62 = vpack.c.bf16 %v1029_v59, %v1029_v59 }
 0x436   : > { %v1079_v60 = vpop.permute.xlu1 %1078 }
 0x437   : > { %v1084_v61 = vsel %vm1040_vm13, %v1079_v60, 0  ;;  %v1939_v60 = vld [vmem:[%s2402_s11] ss:$0 sm:$0xff] }
 0x438   : > { %1093 = vmatpush.bf16.msrb.mxu3 %v1084_v61 }
 0x43b   : > { %1817 = vmatmul.msk.bf16.vlgmr.msrb.gmra.mxu3 %vm898_vm6, %v1033_v62 }
 0x43c   : > { %1279 = vmatpush.bf16.msra.mxu3 %v1904_v28 }
 0x43f   : > { %v1013_v63 = vpop.xlane.xlu2 %1012 }
 0x440   : > { %1965 = vrcp.f32 %v1013_v63 }
 0x446   : > { %v1966_v0 = vpop.eup %1965 }
 0x447   : > { %v1027_v2 = vmul.f32 %v1966_v0, %v1958_v42 }
 0x449   : > { %v1031_v3 = vpack.c.bf16 %v1027_v2, %v1027_v2 }
 0x44b   : > { %1815 = vmatmul.msk.bf16.vlgmr.msrb.gmra.mxu1 %vm898_vm6, %v1031_v3 }
 0x48d   : > { %v1116_v4 = vpop.f32.mrf.mxu0 }
 0x48e   : > { %v1074_v5 = vpop.f32.mrf.mxu2 }
 0x48f   : > { %1121 = vrot.lane.b32.xlu1 %v1074_v5, %s2423_s29  ;;  %s2443_s29 = sld [smem:[#allocation3_spill]] }
 0x495   : > { %v1118_v6 = vpop.f32.mrf.mxu0  ;;  %s772_s28 = scalar_lea.vmem %s2443_s29, %s1895_s1  ;;  %s2449_s1 = sshll.u32 %s2451_s26, 2 }
 0x496   : > { %v1076_v7 = vpop.f32.mrf.mxu2  ;;  %v1896_v29 = vld [vmem:[%s772_s28] sm:$0xff] }
 0x497   : > { %1129 = vrot.lane.b32.xlu1 %v1116_v4, %s2421_s0 }
 0x4be   : > { %v1095_v8 = vpop.f32.mrf.mxu3 }
 0x4bf   : > { %1125 = vrot.lane.b32.xlu0 %v1095_v8, %s2422_s7  ;;  %s2447_s7 = smov 16  }
 0x4c6   : > { %v1097_v10 = vpop.f32.mrf.mxu3 }
 0x4c8   : > { %v1053_v11 = vpop.f32.mrf.mxu1 }
 0x4d0   : > { %v1055_v12 = vpop.f32.mrf.mxu1 }
 0x501   : > { %v1122_v15 = vpop.permute.xlu1 %1121 }
 0x502   : > { %v1132_v16 = vsel %vm898_vm6, %v1053_v11, %v1122_v15 }
 0x509   : > { %v1130_v18 = vpop.permute.xlu1 %1129 }
 0x531   : > { %v1126_v17 = vpop.permute.xlu0 %1125 }
 0x532   : > { %v1134_v19 = vsel %vm1133_vm14, %v1132_v16, %v1126_v17 }
 0x533   : > { %v1136_v20 = vsel %vm1135_vm15, %v1134_v19, %v1130_v18  ;;  %v1941_v19 = vld [vmem:[%s2404_s13] ss:$0 sm:$0xff] }
 0x534   : > { %v1137_v21 = vpack.c.bf16 %v1136_v20, %v1136_v20 }
 0x536   : > { %1827 = vmatmul.msk.bf16.vlgmr.msra.gmra.mxu1 %vm811_vm0, %v1137_v21 }
 0x5b3   : > { %v1166_v23 = vpop.f32.mrf.mxu1 }
 0x5b4   : > { %v1170_v24 = vadd.f32 %v1166_v23, %v2147_v1  ;;  %v1903_v1 = vld [vmem:[%s2405_s14] sm:$0xff] }
 0x5b5   : > { %1280 = vmatpush.bf16.msra.mxu3 %v1903_v1 }
 0x5b6   : > { %v2247_v25 = vadd.f32 %v1937_v22, %v1170_v24 }
 0x5b8   : > { %v1178_v26 = vsel %vm811_vm0, %v2247_v25, 0.0  ;;  %1849 = vmatmul.msk.bf16.vlgmr.msra.gmra.mxu3 %vm811_vm0, %v1896_v29 }
 0x5b9   : > { %1179 = vadd.xlane.f32.xlu0 %v1178_v26 }
 0x5bb   : > { %v1168_v27 = vpop.f32.mrf.mxu1 }
 0x62c   : > { %v1180_v30 = vpop.xlane.xlu0 %1179 }
 0x62d   : > { %v1181_v31 = vmul.f32 %v1180_v30, %v2151_v9 }
 0x62f   : > { %v1182_v32 = vsub.f32 %v2247_v25, %v1181_v31 }
 0x631   : > { %v1183_v33 = vmul.f32 %v1182_v32, %v1182_v32 }
 0x633   : > { %v1184_v34 = vsel %vm811_vm0, %v1183_v33, 0.0 }
 0x634   : > { %1185 = vadd.xlane.f32.xlu1 %v1184_v34 }
 0x63b   : > { %v1282_v38 = vpop.f32.mrf.mxu3 }
 0x63c   : > { %v1283_v42 = vadd.f32 %v1940_v37, %v1282_v38 }
 0x63e   : > { %v1295_v44 = vpack.c.bf16 %v1283_v42, %v1283_v42 }
 0x640   : > { %1303 = vrot.lane.b32.xlu2 %v1295_v44, %s1998_s8  ;;  %v1311_v48 = vunpack.c.l.b16 %v1295_v44 }
 0x643   : > { %v1284_v45 = vpop.f32.mrf.mxu3 }
 0x644   : > { %v1285_v43 = vadd.f32 %v1940_v37, %v1284_v45 }
 0x646   : > { %v1296_v46 = vpack.c.bf16 %v1285_v43, %v1285_v43 }
 0x648   : > { %1305 = vrot.lane.b32.xlu0 %v1296_v46, %s1998_s8  ;;  %v1312_v51 = vunpack.c.l.b16 %v1296_v46  ;;  %1309 = vrot.lane.b32.xlu2 %v1296_v46, %s1996_s3 }
 0x64a   : > { %v2280_v53 = vpack.c.b16 %v1312_v51, %v1311_v48 }
 0x64c   : > { %v1318_v54 = vsel %vm898_vm6, %v2280_v53, 0 }
 0x64d   : > { %1307 = vrot.lane.b32.xlu1 %v1295_v44, %s1996_s3  ;;  %1327 = vmatpush.bf16.xpose.msrb.mxu0 %v1318_v54 }
 0x650   : > { %1301 = vrot.lane.b32.xlu0 %v1296_v46, %s2444_s4  ;;  %1299 = vrot.lane.b32.xlu2 %v1295_v44, %s2444_s4 }
 0x69a   : > { %v1304_v0 = vpop.permute.xlu2 %1303 }
 0x69b   : > { %v1355_v3 = vunpack.c.l.b16 %v1304_v0 }
 0x6a2   : > { %v1310_v10 = vpop.permute.xlu2 %1309 }
 0x6a3   : > { %v1378_v11 = vunpack.c.l.b16 %v1310_v10 }
 0x6a7   : > { %v1186_v39 = vpop.xlane.xlu1 %1185 }
 0x6a8   : > { %v1187_v41 = vmul.f32 %v1186_v39, %v2151_v9 }
 0x6aa   : > { %v1188_v40 = vadd.f32 1e-05, %v1187_v41  ;;  %v1300_v16 = vpop.permute.xlu2 %1299 }
 0x6ab   : > { %v1333_v17 = vunpack.c.l.b16 %v1300_v16 }
 0x6ac   : > { %1967 = vrsqrt.f32 %v1188_v40  ;;  %vm1195_vm2 = vweird.f32 %v1188_v40 }
 0x6b2   : > { %v1968_v49 = vpop.eup %1967 }
 0x6b3   : > { %v1190_v50 = vmul.f32 %v1968_v49, %v1188_v40  ;;  %vm1196_vm1 = vweird.f32 %v1968_v49 }
 0x6b4   : > { %vm1197_vm3 = vmor %vm1195_vm2, %vm1196_vm1 }
 0x6b5   : > { %v1191_v52 = vmul.f32 %v1968_v49, %v1190_v50 }
 0x6b7   : > { %v1192_v47 = vmul.f32 0.5, %v1191_v52 }
 0x6b9   : > { %v1193_v55 = vsub.f32 1.5, %v1192_v47 }
 0x6ba   : > { %v1306_v2 = vpop.permute.xlu0 %1305 }
 0x6bb   : > { %v1194_v56 = vmul.f32 %v1968_v49, %v1193_v55  ;;  %v1356_v4 = vunpack.c.l.b16 %v1306_v2 }
 0x6bd   : > { %v1198_v58 = vsel %vm1197_vm3, %v1968_v49, %v1194_v56  ;;  %v2293_v5 = vpack.c.b16 %v1356_v4, %v1355_v3 }
 0x6be   : > { %v1199_v59 = vmul.f32 %v1198_v58, %v1182_v32 }
 0x6bf   : > { %v1308_v6 = vpop.permute.xlu1 %1307  ;;  %v1362_v7 = vsel %vm898_vm6, %v2293_v5, 0 }
 0x6c0   : > { %v1203_v61 = vmul.f32 %v1938_v57, %v1199_v59  ;;  %1371 = vmatpush.bf16.xpose.msrb.mxu2 %v1362_v7  ;;  %v1377_v8 = vunpack.c.l.b16 %v1308_v6 }
 0x6c2   : > { %v1207_v62 = vadd.f32 %v1939_v60, %v1203_v61  ;;  %v2297_v12 = vpack.c.b16 %v1378_v11, %v1377_v8  ;;  %v1302_v13 = vpop.permute.xlu0 %1301 }
 0x6c3   : > { %v1334_v15 = vunpack.c.l.b16 %v1302_v13 }
 0x6c4   : > { %v1208_v63 = vpack.c.bf16 %v1207_v62, %v1207_v62  ;;  %v1384_v14 = vsel %vm898_vm6, %v2297_v12, 0 }
 0x6c5   : > { %1393 = vmatpush.bf16.xpose.msrb.mxu3 %v1384_v14  ;;  %v1335_v18 = vpack.c.b16 %v1334_v15, %v1333_v17 }
 0x6c6   : > { %1836 = vmatmul.msk.bf16.vlgmr.msra.gmra.mxu2 %vm811_vm0, %v1208_v63 }
 0x6c7   : > { %v1340_v20 = vsel %vm898_vm6, %v1335_v18, 0 }
 0x6c8   : > { %1349 = vmatpush.bf16.xpose.msrb.mxu1 %v1340_v20 }
 0x749   : > { %v1241_v21 = vpop.f32.mrf.mxu2 }
 0x74a   : > { %v1242_v22 = vadd.f32 %v1941_v19, %v1241_v21 }
 0x74c   : > { %v1287_v23 = vpack.c.bf16 %v1242_v22, %v1242_v22 }
 0x74e   : > { %1289 = vrot.lane.b32.xlu0 %v1287_v23, %s2444_s4  ;;  %1293 = vrot.lane.b32.xlu1 %v1287_v23, %s1996_s3  ;;  %s2445_s3 = smov 96  }
 0x74f   : > { %1291 = vrot.lane.b32.xlu2 %v1287_v23, %s1998_s8  ;;  %1850 = vmatmul.msk.bf16.vlgmr.msrb.gmra.mxu0 %vm898_vm6, %v1287_v23  ;;  %s2446_s8 = smov 8  }
 0x751   : > { %v1243_v24 = vpop.f32.mrf.mxu2 }
 0x7a9   : > { %v1292_v26 = vpop.permute.xlu2 %1291 }
 0x7aa   : > { %1852 = vmatmul.msk.bf16.vlgmr.msrb.gmra.mxu2 %vm898_vm6, %v1292_v26 }
 0x7c0   : > { %v1294_v27 = vpop.permute.xlu1 %1293  ;;  %v1290_v28 = vpop.permute.xlu0 %1289 }
 0x7c1   : > { %1851 = vmatmul.msk.bf16.vlgmr.msrb.gmra.mxu1 %vm898_vm6, %v1290_v28  ;;  %1853 = vmatmul.msk.bf16.vlgmr.msrb.gmra.mxu3 %vm898_vm6, %v1294_v27  ;;  %v1906_v27 = vld [vmem:[%s2407_s16 + $0x8] sm:$0xff]  ;;  %v1905_v28 = vld [vmem:[%s2407_s16] sm:$0xff] }
 0x7cc   : > { %v1329_v1 = vpop.f32.mrf.mxu0 }
 0x7cd   : > { %v1399_v33 = vsel %vm1133_vm14, %v1329_v1, -inf }
 0x7d4   : > { %v1331_v29 = vpop.f32.mrf.mxu0 }
 0x82d   : > { %v1373_v30 = vpop.f32.mrf.mxu2 }
 0x82e   : > { %v1405_v31 = vsel %vm1133_vm14, %v1373_v30, -inf }
 0x82f   : > { %1406 = vmax.xlane.f32.xlu2 %v1405_v31 }
 0x835   : > { %v1375_v32 = vpop.f32.mrf.mxu2 }
 0x837   : > { %1400 = vmax.xlane.f32.xlu2 %v1399_v33 }
 0x83e   : > { %v1351_v34 = vpop.f32.mrf.mxu1 }
 0x83f   : > { %v1402_v35 = vsel %vm1133_vm14, %v1351_v34, -inf }
 0x840   : > { %1403 = vmax.xlane.f32.xlu0 %v1402_v35  ;;  %v1942_v35 = vld [vmem:[%s2408_s17] ss:$0 sm:$0xff] }
 0x844   : > { %v1395_v36 = vpop.f32.mrf.mxu3 }
 0x845   : > { %v1408_v37 = vsel %vm1133_vm14, %v1395_v36, -inf }
 0x846   : > { %1409 = vmax.xlane.f32.xlu1 %v1408_v37  ;;  %v1353_v38 = vpop.f32.mrf.mxu1 }
 0x84c   : > { %v1397_v39 = vpop.f32.mrf.mxu3 }
 0x8a2   : > { %v1407_v41 = vpop.xlane.xlu2 %1406 }
 0x8a3   : > { %v1413_v42 = vsub.f32 %v1373_v30, %v1407_v41 }
 0x8a5   : > { %v1419_v40 = vmul.f32 1.442695, %v1413_v42 }
 0x8a7   : > { %1969 = vpow2.f32 %v1419_v40 }
 0x8aa   : > { %v1401_v56 = vpop.xlane.xlu2 %1400 }
 0x8ab   : > { %v1411_v57 = vsub.f32 %v1329_v1, %v1401_v56 }
 0x8ad   : > { %v1970_v44 = vpop.eup %1969  ;;  %v1415_v58 = vmul.f32 1.442695, %v1411_v57 }
 0x8ae   : > { %v1429_v45 = vsel %vm1133_vm14, %v1970_v44, 0.0 }
 0x8af   : > { %1430 = vadd.xlane.f32.xlu1 %v1429_v45 }
 0x8b3   : > { %v1404_v43 = vpop.xlane.xlu0 %1403 }
 0x8b4   : > { %v1412_v46 = vsub.f32 %v1351_v34, %v1404_v43 }
 0x8b6   : > { %v1417_v48 = vmul.f32 1.442695, %v1412_v46  ;;  %v1908_v46 = vld [vmem:[%s2411_s20 + $0x8] sm:$0xff] }
 0x8b8   : > { %1971 = vpow2.f32 %v1417_v48  ;;  %v1912_v48 = vld [vmem:[%s2413_s22 + $0x18] sm:$0xff] }
 0x8b9   : > { %v1410_v49 = vpop.xlane.xlu1 %1409 }
 0x8ba   : > { %v1414_v50 = vsub.f32 %v1395_v36, %v1410_v49 }
 0x8bc   : > { %v1421_v51 = vmul.f32 1.442695, %v1414_v50 }
 0x8be   : > { %v1972_v52 = vpop.eup %1971  ;;  %1973 = vpow2.f32 %v1421_v51  ;;  %v1911_v51 = vld [vmem:[%s2413_s22 + $0x10] sm:$0xff] }
 0x8bf   : > { %v1426_v47 = vsel %vm1133_vm14, %v1972_v52, 0.0  ;;  %1975 = vpow2.f32 %v1415_v58 }
 0x8c0   : > { %1427 = vadd.xlane.f32.xlu2 %v1426_v47 }
 0x8c4   : > { %v1974_v54 = vpop.eup %1973 }
 0x8c5   : > { %v1432_v55 = vsel %vm1133_vm14, %v1974_v54, 0.0  ;;  %v1976_v59 = vpop.eup %1975 }
 0x8c6   : > { %1433 = vadd.xlane.f32.xlu0 %v1432_v55  ;;  %v1423_v60 = vsel %vm1133_vm14, %v1976_v59, 0.0 }
 0x8c8   : > { %1485 = vrot.lane.b32.xlu1 %v2293_v5, %s2445_s3 }
 0x8d0   : > { %1447 = vrot.lane.b32.xlu1 %v2280_v53, %s2445_s3 }
 0x8d8   : > { %1466 = vrot.lane.b32.xlu2 %v1335_v18, %s2445_s3 }
 0x8da   : > { %1504 = vrot.lane.b32.xlu0 %v2297_v12, %s2445_s3  ;;  %s783_s3 = scalar_lea.vmem %s2415_s24, %s2449_s1 }
 0x904   : > { %1424 = vadd.xlane.f32.xlu0 %v1423_v60 }
 0x922   : > { %v1431_v61 = vpop.xlane.xlu1 %1430 }
 0x923   : > { %1977 = vrcp.f32 %v1431_v61  ;;  %v1944_v61 = vld [vmem:[%s2410_s19] ss:$0 sm:$0xff] }
 0x929   : > { %v1978_v63 = vpop.eup %1977 }
 0x92a   : > { %v1441_v0 = vmul.f32 %v1978_v63, %v1970_v44 }
 0x92c   : > { %v1445_v5 = vpack.c.bf16 %v1441_v0, %v1441_v0 }
 0x933   : > { %v1428_v62 = vpop.xlane.xlu2 %1427 }
 0x934   : > { %1979 = vrcp.f32 %v1428_v62 }
 0x939   : > { %v1434_v7 = vpop.xlane.xlu0 %1433 }
 0x93a   : > { %v1980_v53 = vpop.eup %1979  ;;  %v1486_v2 = vpop.permute.xlu1 %1485  ;;  %1981 = vrcp.f32 %v1434_v7 }
 0x93b   : > { %v1440_v3 = vmul.f32 %v1980_v53, %v1972_v52  ;;  %1498 = vmatpush.bf16.msra.mxu2 %v1486_v2  ;;  %v1467_v4 = vpop.permute.xlu2 %1466  ;;  %v1910_v53 = vld [vmem:[%s2413_s22 + $0x8] sm:$0xff]  ;;  %v1909_v2 = vld [vmem:[%s2413_s22] sm:$0xff] }
 0x93c   : > { %1479 = vmatpush.bf16.msra.mxu1 %v1467_v4 }
 0x93d   : > { %v1444_v6 = vpack.c.bf16 %v1440_v3, %v1440_v3  ;;  %v1945_v3 = vld [vmem:[%s2412_s21] ss:$0 sm:$0xff] }
 0x93e   : > { %1856 = vmatmul.msk.bf16.vlgmr.msra.gmra.mxu2 %vm1133_vm14, %v1445_v5 }
 0x93f   : > { %1855 = vmatmul.msk.bf16.vlgmr.msra.gmra.mxu1 %vm1133_vm14, %v1444_v6  ;;  %1688 = vmatpush.bf16.msrb.mxu2 %v1912_v48 }
 0x940   : > { %v1982_v10 = vpop.eup %1981  ;;  %1639 = vmatpush.bf16.msrb.mxu1 %v1908_v46 }
 0x941   : > { %v1442_v11 = vmul.f32 %v1982_v10, %v1974_v54  ;;  %v1946_v10 = vld [vmem:[%s2414_s23] ss:$0 sm:$0xff] }
 0x942   : > { %v1448_v8 = vpop.permute.xlu1 %1447 }
 0x943   : > { %1460 = vmatpush.bf16.msra.mxu0 %v1448_v8  ;;  %v1446_v13 = vpack.c.bf16 %v1442_v11, %v1442_v11  ;;  %1689 = vmatpush.bf16.msrb.mxu2 %v1911_v51 }
 0x947   : > { %1564 = vmatpush.bf16.msrb.mxu0 %v1906_v27  ;;  %1690 = vmatpush.bf16.msrb.mxu2 %v1910_v53 }
 0x94b   : > { %1565 = vmatpush.bf16.msrb.mxu0 %v1905_v28  ;;  %1691 = vmatpush.bf16.msrb.mxu2 %v1909_v2 }
 0x94c   : > { %v1505_v12 = vpop.permute.xlu0 %1504 }
 0x94d   : > { %1517 = vmatpush.bf16.msra.mxu3 %v1505_v12 }
 0x950   : > { %1857 = vmatmul.msk.bf16.vlgmr.msra.gmra.mxu3 %vm1133_vm14, %v1446_v13 }
 0x977   : > { %v1425_v14 = vpop.xlane.xlu0 %1424 }
 0x978   : > { %1983 = vrcp.f32 %v1425_v14 }
 0x97e   : > { %v1984_v15 = vpop.eup %1983 }
 0x97f   : > { %v1439_v16 = vmul.f32 %v1984_v15, %v1976_v59 }
 0x981   : > { %v1443_v17 = vpack.c.bf16 %v1439_v16, %v1439_v16 }
 0x983   : > { %1854 = vmatmul.msk.bf16.vlgmr.msra.gmra.mxu0 %vm1133_vm14, %v1443_v17 }
 0x9bc   : > { %v1481_v18 = vpop.f32.mrf.mxu1 }
 0x9bd   : > { %1524 = vrot.lane.b32.xlu2 %v1481_v18, %s2446_s8 }
 0x9c1   : > { %v1500_v19 = vpop.f32.mrf.mxu2 }
 0x9c2   : > { %1528 = vrot.lane.b32.xlu1 %v1500_v19, %s2447_s7 }
 0x9c4   : > { %v1483_v20 = vpop.f32.mrf.mxu1 }
 0x9c9   : > { %v1502_v21 = vpop.f32.mrf.mxu2 }
 0x9d3   : > { %v1519_v22 = vpop.f32.mrf.mxu3 }
 0x9d4   : > { %1532 = vrot.lane.b32.xlu2 %v1519_v22, %s2448_s27 }
 0x9db   : > { %v1521_v23 = vpop.f32.mrf.mxu3 }
 0xa00   : > { %v1462_v24 = vpop.f32.mrf.mxu0 }
 0xa08   : > { %v1464_v26 = vpop.f32.mrf.mxu0 }
 0xa17   : > { %v1525_v1 = vpop.permute.xlu2 %1524 }
 0xa18   : > { %v1535_v29 = vsel %vm898_vm6, %v1462_v24, %v1525_v1 }
 0xa2e   : > { %v1533_v31 = vpop.permute.xlu2 %1532 }
 0xa34   : > { %v1529_v30 = vpop.permute.xlu1 %1528 }
 0xa35   : > { %v1536_v32 = vsel %vm1133_vm14, %v1535_v29, %v1529_v30 }
 0xa36   : > { %v1537_v33 = vsel %vm1135_vm15, %v1536_v32, %v1533_v31 }
 0xa37   : > { %v1538_v34 = vpack.c.bf16 %v1537_v33, %v1537_v33 }
 0xa39   : > { %1866 = vmatmul.msk.bf16.vlgmr.msrb.gmra.mxu0 %vm811_vm0, %v1538_v34 }
 0xab6   : > { %v1567_v36 = vpop.f32.mrf.mxu0 }
 0xab7   : > { %v1571_v37 = vadd.f32 %v1567_v36, %v2247_v25  ;;  %v1907_v25 = vld [vmem:[%s2411_s20] sm:$0xff] }
 0xab8   : > { %1640 = vmatpush.bf16.msrb.mxu1 %v1907_v25 }
 0xab9   : > { %v1576_v38 = vadd.f32 %v1942_v35, %v1571_v37 }
 0xabb   : > { %v1579_v39 = vsel %vm811_vm0, %v1576_v38, 0.0 }
 0xabc   : > { %1580 = vadd.xlane.f32.xlu1 %v1579_v39 }
 0xabe   : > { %v1569_v41 = vpop.f32.mrf.mxu0 }
 0xb2f   : > { %v1581_v42 = vpop.xlane.xlu1 %1580 }
 0xb30   : > { %v1582_v40 = vmul.f32 %v1581_v42, %v2151_v9 }
 0xb32   : > { %v1583_v44 = vsub.f32 %v1576_v38, %v1582_v40 }
 0xb34   : > { %v1584_v45 = vmul.f32 %v1583_v44, %v1583_v44 }
 0xb36   : > { %v1585_v43 = vsel %vm811_vm0, %v1584_v45, 0.0 }
 0xb37   : > { %1586 = vadd.xlane.f32.xlu2 %v1585_v43 }
 0xbaa   : > { %v1587_v49 = vpop.xlane.xlu2 %1586 }
 0xbab   : > { %v1588_v50 = vmul.f32 %v1587_v49, %v2151_v9  ;;  %v1943_v9 = vld [vmem:[%s2409_s18] ss:$0 sm:$0xff] }
 0xbad   : > { %v1589_v52 = vadd.f32 1e-05, %v1588_v50 }
 0xbaf   : > { %1985 = vrsqrt.f32 %v1589_v52  ;;  %vm1596_vm5 = vweird.f32 %v1589_v52 }
 0xbb5   : > { %v1986_v47 = vpop.eup %1985 }
 0xbb6   : > { %v1591_v54 = vmul.f32 %v1986_v47, %v1589_v52  ;;  %vm1597_vm4 = vweird.f32 %v1986_v47 }
 0xbb7   : > { %vm1598_vm6 = vmor %vm1596_vm5, %vm1597_vm4 }
 0xbb8   : > { %v1592_v55 = vmul.f32 %v1986_v47, %v1591_v54 }
 0xbba   : > { %v1593_v56 = vmul.f32 0.5, %v1592_v55 }
 0xbbc   : > { %v1594_v57 = vsub.f32 1.5, %v1593_v56 }
 0xbbe   : > { %v1595_v58 = vmul.f32 %v1986_v47, %v1594_v57 }
 0xbc0   : > { %v1599_v59 = vsel %vm1598_vm6, %v1986_v47, %v1595_v58 }
 0xbc1   : > { %v1600_v60 = vmul.f32 %v1599_v59, %v1583_v44 }
 0xbc3   : > { %v1604_v62 = vmul.f32 %v1943_v9, %v1600_v60 }
 0xbc5   : > { %v1608_v63 = vadd.f32 %v1944_v61, %v1604_v62 }
 0xbc7   : > { %v1609_v0 = vpack.c.bf16 %v1608_v63, %v1608_v63 }
 0xbc9   : > { %1875 = vmatmul.msk.bf16.vlgmr.msrb.gmra.mxu1 %vm811_vm0, %v1609_v0  ;;  %vm1704_vm0 = vcmask 257024  }
 0xc46   : > { %v1642_v4 = vpop.f32.mrf.mxu1 }
 0xc47   : > { %v1643_v5 = vadd.f32 %v1945_v3, %v1642_v4 }
 0xc49   : > { %v1646_v6 = vmax.f32 %v1643_v5, 0.0 }
 0xc4b   : > { %v1647_v7 = vpack.c.bf16 %v1646_v6, %v1646_v6 }
 0xc4d   : > { %1892 = vmatmul.msk.bf16.vlgmr.msrb.gmra.mxu2 %vm1680_vm7, %v1647_v7 }
 0xc4e   : > { %v1644_v8 = vpop.f32.mrf.mxu1 }
 0xcd0   : > { %v1693_v11 = vpop.f32.mrf.mxu2 }
 0xcd1   : > { %v1697_v12 = vadd.f32 %v1693_v11, %v1576_v38 }
 0xcd3   : > { %v1702_v13 = vadd.f32 %v1946_v10, %v1697_v12 }
 0xcd5   : > { %v1703_v14 = vpack.c.bf16 %v1702_v13, %v1702_v13 }
 0xcd7   : > { %1705 = vst.msk [vmem:[%s783_s3] sm:$0xf] %vm1704_vm0, %v1703_v14 }
 0xcd8   : > { %v1695_v15 = vpop.f32.mrf.mxu2 }
 0xcd9 PF: > { %s34_s5 = sadd.s32 1, %s1993_s5  }
 0xcda   : > { %p31_p4 = scmp.ge.s32.totalorder %s34_s5, 4  }
 0xcdc   :  { %33 = sbr.rel (!%p31_p4) target bundleno = 10 (0xa), region = 155 }

</bundles_post_ra>
